<compile_context>
chip_gen: v6e
topology: v6e:2x2x1
jax: 0.10.0
libtpu: 0.0.40
codegen_flags: <defaults>
</compile_context>

<pallas_src>
import functools

import jax
import jax.numpy as jnp
from jax.experimental import pallas as pl
from jax.experimental.pallas import tpu as pltpu

# ----------------------------- config (synthetic, small) ---------------------
VOCAB = 40            # len(pyfoal.load.phonemes())
CHANNELS = 32         # pyfoal.PHONEME_EMBEDDING_SIZE
ATTENTION_WIDTH = 16  # pyfoal.ATTENTION_WIDTH
KERNEL_SIZES = (3, 3, 3, 3, 1)  # pyfoal.TEXT_ENCODER_KERNEL_SIZES (odd sizes only)
LSTM = False          # pyfoal.LSTM

BATCH = 2
SEQ = 8

assert all(k % 2 == 1 for k in KERNEL_SIZES), "'same' padding math assumes odd K"
PAD_MAX = max((k - 1) // 2 for k in KERNEL_SIZES)
_HALO = ((PAD_MAX + 7) // 8) * 8      # left halo rows, 8-aligned interior writes
_LANES = 128
_PREC = jax.lax.Precision.HIGHEST


def _round_up(x, m):
    return ((x + m - 1) // m) * m


# ----------------------------- Pallas kernel ---------------------------------
def _conv1d_same(xpad_ref, x, w_ref, b_ref, row_mask, relu):
    """Conv1d 'same' (odd K) on a (T_pad, Cin) activation slab.

    Taps are K accumulated MXU matmuls against (Cin, Cout) weight slices
    (no lane-axis im2col).  For K > 1 the activation is written once into the
    8-aligned interior of the zero-halo scratch and the K taps are read back
    as static sublane-shifted ref slices.
    """
    K, cin, _ = w_ref.shape
    Tp = x.shape[0]
    pad = (K - 1) // 2

    if K == 1:
        y = jnp.dot(x, w_ref[0], preferred_element_type=jnp.float32, precision=_PREC)
    else:
        assert cin == xpad_ref.shape[1]
        xw = x if row_mask is None else x * row_mask
        xpad_ref[_HALO:_HALO + Tp, :] = xw                     # tile-aligned store
        start = _HALO - pad
        y = jnp.dot(xpad_ref[start:start + Tp, :], w_ref[0],
                    preferred_element_type=jnp.float32, precision=_PREC)
        for k in range(1, K):
            y = y + jnp.dot(xpad_ref[start + k:start + k + Tp, :], w_ref[k],
                            preferred_element_type=jnp.float32, precision=_PREC)
    y = y + b_ref[...]
    return jnp.maximum(y, 0.0) if relu else y


def text_encoder_kernel(idx_ref, emb_ref,
                        w1_ref, b1_ref, w2_ref, b2_ref, w3_ref, b3_ref,
                        w4_ref, b4_ref, w5_ref, b5_ref,
                        out_ref, xpad_ref, *, t_real):
    _, C = xpad_ref.shape
    Tp = idx_ref.shape[0]
    V = emb_ref.shape[0]

    # Zero only the halo rows the conv taps ever read (2*PAD_MAX rows).  Done
    # every grid step so correctness does not depend on how the parallel batch
    # axis is split across TensorCores; interior rows are overwritten each layer.
    if PAD_MAX > 0:
        zeros = jnp.zeros((PAD_MAX, C), jnp.float32)
        xpad_ref[_HALO - PAD_MAX:_HALO, :] = zeros
        xpad_ref[_HALO + Tp:_HALO + Tp + PAD_MAX, :] = zeros

    # Wrapper-padded sequence rows (t_real < Tp) must stay zero inside the halo.
    if t_real < Tp:
        row_mask = (jax.lax.broadcasted_iota(jnp.int32, (Tp, 1), 0)
                    < t_real).astype(jnp.float32)
    else:
        row_mask = None

    # Embedding lookup: in-kernel one-hot (iota == idx) matmul on the MXU.
    ids = idx_ref[...]                                              # (Tp, 1) int32
    onehot = (jax.lax.broadcasted_iota(jnp.int32, (Tp, V), 1) == ids
              ).astype(jnp.float32)                                 # (Tp, V)
    x = jnp.dot(onehot, emb_ref[...], preferred_element_type=jnp.float32,
                precision=_PREC)                                    # (Tp, C)

    # input_stack: conv + relu, x3
    x = _conv1d_same(xpad_ref, x, w1_ref, b1_ref, row_mask, relu=True)
    x = _conv1d_same(xpad_ref, x, w2_ref, b2_ref, row_mask, relu=True)
    x = _conv1d_same(xpad_ref, x, w3_ref, b3_ref, row_mask, relu=True)

    # output_stack: conv + relu, conv (last layer pointwise, lane-padded Cout)
    x = _conv1d_same(xpad_ref, x, w4_ref, b4_ref, row_mask, relu=True)
    x = _conv1d_same(xpad_ref, x, w5_ref, b5_ref, row_mask, relu=False)

    out_ref[...] = x.astype(out_ref.dtype)        # (Tp, 128) full-lane store


# ----------------------------- wrapper ----------------------------------------
def _full_spec(shape):
    nd = len(shape)
    return pl.BlockSpec(shape, lambda b, _nd=nd: (0,) * _nd)


def text_encoder(phonemes, params):
    """phonemes: (B, 1, T) int32.  Returns (B, ATTENTION_WIDTH, T) float32."""
    B, _, T = phonemes.shape
    V, C = params["emb"].shape
    A = params["w5"].shape[2]

    # squeeze(1); pad T to a sublane multiple so per-batch row blocks are aligned.
    T_pad = _round_up(T, 8)
    idx = phonemes[:, 0, :].astype(jnp.int32)
    if T_pad != T:
        idx = jnp.pad(idx, ((0, 0), (0, T_pad - T)))
    idx = idx.reshape(B * T_pad, 1)

    # Lane-dense output: pad final-layer Cout to 128; slice back after the call.
    A_pad = _round_up(A, _LANES)
    w5, b5 = params["w5"], params["b5"]
    if A_pad != A:
        w5 = jnp.pad(w5, ((0, 0), (0, 0), (0, A_pad - A)))
        b5 = jnp.pad(b5, ((0, 0), (0, A_pad - A)))

    TP = _round_up(_HALO + T_pad + PAD_MAX, 8)     # halo scratch rows (8-aligned)

    ks = KERNEL_SIZES
    flops = 2 * B * T_pad * (V * C + (ks[0] + ks[1] + ks[2]) * C * C
                             + ks[3] * C * 2 * C + ks[4] * 2 * C * A_pad)
    bytes_accessed = 4 * (int(idx.size) + V * C
                          + sum(int(params[f"w{i}"].size) for i in range(1, 5))
                          + sum(int(params[f"b{i}"].size) for i in range(1, 5))
                          + int(w5.size) + int(b5.size)
                          + B * T_pad * A_pad)

    kernel = functools.partial(text_encoder_kernel, t_real=T)

    out = pl.pallas_call(
        kernel,
        out_shape=jax.ShapeDtypeStruct((B * T_pad, A_pad), jnp.float32),
        grid=(B,),
        in_specs=[
            pl.BlockSpec((T_pad, 1), lambda b: (b, 0)),     # per-batch index rows
            _full_spec(params["emb"].shape),
            _full_spec(params["w1"].shape), _full_spec(params["b1"].shape),
            _full_spec(params["w2"].shape), _full_spec(params["b2"].shape),
            _full_spec(params["w3"].shape), _full_spec(params["b3"].shape),
            _full_spec(params["w4"].shape), _full_spec(params["b4"].shape),
            _full_spec(w5.shape), _full_spec(b5.shape),
        ],
        out_specs=pl.BlockSpec((T_pad, A_pad), lambda b: (b, 0)),
        scratch_shapes=[pltpu.VMEM((TP, C), jnp.float32)],
        compiler_params=pltpu.CompilerParams(dimension_semantics=("parallel",)),
        cost_estimate=pl.CostEstimate(flops=flops, transcendentals=0,
                                      bytes_accessed=bytes_accessed),
    )(idx, params["emb"],
      params["w1"], params["b1"], params["w2"], params["b2"],
      params["w3"], params["b3"], params["w4"], params["b4"], w5, b5)

    # kernel layout (B*T_pad, A_pad) -> PyTorch NCL (B, A, T)
    out = out.reshape(B, T_pad, A_pad)[:, :T, :A]
    return jnp.transpose(out, (0, 2, 1))


# ----------------------------- parameters --------------------------------------
def init_params(key):
    ks = KERNEL_SIZES
    C, A, V = CHANNELS, ATTENTION_WIDTH, VOCAB
    shapes = {
        "emb": (V, C),
        # conv weights stored as (K, Cin, Cout); biases as (1, Cout)
        "w1": (ks[0], C, C), "b1": (1, C),
        "w2": (ks[1], C, C), "b2": (1, C),
        "w3": (ks[2], C, C), "b3": (1, C),
        "w4": (ks[3], C, 2 * C), "b4": (1, 2 * C),
        "w5": (ks[4], 2 * C, A), "b5": (1, A),
    }
    params = {}
    for name, shape in shapes.items():
        key, sub = jax.random.split(key)
        params[name] = 0.1 * jax.random.normal(sub, shape, jnp.float32)
    return params


# ----------------------------- pure-JAX reference -------------------------------
def reference(phonemes, params):
    idx = phonemes[:, 0, :]
    x = params["emb"][idx]                 # (B, T, C)
    x = jnp.transpose(x, (0, 2, 1))        # (B, C, T)

    def conv(x, w, b):
        wt = jnp.transpose(w, (2, 1, 0))   # (Cout, Cin, K)  (PyTorch weight layout)
        y = jax.lax.conv_general_dilated(
            x, wt, window_strides=(1,), padding="SAME",
            dimension_numbers=("NCH", "OIH", "NCH"), precision=_PREC)
        return y + b.reshape(1, -1, 1)

    x = jax.nn.relu(conv(x, params["w1"], params["b1"]))
    x = jax.nn.relu(conv(x, params["w2"], params["b2"]))
    x = jax.nn.relu(conv(x, params["w3"], params["b3"]))
    x = jax.nn.relu(conv(x, params["w4"], params["b4"]))
    x = conv(x, params["w5"], params["b5"])
    return x                               # (B, A, T)


# ----------------------------- main ---------------------------------------------
if __name__ == "__main__":
    key = jax.random.PRNGKey(0)
    pkey, ikey = jax.random.split(key)

    params = init_params(pkey)
    phonemes = jax.random.randint(ikey, (BATCH, 1, SEQ), 0, VOCAB, dtype=jnp.int32)

    out = jax.jit(functools.partial(text_encoder, params=params))(phonemes)
    out = jax.block_until_ready(out)

    ref = jax.block_until_ready(reference(phonemes, params))

    assert out.shape == (BATCH, ATTENTION_WIDTH, SEQ), out.shape
    err = float(jnp.max(jnp.abs(out - ref)))
    assert jnp.allclose(out, ref, rtol=1e-4, atol=1e-4), err

    print("KERNEL_OK")
</pallas_src>

<mosaic_0001>
module attributes {stable_mosaic.version = 11 : i64} {
  func.func @text_encoder_kernel(%arg0: i32, %arg1: memref<8x1xi32, #tpu.memory_space<vmem>>, %arg2: memref<40x32xf32, #tpu.memory_space<vmem>>, %arg3: memref<3x32x32xf32, #tpu.memory_space<vmem>>, %arg4: memref<1x32xf32, #tpu.memory_space<vmem>>, %arg5: memref<3x32x32xf32, #tpu.memory_space<vmem>>, %arg6: memref<1x32xf32, #tpu.memory_space<vmem>>, %arg7: memref<3x32x32xf32, #tpu.memory_space<vmem>>, %arg8: memref<1x32xf32, #tpu.memory_space<vmem>>, %arg9: memref<3x32x64xf32, #tpu.memory_space<vmem>>, %arg10: memref<1x64xf32, #tpu.memory_space<vmem>>, %arg11: memref<1x64x128xf32, #tpu.memory_space<vmem>>, %arg12: memref<1x128xf32, #tpu.memory_space<vmem>>, %arg13: memref<8x128xf32, #tpu.memory_space<vmem>>, %arg14: memref<24x32xf32, #tpu.memory_space<vmem>>) attributes {dimension_semantics = [#tpu.dimension_semantics<parallel>], iteration_bounds = array<i64: 2>, scalar_prefetch = 0 : i64, scratch_operands = 1 : i64, tpu.core_type = #tpu.core_type<tc>, window_params = [{transform_indices = @transform_0, window_bounds = array<i64: 8, 1>}, {pipeline_mode = #tpu.pipeline_mode<synchronous>, transform_indices = @transform_1, window_bounds = array<i64: 40, 32>}, {pipeline_mode = #tpu.pipeline_mode<synchronous>, transform_indices = @transform_2, window_bounds = array<i64: 3, 32, 32>}, {pipeline_mode = #tpu.pipeline_mode<synchronous>, transform_indices = @transform_3, window_bounds = array<i64: 1, 32>}, {pipeline_mode = #tpu.pipeline_mode<synchronous>, transform_indices = @transform_4, window_bounds = array<i64: 3, 32, 32>}, {pipeline_mode = #tpu.pipeline_mode<synchronous>, transform_indices = @transform_5, window_bounds = array<i64: 1, 32>}, {pipeline_mode = #tpu.pipeline_mode<synchronous>, transform_indices = @transform_6, window_bounds = array<i64: 3, 32, 32>}, {pipeline_mode = #tpu.pipeline_mode<synchronous>, transform_indices = @transform_7, window_bounds = array<i64: 1, 32>}, {pipeline_mode = #tpu.pipeline_mode<synchronous>, transform_indices = @transform_8, window_bounds = array<i64: 3, 32, 64>}, {pipeline_mode = #tpu.pipeline_mode<synchronous>, transform_indices = @transform_9, window_bounds = array<i64: 1, 64>}, {pipeline_mode = #tpu.pipeline_mode<synchronous>, transform_indices = @transform_10, window_bounds = array<i64: 1, 64, 128>}, {pipeline_mode = #tpu.pipeline_mode<synchronous>, transform_indices = @transform_11, window_bounds = array<i64: 1, 128>}, {transform_indices = @transform_12, window_bounds = array<i64: 8, 128>}]} {
    %cst = arith.constant 0.000000e+00 : f32
    %0 = vector.broadcast %cst : f32 to vector<1x32xf32>
    %c7 = arith.constant 7 : index
    %c0 = arith.constant 0 : index
    %1 = vector.load %arg14[%c7, %c0] : memref<24x32xf32, #tpu.memory_space<vmem>>, vector<1x32xf32>
    tpu.vector_store %arg14[%c7, %c0], %0 {strides = array<i32>} : memref<24x32xf32, #tpu.memory_space<vmem>>, vector<1x32xf32>,
    %c16 = arith.constant 16 : index
    %c0_0 = arith.constant 0 : index
    %2 = vector.load %arg14[%c16, %c0_0] : memref<24x32xf32, #tpu.memory_space<vmem>>, vector<1x32xf32>
    tpu.vector_store %arg14[%c16, %c0_0], %0 {strides = array<i32>} : memref<24x32xf32, #tpu.memory_space<vmem>>, vector<1x32xf32>,
    %c0_1 = arith.constant 0 : index
    %c0_2 = arith.constant 0 : index
    %3 = vector.load %arg1[%c0_1, %c0_2] : memref<8x1xi32, #tpu.memory_space<vmem>>, vector<8x1xi32>
    %4 = tpu.iota {dimensions = array<i32: 1>} : vector<8x40xi32>
    %5 = vector.broadcast %3 : vector<8x1xi32> to vector<8x40xi32>
    %6 = arith.cmpi eq, %4, %5 : vector<8x40xi32>
    %7 = arith.extui %6 : vector<8x40xi1> to vector<8x40xi32>
    %8 = arith.sitofp %7 : vector<8x40xi32> to vector<8x40xf32>
    %c0_3 = arith.constant 0 : index
    %c0_4 = arith.constant 0 : index
    %9 = vector.load %arg2[%c0_3, %c0_4] : memref<40x32xf32, #tpu.memory_space<vmem>>, vector<40x32xf32>
    %cst_5 = arith.constant dense<0.000000e+00> : vector<8x32xf32>
    %10 = tpu.matmul %8, %9, %cst_5 {dimension_numbers = #tpu.dot_dimension_numbers<[1], [0], [0], [1], [0, 0, 1, 1], [], []>, precision = #tpu.contract_precision<fp32>} : vector<8x40xf32>, vector<40x32xf32>, vector<8x32xf32> -> vector<8x32xf32>
    %c8 = arith.constant 8 : index
    %c0_6 = arith.constant 0 : index
    %11 = vector.load %arg14[%c8, %c0_6] : memref<24x32xf32, #tpu.memory_space<vmem>>, vector<8x32xf32>
    tpu.vector_store %arg14[%c8, %c0_6], %10 {strides = array<i32>} : memref<24x32xf32, #tpu.memory_space<vmem>>, vector<8x32xf32>,
    %c7_7 = arith.constant 7 : index
    %c0_8 = arith.constant 0 : index
    %12 = vector.load %arg14[%c7_7, %c0_8] : memref<24x32xf32, #tpu.memory_space<vmem>>, vector<8x32xf32>
    %c0_9 = arith.constant 0 : index
    %c0_10 = arith.constant 0 : index
    %c0_11 = arith.constant 0 : index
    %13 = vector.load %arg3[%c0_9, %c0_10, %c0_11] : memref<3x32x32xf32, #tpu.memory_space<vmem>>, vector<1x32x32xf32>
    %14 = vector.shape_cast %13 : vector<1x32x32xf32> to vector<32x32xf32>
    %cst_12 = arith.constant dense<0.000000e+00> : vector<8x32xf32>
    %15 = tpu.matmul %12, %14, %cst_12 {dimension_numbers = #tpu.dot_dimension_numbers<[1], [0], [0], [1], [0, 0, 1, 1], [], []>, precision = #tpu.contract_precision<fp32>} : vector<8x32xf32>, vector<32x32xf32>, vector<8x32xf32> -> vector<8x32xf32>
    %c8_13 = arith.constant 8 : index
    %c0_14 = arith.constant 0 : index
    %16 = vector.load %arg14[%c8_13, %c0_14] : memref<24x32xf32, #tpu.memory_space<vmem>>, vector<8x32xf32>
    %c1 = arith.constant 1 : index
    %c0_15 = arith.constant 0 : index
    %c0_16 = arith.constant 0 : index
    %17 = vector.load %arg3[%c1, %c0_15, %c0_16] : memref<3x32x32xf32, #tpu.memory_space<vmem>>, vector<1x32x32xf32>
    %18 = vector.shape_cast %17 : vector<1x32x32xf32> to vector<32x32xf32>
    %cst_17 = arith.constant dense<0.000000e+00> : vector<8x32xf32>
    %19 = tpu.matmul %16, %18, %cst_17 {dimension_numbers = #tpu.dot_dimension_numbers<[1], [0], [0], [1], [0, 0, 1, 1], [], []>, precision = #tpu.contract_precision<fp32>} : vector<8x32xf32>, vector<32x32xf32>, vector<8x32xf32> -> vector<8x32xf32>
    %20 = arith.addf %15, %19 : vector<8x32xf32>
    %c9 = arith.constant 9 : index
    %c0_18 = arith.constant 0 : index
    %21 = vector.load %arg14[%c9, %c0_18] : memref<24x32xf32, #tpu.memory_space<vmem>>, vector<8x32xf32>
    %c2 = arith.constant 2 : index
    %c0_19 = arith.constant 0 : index
    %c0_20 = arith.constant 0 : index
    %22 = vector.load %arg3[%c2, %c0_19, %c0_20] : memref<3x32x32xf32, #tpu.memory_space<vmem>>, vector<1x32x32xf32>
    %23 = vector.shape_cast %22 : vector<1x32x32xf32> to vector<32x32xf32>
    %cst_21 = arith.constant dense<0.000000e+00> : vector<8x32xf32>
    %24 = tpu.matmul %21, %23, %cst_21 {dimension_numbers = #tpu.dot_dimension_numbers<[1], [0], [0], [1], [0, 0, 1, 1], [], []>, precision = #tpu.contract_precision<fp32>} : vector<8x32xf32>, vector<32x32xf32>, vector<8x32xf32> -> vector<8x32xf32>
    %25 = arith.addf %20, %24 : vector<8x32xf32>
    %c0_22 = arith.constant 0 : index
    %c0_23 = arith.constant 0 : index
    %26 = vector.load %arg4[%c0_22, %c0_23] : memref<1x32xf32, #tpu.memory_space<vmem>>, vector<1x32xf32>
    %27 = vector.broadcast %26 : vector<1x32xf32> to vector<8x32xf32>
    %28 = arith.addf %25, %27 : vector<8x32xf32>
    %cst_24 = arith.constant 0.000000e+00 : f32
    %29 = vector.broadcast %cst_24 : f32 to vector<8x32xf32>
    %30 = arith.maximumf %28, %29 : vector<8x32xf32>
    %c8_25 = arith.constant 8 : index
    %c0_26 = arith.constant 0 : index
    %31 = vector.load %arg14[%c8_25, %c0_26] : memref<24x32xf32, #tpu.memory_space<vmem>>, vector<8x32xf32>
    tpu.vector_store %arg14[%c8_25, %c0_26], %30 {strides = array<i32>} : memref<24x32xf32, #tpu.memory_space<vmem>>, vector<8x32xf32>,
    %c7_27 = arith.constant 7 : index
    %c0_28 = arith.constant 0 : index
    %32 = vector.load %arg14[%c7_27, %c0_28] : memref<24x32xf32, #tpu.memory_space<vmem>>, vector<8x32xf32>
    %c0_29 = arith.constant 0 : index
    %c0_30 = arith.constant 0 : index
    %c0_31 = arith.constant 0 : index
    %33 = vector.load %arg5[%c0_29, %c0_30, %c0_31] : memref<3x32x32xf32, #tpu.memory_space<vmem>>, vector<1x32x32xf32>
    %34 = vector.shape_cast %33 : vector<1x32x32xf32> to vector<32x32xf32>
    %cst_32 = arith.constant dense<0.000000e+00> : vector<8x32xf32>
    %35 = tpu.matmul %32, %34, %cst_32 {dimension_numbers = #tpu.dot_dimension_numbers<[1], [0], [0], [1], [0, 0, 1, 1], [], []>, precision = #tpu.contract_precision<fp32>} : vector<8x32xf32>, vector<32x32xf32>, vector<8x32xf32> -> vector<8x32xf32>
    %c8_33 = arith.constant 8 : index
    %c0_34 = arith.constant 0 : index
    %36 = vector.load %arg14[%c8_33, %c0_34] : memref<24x32xf32, #tpu.memory_space<vmem>>, vector<8x32xf32>
    %c1_35 = arith.constant 1 : index
    %c0_36 = arith.constant 0 : index
    %c0_37 = arith.constant 0 : index
    %37 = vector.load %arg5[%c1_35, %c0_36, %c0_37] : memref<3x32x32xf32, #tpu.memory_space<vmem>>, vector<1x32x32xf32>
    %38 = vector.shape_cast %37 : vector<1x32x32xf32> to vector<32x32xf32>
    %cst_38 = arith.constant dense<0.000000e+00> : vector<8x32xf32>
    %39 = tpu.matmul %36, %38, %cst_38 {dimension_numbers = #tpu.dot_dimension_numbers<[1], [0], [0], [1], [0, 0, 1, 1], [], []>, precision = #tpu.contract_precision<fp32>} : vector<8x32xf32>, vector<32x32xf32>, vector<8x32xf32> -> vector<8x32xf32>
    %40 = arith.addf %35, %39 : vector<8x32xf32>
    %c9_39 = arith.constant 9 : index
    %c0_40 = arith.constant 0 : index
    %41 = vector.load %arg14[%c9_39, %c0_40] : memref<24x32xf32, #tpu.memory_space<vmem>>, vector<8x32xf32>
    %c2_41 = arith.constant 2 : index
    %c0_42 = arith.constant 0 : index
    %c0_43 = arith.constant 0 : index
    %42 = vector.load %arg5[%c2_41, %c0_42, %c0_43] : memref<3x32x32xf32, #tpu.memory_space<vmem>>, vector<1x32x32xf32>
    %43 = vector.shape_cast %42 : vector<1x32x32xf32> to vector<32x32xf32>
    %cst_44 = arith.constant dense<0.000000e+00> : vector<8x32xf32>
    %44 = tpu.matmul %41, %43, %cst_44 {dimension_numbers = #tpu.dot_dimension_numbers<[1], [0], [0], [1], [0, 0, 1, 1], [], []>, precision = #tpu.contract_precision<fp32>} : vector<8x32xf32>, vector<32x32xf32>, vector<8x32xf32> -> vector<8x32xf32>
    %45 = arith.addf %40, %44 : vector<8x32xf32>
    %c0_45 = arith.constant 0 : index
    %c0_46 = arith.constant 0 : index
    %46 = vector.load %arg6[%c0_45, %c0_46] : memref<1x32xf32, #tpu.memory_space<vmem>>, vector<1x32xf32>
    %47 = vector.broadcast %46 : vector<1x32xf32> to vector<8x32xf32>
    %48 = arith.addf %45, %47 : vector<8x32xf32>
    %cst_47 = arith.constant 0.000000e+00 : f32
    %49 = vector.broadcast %cst_47 : f32 to vector<8x32xf32>
    %50 = arith.maximumf %48, %49 : vector<8x32xf32>
    %c8_48 = arith.constant 8 : index
    %c0_49 = arith.constant 0 : index
    %51 = vector.load %arg14[%c8_48, %c0_49] : memref<24x32xf32, #tpu.memory_space<vmem>>, vector<8x32xf32>
    tpu.vector_store %arg14[%c8_48, %c0_49], %50 {strides = array<i32>} : memref<24x32xf32, #tpu.memory_space<vmem>>, vector<8x32xf32>,
    %c7_50 = arith.constant 7 : index
    %c0_51 = arith.constant 0 : index
    %52 = vector.load %arg14[%c7_50, %c0_51] : memref<24x32xf32, #tpu.memory_space<vmem>>, vector<8x32xf32>
    %c0_52 = arith.constant 0 : index
    %c0_53 = arith.constant 0 : index
    %c0_54 = arith.constant 0 : index
    %53 = vector.load %arg7[%c0_52, %c0_53, %c0_54] : memref<3x32x32xf32, #tpu.memory_space<vmem>>, vector<1x32x32xf32>
    %54 = vector.shape_cast %53 : vector<1x32x32xf32> to vector<32x32xf32>
    %cst_55 = arith.constant dense<0.000000e+00> : vector<8x32xf32>
    %55 = tpu.matmul %52, %54, %cst_55 {dimension_numbers = #tpu.dot_dimension_numbers<[1], [0], [0], [1], [0, 0, 1, 1], [], []>, precision = #tpu.contract_precision<fp32>} : vector<8x32xf32>, vector<32x32xf32>, vector<8x32xf32> -> vector<8x32xf32>
    %c8_56 = arith.constant 8 : index
    %c0_57 = arith.constant 0 : index
    %56 = vector.load %arg14[%c8_56, %c0_57] : memref<24x32xf32, #tpu.memory_space<vmem>>, vector<8x32xf32>
    %c1_58 = arith.constant 1 : index
    %c0_59 = arith.constant 0 : index
    %c0_60 = arith.constant 0 : index
    %57 = vector.load %arg7[%c1_58, %c0_59, %c0_60] : memref<3x32x32xf32, #tpu.memory_space<vmem>>, vector<1x32x32xf32>
    %58 = vector.shape_cast %57 : vector<1x32x32xf32> to vector<32x32xf32>
    %cst_61 = arith.constant dense<0.000000e+00> : vector<8x32xf32>
    %59 = tpu.matmul %56, %58, %cst_61 {dimension_numbers = #tpu.dot_dimension_numbers<[1], [0], [0], [1], [0, 0, 1, 1], [], []>, precision = #tpu.contract_precision<fp32>} : vector<8x32xf32>, vector<32x32xf32>, vector<8x32xf32> -> vector<8x32xf32>
    %60 = arith.addf %55, %59 : vector<8x32xf32>
    %c9_62 = arith.constant 9 : index
    %c0_63 = arith.constant 0 : index
    %61 = vector.load %arg14[%c9_62, %c0_63] : memref<24x32xf32, #tpu.memory_space<vmem>>, vector<8x32xf32>
    %c2_64 = arith.constant 2 : index
    %c0_65 = arith.constant 0 : index
    %c0_66 = arith.constant 0 : index
    %62 = vector.load %arg7[%c2_64, %c0_65, %c0_66] : memref<3x32x32xf32, #tpu.memory_space<vmem>>, vector<1x32x32xf32>
    %63 = vector.shape_cast %62 : vector<1x32x32xf32> to vector<32x32xf32>
    %cst_67 = arith.constant dense<0.000000e+00> : vector<8x32xf32>
    %64 = tpu.matmul %61, %63, %cst_67 {dimension_numbers = #tpu.dot_dimension_numbers<[1], [0], [0], [1], [0, 0, 1, 1], [], []>, precision = #tpu.contract_precision<fp32>} : vector<8x32xf32>, vector<32x32xf32>, vector<8x32xf32> -> vector<8x32xf32>
    %65 = arith.addf %60, %64 : vector<8x32xf32>
    %c0_68 = arith.constant 0 : index
    %c0_69 = arith.constant 0 : index
    %66 = vector.load %arg8[%c0_68, %c0_69] : memref<1x32xf32, #tpu.memory_space<vmem>>, vector<1x32xf32>
    %67 = vector.broadcast %66 : vector<1x32xf32> to vector<8x32xf32>
    %68 = arith.addf %65, %67 : vector<8x32xf32>
    %cst_70 = arith.constant 0.000000e+00 : f32
    %69 = vector.broadcast %cst_70 : f32 to vector<8x32xf32>
    %70 = arith.maximumf %68, %69 : vector<8x32xf32>
    %c8_71 = arith.constant 8 : index
    %c0_72 = arith.constant 0 : index
    %71 = vector.load %arg14[%c8_71, %c0_72] : memref<24x32xf32, #tpu.memory_space<vmem>>, vector<8x32xf32>
    tpu.vector_store %arg14[%c8_71, %c0_72], %70 {strides = array<i32>} : memref<24x32xf32, #tpu.memory_space<vmem>>, vector<8x32xf32>,
    %c7_73 = arith.constant 7 : index
    %c0_74 = arith.constant 0 : index
    %72 = vector.load %arg14[%c7_73, %c0_74] : memref<24x32xf32, #tpu.memory_space<vmem>>, vector<8x32xf32>
    %c0_75 = arith.constant 0 : index
    %c0_76 = arith.constant 0 : index
    %c0_77 = arith.constant 0 : index
    %73 = vector.load %arg9[%c0_75, %c0_76, %c0_77] : memref<3x32x64xf32, #tpu.memory_space<vmem>>, vector<1x32x64xf32>
    %74 = vector.shape_cast %73 : vector<1x32x64xf32> to vector<32x64xf32>
    %cst_78 = arith.constant dense<0.000000e+00> : vector<8x64xf32>
    %75 = tpu.matmul %72, %74, %cst_78 {dimension_numbers = #tpu.dot_dimension_numbers<[1], [0], [0], [1], [0, 0, 1, 1], [], []>, precision = #tpu.contract_precision<fp32>} : vector<8x32xf32>, vector<32x64xf32>, vector<8x64xf32> -> vector<8x64xf32>
    %c8_79 = arith.constant 8 : index
    %c0_80 = arith.constant 0 : index
    %76 = vector.load %arg14[%c8_79, %c0_80] : memref<24x32xf32, #tpu.memory_space<vmem>>, vector<8x32xf32>
    %c1_81 = arith.constant 1 : index
    %c0_82 = arith.constant 0 : index
    %c0_83 = arith.constant 0 : index
    %77 = vector.load %arg9[%c1_81, %c0_82, %c0_83] : memref<3x32x64xf32, #tpu.memory_space<vmem>>, vector<1x32x64xf32>
    %78 = vector.shape_cast %77 : vector<1x32x64xf32> to vector<32x64xf32>
    %cst_84 = arith.constant dense<0.000000e+00> : vector<8x64xf32>
    %79 = tpu.matmul %76, %78, %cst_84 {dimension_numbers = #tpu.dot_dimension_numbers<[1], [0], [0], [1], [0, 0, 1, 1], [], []>, precision = #tpu.contract_precision<fp32>} : vector<8x32xf32>, vector<32x64xf32>, vector<8x64xf32> -> vector<8x64xf32>
    %80 = arith.addf %75, %79 : vector<8x64xf32>
    %c9_85 = arith.constant 9 : index
    %c0_86 = arith.constant 0 : index
    %81 = vector.load %arg14[%c9_85, %c0_86] : memref<24x32xf32, #tpu.memory_space<vmem>>, vector<8x32xf32>
    %c2_87 = arith.constant 2 : index
    %c0_88 = arith.constant 0 : index
    %c0_89 = arith.constant 0 : index
    %82 = vector.load %arg9[%c2_87, %c0_88, %c0_89] : memref<3x32x64xf32, #tpu.memory_space<vmem>>, vector<1x32x64xf32>
    %83 = vector.shape_cast %82 : vector<1x32x64xf32> to vector<32x64xf32>
    %cst_90 = arith.constant dense<0.000000e+00> : vector<8x64xf32>
    %84 = tpu.matmul %81, %83, %cst_90 {dimension_numbers = #tpu.dot_dimension_numbers<[1], [0], [0], [1], [0, 0, 1, 1], [], []>, precision = #tpu.contract_precision<fp32>} : vector<8x32xf32>, vector<32x64xf32>, vector<8x64xf32> -> vector<8x64xf32>
    %85 = arith.addf %80, %84 : vector<8x64xf32>
    %c0_91 = arith.constant 0 : index
    %c0_92 = arith.constant 0 : index
    %86 = vector.load %arg10[%c0_91, %c0_92] : memref<1x64xf32, #tpu.memory_space<vmem>>, vector<1x64xf32>
    %87 = vector.broadcast %86 : vector<1x64xf32> to vector<8x64xf32>
    %88 = arith.addf %85, %87 : vector<8x64xf32>
    %cst_93 = arith.constant 0.000000e+00 : f32
    %89 = vector.broadcast %cst_93 : f32 to vector<8x64xf32>
    %90 = arith.maximumf %88, %89 : vector<8x64xf32>
    %c0_94 = arith.constant 0 : index
    %c0_95 = arith.constant 0 : index
    %c0_96 = arith.constant 0 : index
    %91 = vector.load %arg11[%c0_94, %c0_95, %c0_96] : memref<1x64x128xf32, #tpu.memory_space<vmem>>, vector<1x64x128xf32>
    %92 = vector.shape_cast %91 : vector<1x64x128xf32> to vector<64x128xf32>
    %cst_97 = arith.constant dense<0.000000e+00> : vector<8x128xf32>
    %93 = tpu.matmul %90, %92, %cst_97 {dimension_numbers = #tpu.dot_dimension_numbers<[1], [0], [0], [1], [0, 0, 1, 1], [], []>, precision = #tpu.contract_precision<fp32>} : vector<8x64xf32>, vector<64x128xf32>, vector<8x128xf32> -> vector<8x128xf32>
    %c0_98 = arith.constant 0 : index
    %c0_99 = arith.constant 0 : index
    %94 = vector.load %arg12[%c0_98, %c0_99] : memref<1x128xf32, #tpu.memory_space<vmem>>, vector<1x128xf32>
    %95 = vector.broadcast %94 : vector<1x128xf32> to vector<8x128xf32>
    %96 = arith.addf %93, %95 : vector<8x128xf32>
    %c0_100 = arith.constant 0 : index
    %c0_101 = arith.constant 0 : index
    %97 = vector.load %arg13[%c0_100, %c0_101] : memref<8x128xf32, #tpu.memory_space<vmem>>, vector<8x128xf32>
    tpu.vector_store %arg13[%c0_100, %c0_101], %96 {strides = array<i32>} : memref<8x128xf32, #tpu.memory_space<vmem>>, vector<8x128xf32>,
    return
  }
  func.func @transform_0(%arg0: i32) -> (i32, i32) {
    %c0_i32 = arith.constant 0 : i32
    %c0_i32_0 = arith.constant 0 : i32
    return %arg0, %c0_i32 : i32, i32
  }
  func.func @transform_1(%arg0: i32) -> (i32, i32) {
    %c0_i32 = arith.constant 0 : i32
    %c0_i32_0 = arith.constant 0 : i32
    %c0_i32_1 = arith.constant 0 : i32
    return %c0_i32, %c0_i32_0 : i32, i32
  }
  func.func @transform_2(%arg0: i32) -> (i32, i32, i32) {
    %c0_i32 = arith.constant 0 : i32
    %c0_i32_0 = arith.constant 0 : i32
    %c0_i32_1 = arith.constant 0 : i32
    %c0_i32_2 = arith.constant 0 : i32
    return %c0_i32, %c0_i32_0, %c0_i32_1 : i32, i32, i32
  }
  func.func @transform_3(%arg0: i32) -> (i32, i32) {
    %c0_i32 = arith.constant 0 : i32
    %c0_i32_0 = arith.constant 0 : i32
    %c0_i32_1 = arith.constant 0 : i32
    return %c0_i32, %c0_i32_0 : i32, i32
  }
  func.func @transform_4(%arg0: i32) -> (i32, i32, i32) {
    %c0_i32 = arith.constant 0 : i32
    %c0_i32_0 = arith.constant 0 : i32
    %c0_i32_1 = arith.constant 0 : i32
    %c0_i32_2 = arith.constant 0 : i32
    return %c0_i32, %c0_i32_0, %c0_i32_1 : i32, i32, i32
  }
  func.func @transform_5(%arg0: i32) -> (i32, i32) {
    %c0_i32 = arith.constant 0 : i32
    %c0_i32_0 = arith.constant 0 : i32
    %c0_i32_1 = arith.constant 0 : i32
    return %c0_i32, %c0_i32_0 : i32, i32
  }
  func.func @transform_6(%arg0: i32) -> (i32, i32, i32) {
    %c0_i32 = arith.constant 0 : i32
    %c0_i32_0 = arith.constant 0 : i32
    %c0_i32_1 = arith.constant 0 : i32
    %c0_i32_2 = arith.constant 0 : i32
    return %c0_i32, %c0_i32_0, %c0_i32_1 : i32, i32, i32
  }
  func.func @transform_7(%arg0: i32) -> (i32, i32) {
    %c0_i32 = arith.constant 0 : i32
    %c0_i32_0 = arith.constant 0 : i32
    %c0_i32_1 = arith.constant 0 : i32
    return %c0_i32, %c0_i32_0 : i32, i32
  }
  func.func @transform_8(%arg0: i32) -> (i32, i32, i32) {
    %c0_i32 = arith.constant 0 : i32
    %c0_i32_0 = arith.constant 0 : i32
    %c0_i32_1 = arith.constant 0 : i32
    %c0_i32_2 = arith.constant 0 : i32
    return %c0_i32, %c0_i32_0, %c0_i32_1 : i32, i32, i32
  }
  func.func @transform_9(%arg0: i32) -> (i32, i32) {
    %c0_i32 = arith.constant 0 : i32
    %c0_i32_0 = arith.constant 0 : i32
    %c0_i32_1 = arith.constant 0 : i32
    return %c0_i32, %c0_i32_0 : i32, i32
  }
  func.func @transform_10(%arg0: i32) -> (i32, i32, i32) {
    %c0_i32 = arith.constant 0 : i32
    %c0_i32_0 = arith.constant 0 : i32
    %c0_i32_1 = arith.constant 0 : i32
    %c0_i32_2 = arith.constant 0 : i32
    return %c0_i32, %c0_i32_0, %c0_i32_1 : i32, i32, i32
  }
  func.func @transform_11(%arg0: i32) -> (i32, i32) {
    %c0_i32 = arith.constant 0 : i32
    %c0_i32_0 = arith.constant 0 : i32
    %c0_i32_1 = arith.constant 0 : i32
    return %c0_i32, %c0_i32_0 : i32, i32
  }
  func.func @transform_12(%arg0: i32) -> (i32, i32) {
    %c0_i32 = arith.constant 0 : i32
    %c0_i32_0 = arith.constant 0 : i32
    return %arg0, %c0_i32 : i32, i32
  }
}

</mosaic_0001>

<bundles_post_ra>
// kernel: squeeze.0
= control target key start
LH: loop header
LB: loop body
LE: loop exit
PB: predicated region body
PF: predicated region fallthrough
CT: control target
= control target key end

     0   :  { %s67_s8 = smov 125   ;;  %vm8_vm0 = vcmask 7168   ;;  %s68_s11 = smov 126   ;;  %s118_s0 = inlined_call_operand.vmem [shape: s32[2,8], index: 0, kind: input, shape index: {}]   ;;  %s119_s1 = inlined_call_operand.vmem [shape: s32[16,1], index: 1, kind: output, shape index: {}]  }
   0x1   :  { %v5_v0 = vld [vmem:[%s118_s0] sm:$0x3]  ;;  %s66_s0 = smov 127   ;;  %s69_s12 = smov 124  }
   0x2   :  { %6 = vst [vmem:[#allocation0] sm:$0x3] %v5_v0  ;;  %s70_s13 = smov 123   ;;  %s71_s14 = smov 122  }
   0x3   :  { %s72_s15 = smov 121  }
   0x9   :  { %v10_v1 = vld [vmem:[#allocation0] sm:$0x3]  }
   0xa   :  { %v22_v2 = vld [vmem:[#allocation0] sm:$0x3]   ;;  %11 = vrot.lane.b32.xlu0 %v10_v1, %s66_s0 }
   0xb   :  { %23 = vrot.lane.b32.xlu1 %v22_v2, %s67_s8  ;;  %v16_v3 = vld [vmem:[#allocation0] sm:$0x3]  }
   0xc   :  { %v28_v4 = vld [vmem:[#allocation0] sm:$0x3]  }
   0xd   :  { %v7_v5 = vld [vmem:[#allocation0] sm:$0x3]  }
   0xe   :  { %9 = vst.msk [vmem:[%s119_s1] ss:$8 sm:$0x3] %vm8_vm0, %v7_v5   ;;  %17 = vrot.lane.b32.xlu0 %v16_v3, %s68_s11  ;;  %v34_v6 = vld [vmem:[#allocation0] sm:$0x3]  }
   0xf   :  { %29 = vrot.lane.b32.xlu1 %v28_v4, %s69_s12  ;;  %v40_v7 = vld [vmem:[#allocation0] sm:$0x3]  }
  0x10   :  { %v46_v8 = vld [vmem:[#allocation0] sm:$0x3]  }
  0x12   :  { %35 = vrot.lane.b32.xlu0 %v34_v6, %s70_s13 }
  0x13   :  { %41 = vrot.lane.b32.xlu1 %v40_v7, %s71_s14 }
  0x16   :  { %47 = vrot.lane.b32.xlu0 %v46_v8, %s72_s15 }
  0x7c   :  { %v12_v9 = vpop.permute.xlu0 %11  }
  0x7d   :  { %v24_v10 = vpop.permute.xlu1 %23   ;;  %52 = vst.msk [vmem:[%s119_s1 + $0x1] ss:$8 sm:$0x3] %vm8_vm0, %v12_v9  }
  0x7e   :  { %54 = vst.msk [vmem:[%s119_s1 + $0x3] ss:$8 sm:$0x3] %vm8_vm0, %v24_v10  }
  0x80   :  { %v18_v11 = vpop.permute.xlu0 %17  }
  0x81   :  { %v30_v12 = vpop.permute.xlu1 %29   ;;  %53 = vst.msk [vmem:[%s119_s1 + $0x2] ss:$8 sm:$0x3] %vm8_vm0, %v18_v11  }
  0x82   :  { %55 = vst.msk [vmem:[%s119_s1 + $0x4] ss:$8 sm:$0x3] %vm8_vm0, %v30_v12  }
  0x84   :  { %v36_v13 = vpop.permute.xlu0 %35  }
  0x85   :  { %v42_v14 = vpop.permute.xlu1 %41   ;;  %56 = vst.msk [vmem:[%s119_s1 + $0x5] ss:$8 sm:$0x3] %vm8_vm0, %v36_v13  }
  0x86   :  { %57 = vst.msk [vmem:[%s119_s1 + $0x6] ss:$8 sm:$0x3] %vm8_vm0, %v42_v14  }
  0x88   :  { %v48_v15 = vpop.permute.xlu0 %47  }
  0x89   :  { %58 = vst.msk [vmem:[%s119_s1 + $0x7] ss:$8 sm:$0x3] %vm8_vm0, %v48_v15  }

// kernel: text_encoder.1
= control target key start
LH: loop header
LB: loop body
LE: loop exit
PB: predicated region body
PF: predicated region fallthrough
CT: control target
= control target key end

     0   :  { %17 = vsyncpa [#allocation4], 0  ;;  %s11177_s0 = inlined_call_operand.vmem [shape: s32[16,1], index: 0, kind: input, shape index: {}]   ;;  %s11178_s1 = inlined_call_operand.hbm [shape: f32[40,32], index: 1, kind: input, shape index: {}]   ;;  %s11179_s2 = inlined_call_operand.hbm [shape: f32[3,32,32], index: 2, kind: input, shape index: {}]   ;;  %s11180_s3 = inlined_call_operand.vmem [shape: f32[1,32], index: 3, kind: input, shape index: {}]   ;;  %s11181_s4 = inlined_call_operand.hbm [shape: f32[3,32,32], index: 4, kind: input, shape index: {}]   ;;  %s11182_s5 = inlined_call_operand.vmem [shape: f32[1,32], index: 5, kind: input, shape index: {}]   ;;  %s11183_s6 = inlined_call_operand.hbm [shape: f32[3,32,32], index: 6, kind: input, shape index: {}]   ;;  %s11184_s7 = inlined_call_operand.vmem [shape: f32[1,32], index: 7, kind: input, shape index: {}]   ;;  %s11185_s8 = inlined_call_operand.hbm [shape: f32[3,32,64], index: 8, kind: input, shape index: {}]   ;;  %s11186_s9 = inlined_call_operand.vmem [shape: f32[1,64], index: 9, kind: input, shape index: {}]   ;;  %s11187_s10 = inlined_call_operand.hbm [shape: f32[1,64,128], index: 10, kind: input, shape index: {}]   ;;  %s11188_s11 = inlined_call_operand.vmem [shape: f32[1,128], index: 11, kind: input, shape index: {}]   ;;  %s11189_s12 = inlined_call_operand.vmem [shape: f32[16,128], index: 12, kind: output, shape index: {}]  }
   0x1   :  { %18 = vsyncpa [#allocation6], 0 }
   0x2   :  { %19 = vsyncpa [#allocation9], 0 }
   0x3   :  { %20 = vsyncpa [#allocation12], 0  ;;  %s9450_s21 = smov 0  }
   0x4 LB: > { %s9456_s22 = sadd.s32 4294967295, %s9372_s21   ;;  %p7657_p0 = scmp.ge.s32.totalorder %s9372_s21, 1  ;;  %s9372_s21 = sphi %s9450_s21, %s26_s21  }
   0x5   : > { %p314_p1 = scmp.lt.s32.totalorder %s9372_s21, 3  ;;  %p9162_p2 = scmp.eq.s32.totalorder %s9456_s22, 0 }
   0x6   : > { %s9374_s24 = smov [#allocation5]   ;;  %s9375_s26 = smov [#allocation8]  }
   0x7   : > { %p9461_p3 = pnand %p7657_p0, %p314_p1  ;;  %s339_s25 = sshll.u32 %s9374_s24, 4  ;;  %s340_s25 = int_to_ptr.vmem [resolvable:$true] %s339_s25 }
   0x8   : > { %s371_s27 = sshll.u32 %s9375_s26, 4  ;;  %s9376_s29 = smov [#allocation3]   ;;  %s9467_s27 = int_to_ptr.vmem [resolvable:$true] %s371_s27 }
   0x9   : > { %p9143_p4 = pneg %p9461_p3  ;;  %s326_s30 = sshll.u32 %s9376_s29, 4  ;;  %s9475_s30 = int_to_ptr.vmem [resolvable:$true] %s326_s30 }
   0xa   : > { %s9377_s13 = smov [#allocation7]   ;;  %s9205_s16 = scalar_lea.vmem %s340_s25, 1536 }
   0xb   : > { %p9471_p5 = pnand %p9162_p2, %p9143_p4  ;;  %s9477_s14 = sshll.u32 %s9377_s13, 4  ;;  %s356_s14 = int_to_ptr.vmem [resolvable:$true] %s9477_s14 }
   0xc   : > { %p9206_p7 = scmp.ne.s32.totalorder %s340_s25, %s9205_s16  ;;  %p9213_p10 = scmp.lt.s32.totalorder %s340_s25, %s340_s25 }
   0xd   : > { %p9481_p6 = pneg %p9471_p5  ;;  %p9214_p11 = scmp.lt.s32.totalorder %s9205_s16, %s9205_s16 }
   0xf   : > { %p9208_p8 = pnand %p9206_p7, %p9481_p6  ;;  %p9215_p12 = por %p9214_p11, %p9213_p10 }
  0x11   : > { %p9209_p9 = pneg %p9208_p8 }
  0x13   : > { %p9216_p13 = pnand %p9215_p12, %p9209_p9 }
  0x15   : > { %9219 = shalt.err (!%p9216_p13)
}
  0x16   : > { %s9378_s17 = smov 128   ;;  %s9379_s18 = smov 8  }
  0x17   : > { %9149 = dma.hbm_to_vmem [thread:$0]  (!%p9471_p5), %s11179_s2, 1536, %s340_s25, [#allocation6], %s9378_s17, %s9378_s17, %s9379_s18  }
  0x18   : > { %s9231_s24 = scalar_lea.vmem %s9467_s27, 1536  ;;  %p9239_p7 = scmp.lt.s32.totalorder %s9467_s27, %s9467_s27 }
  0x19   : > { %p9232_p0 = scmp.ne.s32.totalorder %s9467_s27, %s9231_s24  ;;  %p9240_p8 = scmp.lt.s32.totalorder %s9231_s24, %s9231_s24 }
  0x1b   : > { %p9234_p1 = pnand %p9232_p0, %p9481_p6  ;;  %p9241_p9 = por %p9240_p8, %p9239_p7 }
  0x1d   : > { %p9235_p4 = pneg %p9234_p1 }
  0x1f   : > { %p9242_p10 = pnand %p9241_p9, %p9235_p4 }
  0x21   : > { %9245 = shalt.err (!%p9242_p10)
}
  0x22   : > { %9155 = dma.hbm_to_vmem [thread:$0]  (!%p9471_p5), %s11183_s6, 1536, %s9467_s27, [#allocation9], %s9378_s17, %s9378_s17, %s9379_s18  }
  0x23   : > { %s9257_s25 = scalar_lea.vmem %s9475_s30, 640  ;;  %p9265_p0 = scmp.lt.s32.totalorder %s9475_s30, %s9475_s30 }
  0x24   : > { %p9258_p11 = scmp.ne.s32.totalorder %s9475_s30, %s9257_s25  ;;  %p9266_p1 = scmp.lt.s32.totalorder %s9257_s25, %s9257_s25 }
  0x26   : > { %p9260_p12 = pnand %p9258_p11, %p9481_p6  ;;  %p9267_p4 = por %p9266_p1, %p9265_p0 }
  0x28   : > { %p9261_p13 = pneg %p9260_p12 }
  0x2a   : > { %p9268_p7 = pnand %p9267_p4, %p9261_p13 }
  0x2c   : > { %9271 = shalt.err (!%p9268_p7)
}
  0x2d   : > { %9146 = dma.hbm_to_vmem [thread:$0]  (!%p9471_p5), %s11178_s1, 640, %s9475_s30, [#allocation4], %s9378_s17, %s9378_s17, %s9379_s18  }
  0x2e   : > { %s9283_s27 = scalar_lea.vmem %s356_s14, 1536  ;;  %p9291_p11 = scmp.lt.s32.totalorder %s356_s14, %s356_s14 }
  0x2f   : > { %p9284_p8 = scmp.ne.s32.totalorder %s356_s14, %s9283_s27  ;;  %p9292_p12 = scmp.lt.s32.totalorder %s9283_s27, %s9283_s27 }
  0x31   : > { %p9286_p9 = pnand %p9284_p8, %p9481_p6  ;;  %p9293_p13 = por %p9292_p12, %p9291_p11 }
  0x33   : > { %p9287_p10 = pneg %p9286_p9 }
  0x35   : > { %p9294_p0 = pnand %p9293_p13, %p9287_p10 }
  0x37   : > { %9297 = shalt.err (!%p9294_p0)
}
  0x38   : > { %9152 = dma.hbm_to_vmem [thread:$0]  (!%p9471_p5), %s11181_s4, 1536, %s356_s14, [#allocation6], %s9378_s17, %s9378_s17, %s9379_s18  }
  0x39   : > { %s9380_s30 = smov [#allocation10]   ;;  %s9381_s26 = smov [#allocation11]  }
  0x3a   : > { %s387_s24 = sshll.u32 %s9380_s30, 4  ;;  %s403_s29 = sshll.u32 %s9381_s26, 4  ;;  %s388_s24 = int_to_ptr.vmem [resolvable:$true] %s387_s24  ;;  %s404_s29 = int_to_ptr.vmem [resolvable:$true] %s403_s29 }
  0x3b   : > { %s9309_s25 = scalar_lea.vmem %s388_s24, 1536  ;;  %p9317_p8 = scmp.lt.s32.totalorder %s388_s24, %s388_s24 }
  0x3c   : > { %p9310_p1 = scmp.ne.s32.totalorder %s388_s24, %s9309_s25  ;;  %p9318_p9 = scmp.lt.s32.totalorder %s9309_s25, %s9309_s25 }
  0x3e   : > { %p9312_p4 = pnand %p9310_p1, %p9481_p6  ;;  %p9319_p10 = por %p9318_p9, %p9317_p8 }
  0x40   : > { %p9313_p7 = pneg %p9312_p4 }
  0x42   : > { %p9320_p11 = pnand %p9319_p10, %p9313_p7 }
  0x44   : > { %9323 = shalt.err (!%p9320_p11)
}
  0x45   : > { %9158 = dma.hbm_to_vmem [thread:$0]  (!%p9471_p5), %s11185_s8, 1536, %s388_s24, [#allocation9], %s9378_s17, %s9378_s17, %s9379_s18  }
  0x46   : > { %s9335_s16 = scalar_lea.vmem %s404_s29, 1024  ;;  %p9343_p1 = scmp.lt.s32.totalorder %s404_s29, %s404_s29 }
  0x47   : > { %p9336_p12 = scmp.ne.s32.totalorder %s404_s29, %s9335_s16  ;;  %p9344_p4 = scmp.lt.s32.totalorder %s9335_s16, %s9335_s16 }
  0x49   : > { %p9338_p13 = pnand %p9336_p12, %p9481_p6  ;;  %p9345_p7 = por %p9344_p4, %p9343_p1 }
  0x4b   : > { %p9339_p0 = pneg %p9338_p13 }
  0x4d   : > { %p9346_p8 = pnand %p9345_p7, %p9339_p0 }
  0x4f   : > { %9349 = shalt.err (!%p9346_p8)
}
  0x50   : > { %9161 = dma.hbm_to_vmem [thread:$0]  (!%p9471_p5), %s11187_s10, 1024, %s404_s29, [#allocation12], %s9378_s17, %s9378_s17, %s9379_s18  }
  0x51   : > { %429 = sbr.rel (%p9461_p3) target bundleno = 1896 (0x768), region = 68 }
  0x56   : > { %9355 = dma.done.wait (%p9162_p2), [#allocation4], 640  }
  0x57   : > { %9357 = vsyncadd (%p9162_p2), [#allocation4], 4294966656 }
  0x58   : > { %9359 = dma.done.wait (%p9162_p2), [#allocation6], 3072  }
  0x59   : > { %9361 = vsyncadd (%p9162_p2), [#allocation6], 4294964224 }
  0x5a   : > { %9363 = dma.done.wait (%p9162_p2), [#allocation9], 3072  }
  0x5b   : > { %9365 = vsyncadd (%p9162_p2), [#allocation9], 4294964224 }
  0x5c   : > { %9367 = dma.done.wait (%p9162_p2), [#allocation12], 1024  }
  0x5d   : > { %9369 = vsyncadd (%p9162_p2), [#allocation12], 4294966272  ;;  %p489_p3 = scmp.lt.s32.totalorder %s9456_s22, 1  ;;  %v9382_v0 = vmov 0   ;;  %v9383_v1 = vmov 0.0   ;;  %vm9384_vm0 = vmmov 0   ;;  %v501_v33 = vlaneseq }
  0x5e   : > { %9193 = vset.pattern.permute.xlu0 %v9382_v0  ;;  %8148 = vmatprep.subr.mxu1 %v9383_v1  ;;  %v513_v3 = vld [vmem:[#allocation3 + $0x20] sm:$0xff]  ;;  %v512_v4 = vld [vmem:[#allocation3 + $0x18] sm:$0xff]  ;;  %v511_v7 = vld [vmem:[#allocation3 + $0x10] sm:$0xff]  ;;  %vm514_vm1 = vcmask 326656   ;;  %vm497_vm3 = vcmask 253952   ;;  %vm1016_vm4 = vcmask 261120  }
  0x5f   : > { %s11194_s22 = smov (!%p489_p3, %s9456_s22), 1  ;;  %8135 = vmatprep.subr.mxu0 %v9383_v1  ;;  %8158 = vmatprep.mubr.msk.f32.mxu1 %vm9384_vm0, %v9383_v1  ;;  %v9590_v5 = vand.u32 4294901760, %v513_v3  ;;  %v9592_v6 = vand.u32 4294901760, %v512_v4  ;;  %v510_v8 = vld [vmem:[#allocation3 + $0x8] sm:$0xff]  ;;  %v509_v9 = vld [vmem:[#allocation3] sm:$0xff]  ;;  %v9594_v10 = vand.u32 4294901760, %v511_v7 }
  0x60   : > { %s7672_s23 = sshll.u32 %s11194_s22, 3  ;;  %8145 = vmatprep.mubr.msk.f32.mxu0 %vm9384_vm0, %v9383_v1  ;;  %v9596_v11 = vand.u32 4294901760, %v510_v8  ;;  %v9598_v12 = vand.u32 4294901760, %v509_v9  ;;  %v502_v34 = vand.u32 127, %v501_v33  ;;  %v1028_v42 = vld [vmem:[#allocation5 + $0x38] sm:$0xff]  ;;  %v1027_v44 = vld [vmem:[#allocation5 + $0x30] sm:$0xff] }
  0x61   : > { %s492_s17 = scalar_lea.vmem %s11177_s0, %s7672_s23  ;;  %v9601_v13 = vsub.f32 %v513_v3, %v9590_v5  ;;  %v9604_v14 = vsub.f32 %v512_v4, %v9592_v6  ;;  %8136 = vmatpush3.msra.mxu0 %v9590_v5  ;;  %v9608_v15 = vsub.f32 %v511_v7, %v9594_v10  ;;  %v9712_v43 = vand.u32 4294901760, %v1028_v42  ;;  %v1026_v47 = vld [vmem:[#allocation5 + $0x28] sm:$0xff]  ;;  %v1025_v51 = vld [vmem:[#allocation5 + $0x20] sm:$0xff]  ;;  %498 = vst.msk [vmem:[#allocation2 + $0x7] sm:$0x1] %vm497_vm3, %v9383_v1  ;;  %s496_s28 = scalar_lea.vmem %s11189_s12, %s7672_s23 }
  0x62   : > { %v500_v2 = vld [vmem:[%s492_s17] sm:$0xff]  ;;  %v9611_v16 = vsub.f32 %v510_v8, %v9596_v11  ;;  %v9614_v17 = vsub.f32 %v509_v9, %v9598_v12  ;;  %8137 = vmatprep.subr.mxu0 %v9383_v1  ;;  %v9717_v46 = vand.u32 4294901760, %v1027_v44  ;;  %v9725_v50 = vand.u32 4294901760, %v1026_v47  ;;  %499 = vst.msk [vmem:[#allocation2 + $0x10] sm:$0x1] %vm497_vm3, %v9383_v1 }
  0x63   : > { %504 = vperm.xlu0 %9193, %v500_v2   ;;  %v623_v18 = vand.u32 4294901760, %v9601_v13  ;;  %v630_v19 = vand.u32 4294901760, %v9604_v14  ;;  %8138 = vmatpush3.msra.mxu0 %v9592_v6  ;;  %v637_v20 = vand.u32 4294901760, %v9608_v15  ;;  %v9715_v45 = vsub.f32 %v1028_v42, %v9712_v43 }
  0x64   : > { %v644_v21 = vand.u32 4294901760, %v9611_v16  ;;  %8139 = vmatprep.subr.mxu0 %v9383_v1  ;;  %v651_v24 = vand.u32 4294901760, %v9614_v17  ;;  %v9723_v49 = vsub.f32 %v1027_v44, %v9717_v46  ;;  %v9734_v54 = vsub.f32 %v1026_v47, %v9725_v50 }
  0x65   : > { %v624_v22 = vsub.f32 %v9601_v13, %v623_v18  ;;  %v631_v23 = vsub.f32 %v9604_v14, %v630_v19  ;;  %8140 = vmatpush3.msra.mxu0 %v9594_v10  ;;  %v638_v25 = vsub.f32 %v9608_v15, %v637_v20  ;;  %v1138_v48 = vand.u32 4294901760, %v9715_v45 }
  0x66   : > { %8141 = vmatprep.subr.mxu0 %v9383_v1  ;;  %v645_v28 = vsub.f32 %v9611_v16, %v644_v21  ;;  %v652_v30 = vsub.f32 %v9614_v17, %v651_v24  ;;  %v1145_v53 = vand.u32 4294901760, %v9723_v49  ;;  %v9736_v55 = vand.u32 4294901760, %v1025_v51 }
  0x67   : > { %v625_v26 = vand.u32 4294901760, %v624_v22  ;;  %v632_v27 = vand.u32 4294901760, %v631_v23  ;;  %8142 = vmatpush3.msra.mxu0 %v9596_v11  ;;  %v639_v29 = vand.u32 4294901760, %v638_v25  ;;  %v1139_v52 = vsub.f32 %v9715_v45, %v1138_v48  ;;  %v1022_v22 = vld [vmem:[#allocation5 + $0x18] sm:$0xff] }
  0x68   : > { %8143 = vmatprep.subr.mxu0 %v9383_v1  ;;  %v646_v31 = vand.u32 4294901760, %v645_v28  ;;  %v653_v32 = vand.u32 4294901760, %v652_v30  ;;  %v1146_v57 = vsub.f32 %v9723_v49, %v1145_v53  ;;  %v1152_v58 = vand.u32 4294901760, %v9734_v54  ;;  %v1019_v30 = vld [vmem:[#allocation5] sm:$0xff] }
  0x69   : > { %8149 = vmatpush3.msra.mxu1 %v625_v26  ;;  %8144 = vmatpush3.msra.mxu0 %v9598_v12  ;;  %v1140_v56 = vand.u32 4294901760, %v1139_v52  ;;  %v9745_v59 = vsub.f32 %v1025_v51, %v9736_v55  ;;  %v9768_v26 = vand.u32 4294901760, %v1022_v22  ;;  %vm7000_vm5 = vcmask 523264  }
  0x6a   : > { %8150 = vmatprep.subr.mxu1 %v9383_v1  ;;  %8161 = vmatprep.subr.mxu0 %v9383_v1  ;;  %v1147_v60 = vand.u32 4294901760, %v1146_v57  ;;  %v1153_v61 = vsub.f32 %v9734_v54, %v1152_v58 }
  0x6b   : > { %8151 = vmatpush3.msra.mxu1 %v632_v27  ;;  %v1159_v62 = vand.u32 4294901760, %v9745_v59  ;;  %v1020_v27 = vld [vmem:[#allocation5 + $0x8] sm:$0xff] }
  0x6c   : > { %8152 = vmatprep.subr.mxu1 %v9383_v1  ;;  %v1154_v63 = vand.u32 4294901760, %v1153_v61  ;;  %v9781_v33 = vand.u32 4294901760, %v1020_v27 }
  0x6d   : > { %8153 = vmatpush3.msra.mxu1 %v639_v29  ;;  %v1160_v0 = vsub.f32 %v9745_v59, %v1159_v62 }
  0x6e   : > { %8154 = vmatprep.subr.mxu1 %v9383_v1 }
  0x6f   : > { %8155 = vmatpush3.msra.mxu1 %v646_v31  ;;  %v1161_v2 = vand.u32 4294901760, %v1160_v0 }
  0x70   : > { %8156 = vmatprep.subr.mxu1 %v9383_v1 }
  0x71   : > { %8157 = vmatpush3.msra.mxu1 %v653_v32  ;;  %v9779_v32 = vsub.f32 %v1022_v22, %v9768_v26 }
  0x72   : > { %8174 = vmatprep.subr.mxu1 %v9383_v1 }
  0xde   : > { %v505_v35 = vpop.permute.xlu0 %504 }
  0xdf   : > { %vm506_vm2 = vcmp.eq.s32.totalorder %v502_v34, %v505_v35 }
  0xe0   : > { %v7674_v36 = vsel %vm506_vm2, 1.0, %v9383_v1 }
  0xe1   : > { %v516_v37 = vsel %vm514_vm1, %v7674_v36, 0  ;;  %8159 = vmatmul.mubr.msk.f32.vlgmr.msra.gmra.mxu1 %vm514_vm1, %v7674_v36 }
  0xe2   : > { %v589_v38 = vsub.f32 %v516_v37, %v516_v37  ;;  %8175 = vmatpush3.msra.mxu1 %v9590_v5  ;;  %8184 = vmatprep.mubr.msk.f32.mxu1 %vm9384_vm0, %v9383_v1  ;;  %v1626_v37 = vand.u32 4294901760, %v9779_v32 }
  0xe3   : > { %8176 = vmatprep.subr.mxu1 %v9383_v1 }
  0xe4   : > { %8177 = vmatpush3.msra.mxu1 %v9592_v6  ;;  %v590_v39 = vand.u32 4294901760, %v589_v38 }
  0xe5   : > { %8178 = vmatprep.subr.mxu1 %v9383_v1 }
  0xe6   : > { %8179 = vmatpush3.msra.mxu1 %v9594_v10  ;;  %v591_v40 = vsub.f32 %v589_v38, %v590_v39 }
  0xe7   : > { %8180 = vmatprep.subr.mxu1 %v9383_v1 }
  0xe8   : > { %8181 = vmatpush3.msra.mxu1 %v9596_v11  ;;  %v592_v41 = vand.u32 4294901760, %v591_v40 }
  0xe9   : > { %8182 = vmatprep.subr.mxu1 %v9383_v1 }
  0xea   : > { %8183 = vmatpush3.msra.mxu1 %v9598_v12  ;;  %8146 = vmatmul.mubr.f32.vlgmr.msra.gmra.mxu0 %v592_v41  ;;  %v1627_v41 = vsub.f32 %v9779_v32, %v1626_v37 }
  0xeb   : > { %8162 = vmatpush3.msra.mxu0 %v9601_v13  ;;  %8185 = vmatmul.mubr.f32.vlgmr.msra.gmra.mxu1 %v590_v39 }
  0xec   : > { %8200 = vmatprep.subr.mxu1 %v9383_v1  ;;  %8163 = vmatprep.subr.mxu0 %v9383_v1  ;;  %v1628_v47 = vand.u32 4294901760, %v1627_v41 }
  0xed   : > { %8201 = vmatpush3.msra.mxu1 %v9590_v5  ;;  %8164 = vmatpush3.msra.mxu0 %v9604_v14 }
  0xee   : > { %8202 = vmatprep.subr.mxu1 %v9383_v1  ;;  %8165 = vmatprep.subr.mxu0 %v9383_v1 }
  0xef   : > { %8203 = vmatpush3.msra.mxu1 %v9592_v6  ;;  %8166 = vmatpush3.msra.mxu0 %v9608_v15 }
  0xf0   : > { %8204 = vmatprep.subr.mxu1 %v9383_v1  ;;  %8167 = vmatprep.subr.mxu0 %v9383_v1 }
  0xf1   : > { %8205 = vmatpush3.msra.mxu1 %v9594_v10  ;;  %8168 = vmatpush3.msra.mxu0 %v9611_v16 }
  0xf2   : > { %8206 = vmatprep.subr.mxu1 %v9383_v1  ;;  %8169 = vmatprep.subr.mxu0 %v9383_v1 }
  0xf3   : > { %8207 = vmatpush3.msra.mxu1 %v9596_v11  ;;  %8170 = vmatpush3.msra.mxu0 %v9614_v17 }
  0xf4   : > { %8171 = vmatprep.mubr.msk.f32.mxu0 %vm9384_vm0, %v9383_v1  ;;  %8208 = vmatprep.subr.mxu1 %v9383_v1 }
  0xf5   : > { %8172 = vmatmul.mubr.f32.vlgmr.msra.gmra.mxu0 %v589_v38  ;;  %8187 = vmatprep.subr.mxu0 %v9383_v1  ;;  %v9794_v38 = vsub.f32 %v1020_v27, %v9781_v33 }
  0xf6   : > { %8209 = vmatpush3.msra.mxu1 %v9598_v12  ;;  %8210 = vmatprep.mubr.msk.f32.mxu1 %vm9384_vm0, %v9383_v1 }
  0xf7   : > { %8188 = vmatpush3.msra.mxu0 %v623_v18  ;;  %8211 = vmatmul.mubr.msk.f32.vlgmr.msra.gmra.mxu1 %vm514_vm1, %v7674_v36  ;;  %v1640_v42 = vand.u32 4294901760, %v9794_v38 }
  0xf8   : > { %8189 = vmatprep.subr.mxu0 %v9383_v1  ;;  %8197 = vmatprep.mubr.msk.f32.mxu0 %vm9384_vm0, %v9383_v1 }
  0xf9   : > { %8190 = vmatpush3.msra.mxu0 %v630_v19  ;;  %8224 = vmatprep.subr.mxu1 %v9383_v1 }
  0xfa   : > { %8191 = vmatprep.subr.mxu0 %v9383_v1  ;;  %8232 = vmatprep.mubr.msk.f32.mxu1 %vm9384_vm0, %v9383_v1 }
  0xfb   : > { %8192 = vmatpush3.msra.mxu0 %v637_v20  ;;  %8225 = vmatpush3.msra.mxu1 %v1140_v56 }
  0xfc   : > { %8193 = vmatprep.subr.mxu0 %v9383_v1  ;;  %8226 = vmatprep.subr.mxu1 %v9383_v1 }
  0xfd   : > { %8194 = vmatpush3.msra.mxu0 %v644_v21  ;;  %8227 = vmatpush3.msra.mxu1 %v1147_v60 }
  0xfe   : > { %8195 = vmatprep.subr.mxu0 %v9383_v1  ;;  %8228 = vmatprep.subr.mxu1 %v9383_v1 }
  0xff   : > { %8196 = vmatpush3.msra.mxu0 %v651_v24  ;;  %8229 = vmatpush3.msra.mxu1 %v1154_v63  ;;  %v1021_v24 = vld [vmem:[#allocation5 + $0x10] sm:$0xff] }
 0x100   : > { %8198 = vmatmul.mubr.msk.f32.vlgmr.msra.gmra.mxu0 %vm514_vm1, %v7674_v36  ;;  %8213 = vmatprep.subr.mxu0 %v9383_v1  ;;  %v9774_v29 = vand.u32 4294901760, %v1021_v24  ;;  %v9788_v36 = vand.u32 4294901760, %v1019_v30 }
 0x101   : > { %8221 = vmatprep.mubr.msk.f32.mxu0 %vm9384_vm0, %v9383_v1  ;;  %8214 = vmatpush3.msra.mxu0 %v9712_v43 }
 0x102   : > { %8215 = vmatprep.subr.mxu0 %v9383_v1  ;;  %8230 = vmatprep.subr.mxu1 %v9383_v1  ;;  %v9786_v35 = vsub.f32 %v1021_v24, %v9774_v29  ;;  %v9801_v40 = vsub.f32 %v1019_v30, %v9788_v36 }
 0x103   : > { %8216 = vmatpush3.msra.mxu0 %v9717_v46  ;;  %8231 = vmatpush3.msra.mxu1 %v1161_v2 }
 0x104   : > { %8217 = vmatprep.subr.mxu0 %v9383_v1  ;;  %8246 = vmatprep.subr.mxu1 %v9383_v1  ;;  %v1633_v39 = vand.u32 4294901760, %v9786_v35 }
 0x105   : > { %8218 = vmatpush3.msra.mxu0 %v9725_v50 }
 0x106   : > { %8219 = vmatprep.subr.mxu0 %v9383_v1  ;;  %v1634_v44 = vsub.f32 %v9786_v35, %v1633_v39 }
 0x107   : > { %8220 = vmatpush3.msra.mxu0 %v9736_v55 }
 0x108   : > { %8235 = vmatprep.subr.mxu0 %v9383_v1  ;;  %v1635_v52 = vand.u32 4294901760, %v1634_v44 }
 0x1a1   : > { %v690_v3 = vpop.f32.mrf.mxu1 }
 0x1a3   : > { %v8160_v4 = vpop.f32.mrf.mxu1 }
 0x1aa   : > { %v594_v5 = vpop.f32.mrf.mxu0 }
 0x1ab   : > { %v850_v6 = vpop.f32.mrf.mxu1  ;;  %v691_v12 = vadd.f32 %v690_v3, %v594_v5 }
 0x1ac   : > { %v8147_v7 = vpop.f32.mrf.mxu0 }
 0x1ad   : > { %v8186_v8 = vpop.f32.mrf.mxu1 }
 0x1b5   : > { %v772_v9 = vpop.f32.mrf.mxu0 }
 0x1b6   : > { %v773_v14 = vadd.f32 %v772_v9, %v691_v12 }
 0x1b7   : > { %v1012_v10 = vpop.f32.mrf.mxu1  ;;  %v8173_v11 = vpop.f32.mrf.mxu0 }
 0x1b8   : > { %v851_v15 = vadd.f32 %v850_v6, %v773_v14 }
 0x1b9   : > { %v8212_v13 = vpop.f32.mrf.mxu1 }
 0x1c0   : > { %v936_v16 = vpop.f32.mrf.mxu0 }
 0x1c1   : > { %v937_v17 = vadd.f32 %v936_v16, %v851_v15 }
 0x1c2   : > { %v8199_v18 = vpop.f32.mrf.mxu0 }
 0x1c3   : > { %v1013_v19 = vadd.f32 %v1012_v10, %v937_v17 }
 0x1c5   : > { %1017 = vst.msk [vmem:[#allocation2 + $0x8] sm:$0xff] %vm1016_vm4, %v1013_v19 }
 0x1cc   : > { %v1023_v20 = vld [vmem:[#allocation2 + $0x8] sm:$0xff] }
 0x1cd   : > { %v1030_v21 = vsel %vm1016_vm4, %v1023_v20, 0  ;;  %v2005_v11 = vld [vmem:[#allocation2 + $0x9] sm:$0xff] }
 0x1ce   : > { %v9764_v23 = vand.u32 4294901760, %v1030_v21  ;;  %v2012_v16 = vsel %vm1016_vm4, %v2005_v11, 0 }
 0x1cf   : > { %v9946_v19 = vand.u32 4294901760, %v2012_v16 }
 0x1d0   : > { %v1102_v25 = vsub.f32 %v1030_v21, %v9764_v23  ;;  %8233 = vmatmul.mubr.f32.vlgmr.msra.gmra.mxu1 %v9764_v23 }
 0x1d1   : > { %8247 = vmatpush3.msra.mxu1 %v9712_v43  ;;  %8254 = vmatprep.mubr.msk.f32.mxu1 %vm9384_vm0, %v9383_v1  ;;  %v2084_v22 = vsub.f32 %v2012_v16, %v9946_v19 }
 0x1d2   : > { %8248 = vmatprep.subr.mxu1 %v9383_v1  ;;  %v1103_v28 = vand.u32 4294901760, %v1102_v25 }
 0x1d3   : > { %8249 = vmatpush3.msra.mxu1 %v9717_v46 }
 0x1d4   : > { %8250 = vmatprep.subr.mxu1 %v9383_v1  ;;  %v1104_v31 = vsub.f32 %v1102_v25, %v1103_v28 }
 0x1d5   : > { %8251 = vmatpush3.msra.mxu1 %v9725_v50 }
 0x1d6   : > { %8252 = vmatprep.subr.mxu1 %v9383_v1  ;;  %v1105_v34 = vand.u32 4294901760, %v1104_v31  ;;  %v2518_v31 = vld [vmem:[#allocation7 + $0x28] sm:$0xff] }
 0x1d7   : > { %8253 = vmatpush3.msra.mxu1 %v9736_v55 }
 0x1d8   : > { %8255 = vmatmul.mubr.f32.vlgmr.msra.gmra.mxu1 %v1103_v28  ;;  %8268 = vmatprep.subr.mxu1 %v9383_v1  ;;  %v2519_v28 = vld [vmem:[#allocation7 + $0x30] sm:$0xff] }
 0x1d9   : > { %8222 = vmatmul.mubr.f32.vlgmr.msra.gmra.mxu0 %v1105_v34  ;;  %8269 = vmatpush3.msra.mxu1 %v9712_v43  ;;  %v1018_v43 = vld [vmem:[#allocation2 + $0x7] sm:$0xff]  ;;  %v10034_v30 = vand.u32 4294901760, %v2519_v28  ;;  %v10042_v34 = vand.u32 4294901760, %v2518_v31 }
 0x1da   : > { %8236 = vmatpush3.msra.mxu0 %v9715_v45  ;;  %8270 = vmatprep.subr.mxu1 %v9383_v1  ;;  %v1518_v51 = vsel %vm1016_vm4, %v1018_v43, 0 }
 0x1db   : > { %8237 = vmatprep.subr.mxu0 %v9383_v1  ;;  %8271 = vmatpush3.msra.mxu1 %v9717_v46  ;;  %v1647_v46 = vand.u32 4294901760, %v9801_v40  ;;  %v9838_v56 = vand.u32 4294901760, %v1518_v51 }
 0x1dc   : > { %8238 = vmatpush3.msra.mxu0 %v9723_v49  ;;  %8272 = vmatprep.subr.mxu1 %v9383_v1  ;;  %v2010_v49 = vld [vmem:[#allocation5 + $0x58] sm:$0xff] }
 0x1dd   : > { %8239 = vmatprep.subr.mxu0 %v9383_v1  ;;  %8273 = vmatpush3.msra.mxu1 %v9725_v50  ;;  %v1641_v50 = vsub.f32 %v9794_v38, %v1640_v42  ;;  %v9849_v45 = vsub.f32 %v1518_v51, %v9838_v56 }
 0x1de   : > { %8240 = vmatpush3.msra.mxu0 %v9734_v54  ;;  %8274 = vmatprep.subr.mxu1 %v9383_v1  ;;  %v9867_v54 = vand.u32 4294901760, %v2010_v49 }
 0x1df   : > { %8241 = vmatprep.subr.mxu0 %v9383_v1  ;;  %8243 = vmatprep.mubr.msk.f32.mxu0 %vm9384_vm0, %v9383_v1  ;;  %v1642_v57 = vand.u32 4294901760, %v1641_v50 }
 0x1e0   : > { %8242 = vmatpush3.msra.mxu0 %v9745_v59  ;;  %8275 = vmatpush3.msra.mxu1 %v9736_v55  ;;  %v1648_v55 = vsub.f32 %v9801_v40, %v1647_v46  ;;  %v2008_v59 = vld [vmem:[#allocation5 + $0x48] sm:$0xff]  ;;  %v9881_v63 = vsub.f32 %v2010_v49, %v9867_v54 }
 0x1e1   : > { %8276 = vmatprep.mubr.msk.f32.mxu1 %vm9384_vm0, %v9383_v1  ;;  %8244 = vmatmul.mubr.f32.vlgmr.msra.gmra.mxu0 %v1102_v25  ;;  %v9883_v0 = vand.u32 4294901760, %v2008_v59 }
 0x1e2   : > { %8257 = vmatprep.subr.mxu0 %v9383_v1  ;;  %8277 = vmatmul.mubr.f32.vlgmr.msra.gmra.mxu1 %v9764_v23  ;;  %v1649_v60 = vand.u32 4294901760, %v1648_v55  ;;  %v2120_v5 = vand.u32 4294901760, %v9881_v63 }
 0x1e3   : > { %8290 = vmatprep.subr.mxu1 %v9383_v1  ;;  %8258 = vmatpush3.msra.mxu0 %v1138_v48  ;;  %v1591_v48 = vand.u32 4294901760, %v9849_v45  ;;  %v9900_v6 = vsub.f32 %v2008_v59, %v9883_v0 }
 0x1e4   : > { %8291 = vmatpush3.msra.mxu1 %v1628_v47  ;;  %8259 = vmatprep.subr.mxu0 %v9383_v1  ;;  %v2121_v9 = vsub.f32 %v9881_v63, %v2120_v5 }
 0x1e5   : > { %8292 = vmatprep.subr.mxu1 %v9383_v1  ;;  %8260 = vmatpush3.msra.mxu0 %v1145_v53  ;;  %v2009_v53 = vld [vmem:[#allocation5 + $0x50] sm:$0xff]  ;;  %v2134_v10 = vand.u32 4294901760, %v9900_v6 }
 0x1e6   : > { %8293 = vmatpush3.msra.mxu1 %v1635_v52  ;;  %8261 = vmatprep.subr.mxu0 %v9383_v1  ;;  %v9874_v61 = vand.u32 4294901760, %v2009_v53  ;;  %v2122_v14 = vand.u32 4294901760, %v2121_v9 }
 0x1e7   : > { %8294 = vmatprep.subr.mxu1 %v9383_v1  ;;  %8262 = vmatpush3.msra.mxu0 %v1152_v58  ;;  %v1592_v58 = vsub.f32 %v9849_v45, %v1591_v48  ;;  %v2135_v15 = vsub.f32 %v9900_v6, %v2134_v10 }
 0x1e8   : > { %8295 = vmatpush3.msra.mxu1 %v1642_v57  ;;  %8263 = vmatprep.subr.mxu0 %v9383_v1  ;;  %v9891_v3 = vsub.f32 %v2009_v53, %v9874_v61 }
 0x1e9   : > { %8296 = vmatprep.subr.mxu1 %v9383_v1  ;;  %8264 = vmatpush3.msra.mxu0 %v1159_v62  ;;  %v2007_v62 = vld [vmem:[#allocation5 + $0x40] sm:$0xff]  ;;  %v1593_v2 = vand.u32 4294901760, %v1592_v58  ;;  %v2136_v20 = vand.u32 4294901760, %v2135_v15 }
 0x1ea   : > { %8265 = vmatprep.mubr.msk.f32.mxu0 %vm9384_vm0, %v9383_v1  ;;  %8297 = vmatpush3.msra.mxu1 %v1649_v60  ;;  %v9893_v4 = vand.u32 4294901760, %v2007_v62  ;;  %v2127_v7 = vand.u32 4294901760, %v9891_v3 }
 0x1eb   : > { %8298 = vmatprep.mubr.msk.f32.mxu1 %vm9384_vm0, %v9383_v1  ;;  %8266 = vmatmul.mubr.f32.vlgmr.msra.gmra.mxu0 %v9764_v23  ;;  %v2085_v23 = vand.u32 4294901760, %v2084_v22 }
 0x1ec   : > { %8279 = vmatprep.subr.mxu0 %v9383_v1  ;;  %8299 = vmatmul.mubr.f32.vlgmr.msra.gmra.mxu1 %v9838_v56  ;;  %v9908_v8 = vsub.f32 %v2007_v62, %v9893_v4  ;;  %v2128_v12 = vsub.f32 %v9891_v3, %v2127_v7 }
 0x1ed   : > { %8312 = vmatprep.subr.mxu1 %v9383_v1  ;;  %8280 = vmatpush3.msra.mxu0 %v9768_v26  ;;  %v2086_v24 = vsub.f32 %v2084_v22, %v2085_v23 }
 0x1ee   : > { %8313 = vmatpush3.msra.mxu1 %v9768_v26  ;;  %8281 = vmatprep.subr.mxu0 %v9383_v1  ;;  %v2141_v13 = vand.u32 4294901760, %v9908_v8  ;;  %v2129_v17 = vand.u32 4294901760, %v2128_v12 }
 0x1ef   : > { %8314 = vmatprep.subr.mxu1 %v9383_v1  ;;  %8282 = vmatpush3.msra.mxu0 %v9774_v29  ;;  %v2087_v25 = vand.u32 4294901760, %v2086_v24 }
 0x1f0   : > { %8315 = vmatpush3.msra.mxu1 %v9774_v29  ;;  %8283 = vmatprep.subr.mxu0 %v9383_v1  ;;  %v2142_v18 = vsub.f32 %v9908_v8, %v2141_v13 }
 0x1f1   : > { %8316 = vmatprep.subr.mxu1 %v9383_v1  ;;  %8284 = vmatpush3.msra.mxu0 %v9781_v33 }
 0x1f2   : > { %8317 = vmatpush3.msra.mxu1 %v9781_v33  ;;  %8285 = vmatprep.subr.mxu0 %v9383_v1  ;;  %v2143_v21 = vand.u32 4294901760, %v2142_v18 }
 0x1f3   : > { %8318 = vmatprep.subr.mxu1 %v9383_v1  ;;  %8286 = vmatpush3.msra.mxu0 %v9788_v36 }
 0x1f4   : > { %8287 = vmatprep.mubr.msk.f32.mxu0 %vm9384_vm0, %v9383_v1  ;;  %8319 = vmatpush3.msra.mxu1 %v9788_v36 }
 0x1f5   : > { %8320 = vmatprep.mubr.msk.f32.mxu1 %vm9384_vm0, %v9383_v1  ;;  %8288 = vmatmul.mubr.f32.vlgmr.msra.gmra.mxu0 %v1593_v2 }
 0x1f6   : > { %8301 = vmatprep.subr.mxu0 %v9383_v1  ;;  %8321 = vmatmul.mubr.f32.vlgmr.msra.gmra.mxu1 %v1591_v48 }
 0x1f7   : > { %8334 = vmatprep.subr.mxu1 %v9383_v1  ;;  %8302 = vmatpush3.msra.mxu0 %v9779_v32 }
 0x1f8   : > { %8335 = vmatpush3.msra.mxu1 %v9768_v26  ;;  %8303 = vmatprep.subr.mxu0 %v9383_v1  ;;  %v2520_v26 = vld [vmem:[#allocation7 + $0x38] sm:$0xff] }
 0x1f9   : > { %8336 = vmatprep.subr.mxu1 %v9383_v1  ;;  %8304 = vmatpush3.msra.mxu0 %v9786_v35  ;;  %v10029_v27 = vand.u32 4294901760, %v2520_v26  ;;  %v2517_v35 = vld [vmem:[#allocation7 + $0x20] sm:$0xff] }
 0x1fa   : > { %8337 = vmatpush3.msra.mxu1 %v9774_v29  ;;  %8305 = vmatprep.subr.mxu0 %v9383_v1 }
 0x1fb   : > { %8338 = vmatprep.subr.mxu1 %v9383_v1  ;;  %8306 = vmatpush3.msra.mxu0 %v9794_v38  ;;  %v10032_v29 = vsub.f32 %v2520_v26, %v10029_v27  ;;  %v10051_v38 = vsub.f32 %v2518_v31, %v10042_v34 }
 0x1fc   : > { %8339 = vmatpush3.msra.mxu1 %v9781_v33  ;;  %8307 = vmatprep.subr.mxu0 %v9383_v1  ;;  %v10040_v33 = vsub.f32 %v2519_v28, %v10034_v30 }
 0x1fd   : > { %8340 = vmatprep.subr.mxu1 %v9383_v1  ;;  %8308 = vmatpush3.msra.mxu0 %v9801_v40  ;;  %v2630_v32 = vand.u32 4294901760, %v10032_v29 }
 0x1fe   : > { %8309 = vmatprep.mubr.msk.f32.mxu0 %vm9384_vm0, %v9383_v1  ;;  %8341 = vmatpush3.msra.mxu1 %v9788_v36 }
 0x1ff   : > { %8342 = vmatprep.mubr.msk.f32.mxu1 %vm9384_vm0, %v9383_v1  ;;  %8310 = vmatmul.mubr.f32.vlgmr.msra.gmra.mxu0 %v9849_v45  ;;  %v2631_v36 = vsub.f32 %v10032_v29, %v2630_v32 }
 0x200   : > { %8323 = vmatprep.subr.mxu0 %v9383_v1  ;;  %8343 = vmatmul.mubr.f32.vlgmr.msra.gmra.mxu1 %v9838_v56 }
 0x201   : > { %8356 = vmatprep.subr.mxu1 %v9383_v1  ;;  %8324 = vmatpush3.msra.mxu0 %v1626_v37  ;;  %v2637_v37 = vand.u32 4294901760, %v10040_v33  ;;  %v2632_v40 = vand.u32 4294901760, %v2631_v36 }
 0x202   : > { %8357 = vmatpush3.msra.mxu1 %v2122_v14  ;;  %8325 = vmatprep.subr.mxu0 %v9383_v1 }
 0x203   : > { %8358 = vmatprep.subr.mxu1 %v9383_v1  ;;  %8326 = vmatpush3.msra.mxu0 %v1633_v39  ;;  %v10053_v39 = vand.u32 4294901760, %v2517_v35  ;;  %v2638_v41 = vsub.f32 %v10040_v33, %v2637_v37 }
 0x204   : > { %8359 = vmatpush3.msra.mxu1 %v2129_v17  ;;  %8327 = vmatprep.subr.mxu0 %v9383_v1 }
 0x205   : > { %8360 = vmatprep.subr.mxu1 %v9383_v1  ;;  %8328 = vmatpush3.msra.mxu0 %v1640_v42  ;;  %v2644_v42 = vand.u32 4294901760, %v10051_v38  ;;  %v10062_v43 = vsub.f32 %v2517_v35, %v10053_v39  ;;  %v2639_v44 = vand.u32 4294901760, %v2638_v41 }
 0x206   : > { %8361 = vmatpush3.msra.mxu1 %v2136_v20  ;;  %8329 = vmatprep.subr.mxu0 %v9383_v1 }
 0x207   : > { %8362 = vmatprep.subr.mxu1 %v9383_v1  ;;  %8330 = vmatpush3.msra.mxu0 %v1647_v46  ;;  %v2645_v46 = vsub.f32 %v10051_v38, %v2644_v42  ;;  %v2651_v47 = vand.u32 4294901760, %v10062_v43 }
 0x208   : > { %8331 = vmatprep.mubr.msk.f32.mxu0 %vm9384_vm0, %v9383_v1  ;;  %8363 = vmatpush3.msra.mxu1 %v2143_v21 }
 0x209   : > { %8364 = vmatprep.mubr.msk.f32.mxu1 %vm9384_vm0, %v9383_v1  ;;  %8332 = vmatmul.mubr.f32.vlgmr.msra.gmra.mxu0 %v9838_v56  ;;  %v2646_v50 = vand.u32 4294901760, %v2645_v46  ;;  %v2652_v51 = vsub.f32 %v10062_v43, %v2651_v47 }
 0x20a   : > { %8345 = vmatprep.subr.mxu0 %v9383_v1  ;;  %8365 = vmatmul.mubr.f32.vlgmr.msra.gmra.mxu1 %v9946_v19 }
 0x20b   : > { %8378 = vmatprep.subr.mxu1 %v9383_v1  ;;  %8346 = vmatpush3.msra.mxu0 %v9867_v54  ;;  %v2653_v52 = vand.u32 4294901760, %v2652_v51 }
 0x20c   : > { %8379 = vmatpush3.msra.mxu1 %v9867_v54  ;;  %8347 = vmatprep.subr.mxu0 %v9383_v1 }
 0x20d   : > { %8380 = vmatprep.subr.mxu1 %v9383_v1  ;;  %8348 = vmatpush3.msra.mxu0 %v9874_v61 }
 0x20e   : > { %8381 = vmatpush3.msra.mxu1 %v9874_v61  ;;  %8349 = vmatprep.subr.mxu0 %v9383_v1 }
 0x20f   : > { %8382 = vmatprep.subr.mxu1 %v9383_v1  ;;  %8350 = vmatpush3.msra.mxu0 %v9883_v0 }
 0x210   : > { %8383 = vmatpush3.msra.mxu1 %v9883_v0  ;;  %8351 = vmatprep.subr.mxu0 %v9383_v1 }
 0x211   : > { %8384 = vmatprep.subr.mxu1 %v9383_v1  ;;  %8352 = vmatpush3.msra.mxu0 %v9893_v4 }
 0x212   : > { %8353 = vmatprep.mubr.msk.f32.mxu0 %vm9384_vm0, %v9383_v1  ;;  %8385 = vmatpush3.msra.mxu1 %v9893_v4 }
 0x213   : > { %8386 = vmatprep.mubr.msk.f32.mxu1 %vm9384_vm0, %v9383_v1  ;;  %8354 = vmatmul.mubr.f32.vlgmr.msra.gmra.mxu0 %v2087_v25 }
 0x214   : > { %8367 = vmatprep.subr.mxu0 %v9383_v1  ;;  %8387 = vmatmul.mubr.f32.vlgmr.msra.gmra.mxu1 %v2085_v23 }
 0x215   : > { %8400 = vmatprep.subr.mxu1 %v9383_v1  ;;  %8368 = vmatpush3.msra.mxu0 %v9881_v63 }
 0x216   : > { %8401 = vmatpush3.msra.mxu1 %v9867_v54  ;;  %8369 = vmatprep.subr.mxu0 %v9383_v1 }
 0x217   : > { %8402 = vmatprep.subr.mxu1 %v9383_v1  ;;  %8370 = vmatpush3.msra.mxu0 %v9891_v3 }
 0x218   : > { %8403 = vmatpush3.msra.mxu1 %v9874_v61  ;;  %8371 = vmatprep.subr.mxu0 %v9383_v1 }
 0x219   : > { %8404 = vmatprep.subr.mxu1 %v9383_v1  ;;  %8372 = vmatpush3.msra.mxu0 %v9900_v6 }
 0x21a   : > { %8405 = vmatpush3.msra.mxu1 %v9883_v0  ;;  %8373 = vmatprep.subr.mxu0 %v9383_v1 }
 0x21b   : > { %8406 = vmatprep.subr.mxu1 %v9383_v1  ;;  %8374 = vmatpush3.msra.mxu0 %v9908_v8 }
 0x21c   : > { %8375 = vmatprep.mubr.msk.f32.mxu0 %vm9384_vm0, %v9383_v1  ;;  %8407 = vmatpush3.msra.mxu1 %v9893_v4 }
 0x21d   : > { %8408 = vmatprep.mubr.msk.f32.mxu1 %vm9384_vm0, %v9383_v1  ;;  %8376 = vmatmul.mubr.f32.vlgmr.msra.gmra.mxu0 %v2084_v22 }
 0x21e   : > { %8389 = vmatprep.subr.mxu0 %v9383_v1  ;;  %8409 = vmatmul.mubr.f32.vlgmr.msra.gmra.mxu1 %v9946_v19 }
 0x21f   : > { %8390 = vmatpush3.msra.mxu0 %v2120_v5  ;;  %8397 = vmatprep.mubr.msk.f32.mxu0 %vm9384_vm0, %v9383_v1 }
 0x220   : > { %8391 = vmatprep.subr.mxu0 %v9383_v1  ;;  %8422 = vmatprep.subr.mxu1 %v9383_v1 }
 0x221   : > { %8392 = vmatpush3.msra.mxu0 %v2127_v7  ;;  %8430 = vmatprep.mubr.msk.f32.mxu1 %vm9384_vm0, %v9383_v1 }
 0x222   : > { %8393 = vmatprep.subr.mxu0 %v9383_v1  ;;  %8423 = vmatpush3.msra.mxu1 %v2632_v40 }
 0x223   : > { %8394 = vmatpush3.msra.mxu0 %v2134_v10  ;;  %8424 = vmatprep.subr.mxu1 %v9383_v1 }
 0x224   : > { %8395 = vmatprep.subr.mxu0 %v9383_v1  ;;  %8425 = vmatpush3.msra.mxu1 %v2639_v44 }
 0x225   : > { %8396 = vmatpush3.msra.mxu0 %v2141_v13  ;;  %8426 = vmatprep.subr.mxu1 %v9383_v1 }
 0x226   : > { %8398 = vmatmul.mubr.f32.vlgmr.msra.gmra.mxu0 %v9946_v19  ;;  %8411 = vmatprep.subr.mxu0 %v9383_v1 }
 0x227   : > { %8419 = vmatprep.mubr.msk.f32.mxu0 %vm9384_vm0, %v9383_v1  ;;  %8412 = vmatpush3.msra.mxu0 %v10029_v27 }
 0x228   : > { %8413 = vmatprep.subr.mxu0 %v9383_v1  ;;  %8427 = vmatpush3.msra.mxu1 %v2646_v50 }
 0x229   : > { %8414 = vmatpush3.msra.mxu0 %v10034_v30  ;;  %8428 = vmatprep.subr.mxu1 %v9383_v1 }
 0x22a   : > { %8415 = vmatprep.subr.mxu0 %v9383_v1  ;;  %8429 = vmatpush3.msra.mxu1 %v2653_v52 }
 0x22b   : > { %8416 = vmatpush3.msra.mxu0 %v10042_v34  ;;  %8444 = vmatprep.subr.mxu1 %v9383_v1 }
 0x22c   : > { %8417 = vmatprep.subr.mxu0 %v9383_v1 }
 0x22d   : > { %8418 = vmatpush3.msra.mxu0 %v10053_v39 }
 0x22e   : > { %8433 = vmatprep.subr.mxu0 %v9383_v1 }
 0x290   : > { %v1198_v55 = vpop.f32.mrf.mxu1 }
 0x292   : > { %v8234_v56 = vpop.f32.mrf.mxu1 }
 0x293   : > { %v7678_v56 = vld [vmem:[%s11180_s3] ss:$0 sm:$0xff] }
 0x298   : > { %v1355_v57 = vpop.f32.mrf.mxu1 }
 0x299   : > { %v1107_v60 = vpop.f32.mrf.mxu0 }
 0x29a   : > { %v8256_v45 = vpop.f32.mrf.mxu1  ;;  %v1199_v49 = vadd.f32 %v1198_v55, %v1107_v60 }
 0x29b   : > { %v8223_v48 = vpop.f32.mrf.mxu0 }
 0x2a1   : > { %v1278_v53 = vpop.f32.mrf.mxu0 }
 0x2a2   : > { %v1279_v54 = vadd.f32 %v1278_v53, %v1199_v49  ;;  %v1513_v58 = vpop.f32.mrf.mxu1  ;;  %v2514_v53 = vld [vmem:[#allocation7 + $0x18] sm:$0xff] }
 0x2a3   : > { %v8245_v59 = vpop.f32.mrf.mxu0 }
 0x2a4   : > { %v8278_v61 = vpop.f32.mrf.mxu1  ;;  %v1356_v62 = vadd.f32 %v1355_v57, %v1279_v54 }
 0x2a5   : > { %v10086_v61 = vand.u32 4294901760, %v2514_v53 }
 0x2ab   : > { %v1438_v63 = vpop.f32.mrf.mxu0 }
 0x2ac   : > { %v1686_v0 = vpop.f32.mrf.mxu1  ;;  %v1439_v16 = vadd.f32 %v1438_v63, %v1356_v62  ;;  %v2512_v62 = vld [vmem:[#allocation7 + $0x8] sm:$0xff] }
 0x2ad   : > { %v8267_v2 = vpop.f32.mrf.mxu0 }
 0x2ae   : > { %v8300_v3 = vpop.f32.mrf.mxu1  ;;  %v1514_v21 = vadd.f32 %v1513_v58, %v1439_v16  ;;  %v2513_v58 = vld [vmem:[#allocation7 + $0x10] sm:$0xff]  ;;  %v2511_v2 = vld [vmem:[#allocation7] sm:$0xff] }
 0x2b5   : > { %v1595_v4 = vpop.f32.mrf.mxu0 }
 0x2b6   : > { %v1843_v5 = vpop.f32.mrf.mxu1  ;;  %v1596_v22 = vadd.f32 %v1595_v4, %v1514_v21  ;;  %v10097_v4 = vsub.f32 %v2514_v53, %v10086_v61 }
 0x2b7   : > { %v8289_v6 = vpop.f32.mrf.mxu0 }
 0x2b8   : > { %v8322_v7 = vpop.f32.mrf.mxu1  ;;  %v1687_v23 = vadd.f32 %v1686_v0, %v1596_v22  ;;  %v10092_v0 = vand.u32 4294901760, %v2513_v58  ;;  %v3499_v22 = vld [vmem:[#allocation7 + $0x40] sm:$0xff] }
 0x2ba   : > { %v10104_v7 = vsub.f32 %v2513_v58, %v10092_v0 }
 0x2bf   : > { %v1766_v8 = vpop.f32.mrf.mxu0 }
 0x2c0   : > { %v2001_v9 = vpop.f32.mrf.mxu1  ;;  %v1767_v26 = vadd.f32 %v1766_v8, %v1687_v23  ;;  %v10106_v8 = vand.u32 4294901760, %v2511_v2 }
 0x2c1   : > { %v8311_v10 = vpop.f32.mrf.mxu0 }
 0x2c2   : > { %v8344_v11 = vpop.f32.mrf.mxu1  ;;  %v1844_v40 = vadd.f32 %v1843_v5, %v1767_v26  ;;  %v10099_v5 = vand.u32 4294901760, %v2512_v62 }
 0x2c3   : > { %v3125_v11 = vand.u32 4294901760, %v10104_v7 }
 0x2c4   : > { %v10112_v10 = vsub.f32 %v2512_v62, %v10099_v5 }
 0x2c9   : > { %v1926_v12 = vpop.f32.mrf.mxu0 }
 0x2ca   : > { %v2180_v13 = vpop.f32.mrf.mxu1  ;;  %v1927_v41 = vadd.f32 %v1926_v12, %v1844_v40  ;;  %v10119_v12 = vsub.f32 %v2511_v2, %v10106_v8 }
 0x2cb   : > { %v8333_v14 = vpop.f32.mrf.mxu0 }
 0x2cc   : > { %v8366_v15 = vpop.f32.mrf.mxu1  ;;  %v2002_v52 = vadd.f32 %v2001_v9, %v1927_v41  ;;  %v3118_v9 = vand.u32 4294901760, %v10097_v4 }
 0x2cd   : > { %v3139_v15 = vand.u32 4294901760, %v10119_v12 }
 0x2d3   : > { %v2089_v17 = vpop.f32.mrf.mxu0 }
 0x2d4   : > { %v2337_v18 = vpop.f32.mrf.mxu1  ;;  %v2181_v28 = vadd.f32 %v2180_v13, %v2089_v17  ;;  %v3132_v13 = vand.u32 4294901760, %v10112_v10 }
 0x2d5   : > { %v8355_v19 = vpop.f32.mrf.mxu0 }
 0x2d6   : > { %v8388_v20 = vpop.f32.mrf.mxu1  ;;  %v3133_v16 = vsub.f32 %v10112_v10, %v3132_v13 }
 0x2d8   : > { %v3134_v20 = vand.u32 4294901760, %v3133_v16 }
 0x2dd   : > { %v2260_v24 = vpop.f32.mrf.mxu0 }
 0x2de   : > { %v2495_v25 = vpop.f32.mrf.mxu1  ;;  %v2261_v36 = vadd.f32 %v2260_v24, %v2181_v28  ;;  %v10211_v28 = vand.u32 4294901760, %v3499_v22 }
 0x2df   : > { %v8377_v31 = vpop.f32.mrf.mxu0 }
 0x2e0   : > { %v8410_v35 = vpop.f32.mrf.mxu1  ;;  %v2338_v44 = vadd.f32 %v2337_v18, %v2261_v36  ;;  %v10226_v40 = vsub.f32 %v3499_v22, %v10211_v28 }
 0x2e6   : > { %v2420_v46 = vpop.f32.mrf.mxu0 }
 0x2e7   : > { %v2421_v50 = vadd.f32 %v2420_v46, %v2338_v44 }
 0x2e8   : > { %v8399_v51 = vpop.f32.mrf.mxu0 }
 0x2e9   : > { %v2496_v55 = vadd.f32 %v2495_v25, %v2421_v50  ;;  %v3633_v51 = vand.u32 4294901760, %v10226_v40 }
 0x2eb   : > { %v2499_v57 = vadd.f32 %v2496_v55, %v2002_v52 }
 0x2ed   : > { %v2507_v60 = vadd.f32 %v7678_v56, %v2499_v57 }
 0x2ef   : > { %v2508_v45 = vmax.f32 %v2507_v60, 0.0  ;;  %v3634_v60 = vsub.f32 %v10226_v40, %v3633_v51 }
 0x2f1   : > { %2509 = vst.msk [vmem:[#allocation2 + $0x8] sm:$0xff] %vm1016_vm4, %v2508_v45 }
 0x2f8   : > { %v2515_v48 = vld [vmem:[#allocation2 + $0x8] sm:$0xff] }
 0x2f9   : > { %v2522_v49 = vsel %vm1016_vm4, %v2515_v48, 0  ;;  %v2510_v14 = vld [vmem:[#allocation2 + $0x7] sm:$0xff] }
 0x2fa   : > { %v10082_v54 = vand.u32 4294901760, %v2522_v49  ;;  %v3010_v17 = vsel %vm1016_vm4, %v2510_v14, 0  ;;  %v3497_v46 = vld [vmem:[#allocation2 + $0x9] sm:$0xff] }
 0x2fb   : > { %v10156_v19 = vand.u32 4294901760, %v3010_v17  ;;  %v3504_v56 = vsel %vm1016_vm4, %v3497_v46, 0 }
 0x2fc   : > { %v2594_v59 = vsub.f32 %v2522_v49, %v10082_v54  ;;  %8431 = vmatmul.mubr.f32.vlgmr.msra.gmra.mxu1 %v10082_v54  ;;  %v10264_v45 = vand.u32 4294901760, %v3504_v56  ;;  %v3635_v49 = vand.u32 4294901760, %v3634_v60 }
 0x2fd   : > { %8445 = vmatpush3.msra.mxu1 %v10029_v27  ;;  %8452 = vmatprep.mubr.msk.f32.mxu1 %vm9384_vm0, %v9383_v1 }
 0x2fe   : > { %8446 = vmatprep.subr.mxu1 %v9383_v1  ;;  %v2595_v63 = vand.u32 4294901760, %v2594_v59  ;;  %v3576_v53 = vsub.f32 %v3504_v56, %v10264_v45 }
 0x2ff   : > { %8447 = vmatpush3.msra.mxu1 %v10034_v30 }
 0x300   : > { %8448 = vmatprep.subr.mxu1 %v9383_v1  ;;  %v2596_v3 = vsub.f32 %v2594_v59, %v2595_v63 }
 0x301   : > { %8449 = vmatpush3.msra.mxu1 %v10042_v34 }
 0x302   : > { %8450 = vmatprep.subr.mxu1 %v9383_v1  ;;  %v2597_v6 = vand.u32 4294901760, %v2596_v3  ;;  %v4010_v3 = vld [vmem:[#allocation8 + $0x28] sm:$0xff] }
 0x303   : > { %8451 = vmatpush3.msra.mxu1 %v10053_v39 }
 0x304   : > { %8453 = vmatmul.mubr.f32.vlgmr.msra.gmra.mxu1 %v2595_v63  ;;  %8466 = vmatprep.subr.mxu1 %v9383_v1  ;;  %v4011_v63 = vld [vmem:[#allocation8 + $0x30] sm:$0xff] }
 0x305   : > { %8420 = vmatmul.mubr.f32.vlgmr.msra.gmra.mxu0 %v2597_v6  ;;  %8467 = vmatpush3.msra.mxu1 %v10029_v27  ;;  %v3119_v27 = vsub.f32 %v10097_v4, %v3118_v9  ;;  %v10352_v2 = vand.u32 4294901760, %v4011_v63  ;;  %v10360_v6 = vand.u32 4294901760, %v4010_v3 }
 0x306   : > { %8434 = vmatpush3.msra.mxu0 %v10032_v29  ;;  %8468 = vmatprep.subr.mxu1 %v9383_v1  ;;  %v10167_v29 = vsub.f32 %v3010_v17, %v10156_v19 }
 0x307   : > { %8435 = vmatprep.subr.mxu0 %v9383_v1  ;;  %8469 = vmatpush3.msra.mxu1 %v10034_v30  ;;  %v3126_v30 = vsub.f32 %v10104_v7, %v3125_v11 }
 0x308   : > { %8436 = vmatpush3.msra.mxu0 %v10040_v33  ;;  %8470 = vmatprep.subr.mxu1 %v9383_v1  ;;  %v3502_v33 = vld [vmem:[#allocation7 + $0x58] sm:$0xff] }
 0x309   : > { %8437 = vmatprep.subr.mxu0 %v9383_v1  ;;  %8471 = vmatpush3.msra.mxu1 %v10042_v34  ;;  %v3120_v34 = vand.u32 4294901760, %v3119_v27  ;;  %v3127_v18 = vand.u32 4294901760, %v3126_v30 }
 0x30a   : > { %8438 = vmatpush3.msra.mxu0 %v10051_v38  ;;  %8472 = vmatprep.subr.mxu1 %v9383_v1  ;;  %v10185_v38 = vand.u32 4294901760, %v3502_v33 }
 0x30b   : > { %8439 = vmatprep.subr.mxu0 %v9383_v1  ;;  %8441 = vmatprep.mubr.msk.f32.mxu0 %vm9384_vm0, %v9383_v1 }
 0x30c   : > { %8440 = vmatpush3.msra.mxu0 %v10062_v43  ;;  %8473 = vmatpush3.msra.mxu1 %v10053_v39  ;;  %v3140_v39 = vsub.f32 %v10119_v12, %v3139_v15  ;;  %v3500_v43 = vld [vmem:[#allocation7 + $0x48] sm:$0xff]  ;;  %v10199_v23 = vsub.f32 %v3502_v33, %v10185_v38 }
 0x30d   : > { %8474 = vmatprep.mubr.msk.f32.mxu1 %vm9384_vm0, %v9383_v1  ;;  %8442 = vmatmul.mubr.f32.vlgmr.msra.gmra.mxu0 %v2594_v59  ;;  %v10201_v24 = vand.u32 4294901760, %v3500_v43 }
 0x30e   : > { %8455 = vmatprep.subr.mxu0 %v9383_v1  ;;  %8475 = vmatmul.mubr.f32.vlgmr.msra.gmra.mxu1 %v10082_v54  ;;  %v3141_v21 = vand.u32 4294901760, %v3140_v39  ;;  %v3612_v31 = vand.u32 4294901760, %v10199_v23 }
 0x30f   : > { %8488 = vmatprep.subr.mxu1 %v9383_v1  ;;  %8456 = vmatpush3.msra.mxu0 %v2630_v32  ;;  %v3083_v32 = vand.u32 4294901760, %v10167_v29  ;;  %v10218_v35 = vsub.f32 %v3500_v43, %v10201_v24 }
 0x310   : > { %8489 = vmatpush3.msra.mxu1 %v3120_v34  ;;  %8457 = vmatprep.subr.mxu0 %v9383_v1  ;;  %v3613_v41 = vsub.f32 %v10199_v23, %v3612_v31 }
 0x311   : > { %8490 = vmatprep.subr.mxu1 %v9383_v1  ;;  %8458 = vmatpush3.msra.mxu0 %v2637_v37  ;;  %v3501_v37 = vld [vmem:[#allocation7 + $0x50] sm:$0xff]  ;;  %v3626_v44 = vand.u32 4294901760, %v10218_v35 }
 0x312   : > { %8491 = vmatpush3.msra.mxu1 %v3127_v18  ;;  %8459 = vmatprep.subr.mxu0 %v9383_v1  ;;  %v3614_v52 = vand.u32 4294901760, %v3613_v41 }
 0x313   : > { %8492 = vmatprep.subr.mxu1 %v9383_v1  ;;  %8460 = vmatpush3.msra.mxu0 %v2644_v42  ;;  %v3084_v42 = vsub.f32 %v10167_v29, %v3083_v32  ;;  %v3627_v55 = vsub.f32 %v10218_v35, %v3626_v44 }
 0x314   : > { %8493 = vmatpush3.msra.mxu1 %v3134_v20  ;;  %8461 = vmatprep.subr.mxu0 %v9383_v1 }
 0x315   : > { %8494 = vmatprep.subr.mxu1 %v9383_v1  ;;  %8462 = vmatpush3.msra.mxu0 %v2651_v47  ;;  %v10192_v47 = vand.u32 4294901760, %v3501_v37  ;;  %v3085_v25 = vand.u32 4294901760, %v3084_v42  ;;  %v3628_v48 = vand.u32 4294901760, %v3627_v55 }
 0x316   : > { %8463 = vmatprep.mubr.msk.f32.mxu0 %vm9384_vm0, %v9383_v1  ;;  %8495 = vmatpush3.msra.mxu1 %v3141_v21 }
 0x317   : > { %8496 = vmatprep.mubr.msk.f32.mxu1 %vm9384_vm0, %v9383_v1  ;;  %8464 = vmatmul.mubr.f32.vlgmr.msra.gmra.mxu0 %v10082_v54  ;;  %v10209_v26 = vsub.f32 %v3501_v37, %v10192_v47  ;;  %v3577_v54 = vand.u32 4294901760, %v3576_v53 }
 0x318   : > { %8477 = vmatprep.subr.mxu0 %v9383_v1  ;;  %8497 = vmatmul.mubr.f32.vlgmr.msra.gmra.mxu1 %v10156_v19 }
 0x319   : > { %8510 = vmatprep.subr.mxu1 %v9383_v1  ;;  %8478 = vmatpush3.msra.mxu0 %v10086_v61  ;;  %v3619_v36 = vand.u32 4294901760, %v10209_v26  ;;  %v3578_v58 = vsub.f32 %v3576_v53, %v3577_v54 }
 0x31a   : > { %8511 = vmatpush3.msra.mxu1 %v10086_v61  ;;  %8479 = vmatprep.subr.mxu0 %v9383_v1 }
 0x31b   : > { %8512 = vmatprep.subr.mxu1 %v9383_v1  ;;  %8480 = vmatpush3.msra.mxu0 %v10092_v0  ;;  %v3620_v50 = vsub.f32 %v10209_v26, %v3619_v36  ;;  %v3579_v59 = vand.u32 4294901760, %v3578_v58 }
 0x31c   : > { %8513 = vmatpush3.msra.mxu1 %v10092_v0  ;;  %8481 = vmatprep.subr.mxu0 %v9383_v1 }
 0x31d   : > { %8514 = vmatprep.subr.mxu1 %v9383_v1  ;;  %8482 = vmatpush3.msra.mxu0 %v10099_v5  ;;  %v3621_v57 = vand.u32 4294901760, %v3620_v50 }
 0x31e   : > { %8515 = vmatpush3.msra.mxu1 %v10099_v5  ;;  %8483 = vmatprep.subr.mxu0 %v9383_v1 }
 0x31f   : > { %8516 = vmatprep.subr.mxu1 %v9383_v1  ;;  %8484 = vmatpush3.msra.mxu0 %v10106_v8 }
 0x320   : > { %8485 = vmatprep.mubr.msk.f32.mxu0 %vm9384_vm0, %v9383_v1  ;;  %8517 = vmatpush3.msra.mxu1 %v10106_v8 }
 0x321   : > { %8518 = vmatprep.mubr.msk.f32.mxu1 %vm9384_vm0, %v9383_v1  ;;  %8486 = vmatmul.mubr.f32.vlgmr.msra.gmra.mxu0 %v3085_v25 }
 0x322   : > { %8499 = vmatprep.subr.mxu0 %v9383_v1  ;;  %8519 = vmatmul.mubr.f32.vlgmr.msra.gmra.mxu1 %v3083_v32 }
 0x323   : > { %8532 = vmatprep.subr.mxu1 %v9383_v1  ;;  %8500 = vmatpush3.msra.mxu0 %v10097_v4 }
 0x324   : > { %8533 = vmatpush3.msra.mxu1 %v10086_v61  ;;  %8501 = vmatprep.subr.mxu0 %v9383_v1  ;;  %v4012_v61 = vld [vmem:[#allocation8 + $0x38] sm:$0xff] }
 0x325   : > { %8534 = vmatprep.subr.mxu1 %v9383_v1  ;;  %8502 = vmatpush3.msra.mxu0 %v10104_v7  ;;  %v10347_v62 = vand.u32 4294901760, %v4012_v61  ;;  %v4009_v7 = vld [vmem:[#allocation8 + $0x20] sm:$0xff] }
 0x326   : > { %8535 = vmatpush3.msra.mxu1 %v10092_v0  ;;  %8503 = vmatprep.subr.mxu0 %v9383_v1 }
 0x327   : > { %8536 = vmatprep.subr.mxu1 %v9383_v1  ;;  %8504 = vmatpush3.msra.mxu0 %v10112_v10  ;;  %v10350_v0 = vsub.f32 %v4012_v61, %v10347_v62  ;;  %v10369_v10 = vsub.f32 %v4010_v3, %v10360_v6 }
 0x328   : > { %8537 = vmatpush3.msra.mxu1 %v10099_v5  ;;  %8505 = vmatprep.subr.mxu0 %v9383_v1  ;;  %v10358_v5 = vsub.f32 %v4011_v63, %v10352_v2 }
 0x329   : > { %8538 = vmatprep.subr.mxu1 %v9383_v1  ;;  %8506 = vmatpush3.msra.mxu0 %v10119_v12  ;;  %v4122_v4 = vand.u32 4294901760, %v10350_v0 }
 0x32a   : > { %8507 = vmatprep.mubr.msk.f32.mxu0 %vm9384_vm0, %v9383_v1  ;;  %8539 = vmatpush3.msra.mxu1 %v10106_v8 }
 0x32b   : > { %8540 = vmatprep.mubr.msk.f32.mxu1 %vm9384_vm0, %v9383_v1  ;;  %8508 = vmatmul.mubr.f32.vlgmr.msra.gmra.mxu0 %v10167_v29  ;;  %v4123_v8 = vsub.f32 %v10350_v0, %v4122_v4 }
 0x32c   : > { %8521 = vmatprep.subr.mxu0 %v9383_v1  ;;  %8541 = vmatmul.mubr.f32.vlgmr.msra.gmra.mxu1 %v10156_v19 }
 0x32d   : > { %8554 = vmatprep.subr.mxu1 %v9383_v1  ;;  %8522 = vmatpush3.msra.mxu0 %v3118_v9  ;;  %v4129_v9 = vand.u32 4294901760, %v10358_v5  ;;  %v4124_v12 = vand.u32 4294901760, %v4123_v8 }
 0x32e   : > { %8555 = vmatpush3.msra.mxu1 %v3614_v52  ;;  %8523 = vmatprep.subr.mxu0 %v9383_v1 }
 0x32f   : > { %8556 = vmatprep.subr.mxu1 %v9383_v1  ;;  %8524 = vmatpush3.msra.mxu0 %v3125_v11  ;;  %v10371_v11 = vand.u32 4294901760, %v4009_v7  ;;  %v4130_v27 = vsub.f32 %v10358_v5, %v4129_v9 }
 0x330   : > { %8557 = vmatpush3.msra.mxu1 %v3621_v57  ;;  %8525 = vmatprep.subr.mxu0 %v9383_v1 }
 0x331   : > { %8558 = vmatprep.subr.mxu1 %v9383_v1  ;;  %8526 = vmatpush3.msra.mxu0 %v3132_v13  ;;  %v4136_v13 = vand.u32 4294901760, %v10369_v10  ;;  %v10380_v14 = vsub.f32 %v4009_v7, %v10371_v11  ;;  %v4131_v30 = vand.u32 4294901760, %v4130_v27 }
 0x332   : > { %8559 = vmatpush3.msra.mxu1 %v3628_v48  ;;  %8527 = vmatprep.subr.mxu0 %v9383_v1 }
 0x333   : > { %8560 = vmatprep.subr.mxu1 %v9383_v1  ;;  %8528 = vmatpush3.msra.mxu0 %v3139_v15  ;;  %v4137_v15 = vsub.f32 %v10369_v10, %v4136_v13  ;;  %v4143_v34 = vand.u32 4294901760, %v10380_v14 }
 0x334   : > { %8529 = vmatprep.mubr.msk.f32.mxu0 %vm9384_vm0, %v9383_v1  ;;  %8561 = vmatpush3.msra.mxu1 %v3635_v49 }
 0x335   : > { %8562 = vmatprep.mubr.msk.f32.mxu1 %vm9384_vm0, %v9383_v1  ;;  %8530 = vmatmul.mubr.f32.vlgmr.msra.gmra.mxu0 %v10156_v19  ;;  %v4138_v16 = vand.u32 4294901760, %v4137_v15  ;;  %v4144_v17 = vsub.f32 %v10380_v14, %v4143_v34 }
 0x336   : > { %8543 = vmatprep.subr.mxu0 %v9383_v1  ;;  %8563 = vmatmul.mubr.f32.vlgmr.msra.gmra.mxu1 %v10264_v45 }
 0x337   : > { %8576 = vmatprep.subr.mxu1 %v9383_v1  ;;  %8544 = vmatpush3.msra.mxu0 %v10185_v38  ;;  %v4145_v18 = vand.u32 4294901760, %v4144_v17 }
 0x338   : > { %8577 = vmatpush3.msra.mxu1 %v10185_v38  ;;  %8545 = vmatprep.subr.mxu0 %v9383_v1 }
 0x339   : > { %8578 = vmatprep.subr.mxu1 %v9383_v1  ;;  %8546 = vmatpush3.msra.mxu0 %v10192_v47 }
 0x33a   : > { %8579 = vmatpush3.msra.mxu1 %v10192_v47  ;;  %8547 = vmatprep.subr.mxu0 %v9383_v1 }
 0x33b   : > { %8580 = vmatprep.subr.mxu1 %v9383_v1  ;;  %8548 = vmatpush3.msra.mxu0 %v10201_v24 }
 0x33c   : > { %8581 = vmatpush3.msra.mxu1 %v10201_v24  ;;  %8549 = vmatprep.subr.mxu0 %v9383_v1 }
 0x33d   : > { %8582 = vmatprep.subr.mxu1 %v9383_v1  ;;  %8550 = vmatpush3.msra.mxu0 %v10211_v28 }
 0x33e   : > { %8551 = vmatprep.mubr.msk.f32.mxu0 %vm9384_vm0, %v9383_v1  ;;  %8583 = vmatpush3.msra.mxu1 %v10211_v28 }
 0x33f   : > { %8584 = vmatprep.mubr.msk.f32.mxu1 %vm9384_vm0, %v9383_v1  ;;  %8552 = vmatmul.mubr.f32.vlgmr.msra.gmra.mxu0 %v3579_v59 }
 0x340   : > { %8565 = vmatprep.subr.mxu0 %v9383_v1  ;;  %8585 = vmatmul.mubr.f32.vlgmr.msra.gmra.mxu1 %v3577_v54 }
 0x341   : > { %8598 = vmatprep.subr.mxu1 %v9383_v1  ;;  %8566 = vmatpush3.msra.mxu0 %v10199_v23 }
 0x342   : > { %8599 = vmatpush3.msra.mxu1 %v10185_v38  ;;  %8567 = vmatprep.subr.mxu0 %v9383_v1 }
 0x343   : > { %8600 = vmatprep.subr.mxu1 %v9383_v1  ;;  %8568 = vmatpush3.msra.mxu0 %v10209_v26 }
 0x344   : > { %8601 = vmatpush3.msra.mxu1 %v10192_v47  ;;  %8569 = vmatprep.subr.mxu0 %v9383_v1 }
 0x345   : > { %8602 = vmatprep.subr.mxu1 %v9383_v1  ;;  %8570 = vmatpush3.msra.mxu0 %v10218_v35 }
 0x346   : > { %8603 = vmatpush3.msra.mxu1 %v10201_v24  ;;  %8571 = vmatprep.subr.mxu0 %v9383_v1 }
 0x347   : > { %8604 = vmatprep.subr.mxu1 %v9383_v1  ;;  %8572 = vmatpush3.msra.mxu0 %v10226_v40 }
 0x348   : > { %8573 = vmatprep.mubr.msk.f32.mxu0 %vm9384_vm0, %v9383_v1  ;;  %8605 = vmatpush3.msra.mxu1 %v10211_v28 }
 0x349   : > { %8606 = vmatprep.mubr.msk.f32.mxu1 %vm9384_vm0, %v9383_v1  ;;  %8574 = vmatmul.mubr.f32.vlgmr.msra.gmra.mxu0 %v3576_v53 }
 0x34a   : > { %8587 = vmatprep.subr.mxu0 %v9383_v1  ;;  %8607 = vmatmul.mubr.f32.vlgmr.msra.gmra.mxu1 %v10264_v45 }
 0x34b   : > { %8588 = vmatpush3.msra.mxu0 %v3612_v31  ;;  %8595 = vmatprep.mubr.msk.f32.mxu0 %vm9384_vm0, %v9383_v1 }
 0x34c   : > { %8589 = vmatprep.subr.mxu0 %v9383_v1  ;;  %8620 = vmatprep.subr.mxu1 %v9383_v1 }
 0x34d   : > { %8590 = vmatpush3.msra.mxu0 %v3619_v36  ;;  %8628 = vmatprep.mubr.msk.f32.mxu1 %vm9384_vm0, %v9383_v1 }
 0x34e   : > { %8591 = vmatprep.subr.mxu0 %v9383_v1  ;;  %8621 = vmatpush3.msra.mxu1 %v4124_v12 }
 0x34f   : > { %8592 = vmatpush3.msra.mxu0 %v3626_v44  ;;  %8622 = vmatprep.subr.mxu1 %v9383_v1 }
 0x350   : > { %8593 = vmatprep.subr.mxu0 %v9383_v1  ;;  %8623 = vmatpush3.msra.mxu1 %v4131_v30 }
 0x351   : > { %8594 = vmatpush3.msra.mxu0 %v3633_v51  ;;  %8624 = vmatprep.subr.mxu1 %v9383_v1 }
 0x352   : > { %8596 = vmatmul.mubr.f32.vlgmr.msra.gmra.mxu0 %v10264_v45  ;;  %8609 = vmatprep.subr.mxu0 %v9383_v1 }
 0x353   : > { %8617 = vmatprep.mubr.msk.f32.mxu0 %vm9384_vm0, %v9383_v1  ;;  %8610 = vmatpush3.msra.mxu0 %v10347_v62 }
 0x354   : > { %8611 = vmatprep.subr.mxu0 %v9383_v1  ;;  %8625 = vmatpush3.msra.mxu1 %v4138_v16 }
 0x355   : > { %8612 = vmatpush3.msra.mxu0 %v10352_v2  ;;  %8626 = vmatprep.subr.mxu1 %v9383_v1 }
 0x356   : > { %8613 = vmatprep.subr.mxu0 %v9383_v1  ;;  %8627 = vmatpush3.msra.mxu1 %v4145_v18 }
 0x357   : > { %8614 = vmatpush3.msra.mxu0 %v10360_v6  ;;  %8642 = vmatprep.subr.mxu1 %v9383_v1 }
 0x358   : > { %8615 = vmatprep.subr.mxu0 %v9383_v1 }
 0x359   : > { %8616 = vmatpush3.msra.mxu0 %v10371_v11 }
 0x35a   : > { %8631 = vmatprep.subr.mxu0 %v9383_v1 }
 0x3bc   : > { %v2690_v39 = vpop.f32.mrf.mxu1 }
 0x3be   : > { %v8432_v19 = vpop.f32.mrf.mxu1 }
 0x3bf   : > { %v7679_v19 = vld [vmem:[%s11182_s5] ss:$0 sm:$0xff] }
 0x3c4   : > { %v2847_v20 = vpop.f32.mrf.mxu1 }
 0x3c5   : > { %v2599_v21 = vpop.f32.mrf.mxu0 }
 0x3c6   : > { %v8454_v29 = vpop.f32.mrf.mxu1  ;;  %v2691_v33 = vadd.f32 %v2690_v39, %v2599_v21 }
 0x3c7   : > { %v8421_v32 = vpop.f32.mrf.mxu0 }
 0x3cd   : > { %v2770_v37 = vpop.f32.mrf.mxu0 }
 0x3ce   : > { %v2771_v38 = vadd.f32 %v2770_v37, %v2691_v33  ;;  %v3005_v42 = vpop.f32.mrf.mxu1  ;;  %v4006_v37 = vld [vmem:[#allocation8 + $0x18] sm:$0xff] }
 0x3cf   : > { %v8443_v43 = vpop.f32.mrf.mxu0 }
 0x3d0   : > { %v8476_v47 = vpop.f32.mrf.mxu1  ;;  %v2848_v22 = vadd.f32 %v2847_v20, %v2771_v38 }
 0x3d1   : > { %v10404_v47 = vand.u32 4294901760, %v4006_v37 }
 0x3d7   : > { %v2930_v23 = vpop.f32.mrf.mxu0 }
 0x3d8   : > { %v3178_v24 = vpop.f32.mrf.mxu1  ;;  %v2931_v56 = vadd.f32 %v2930_v23, %v2848_v22  ;;  %v4004_v22 = vld [vmem:[#allocation8 + $0x8] sm:$0xff] }
 0x3d9   : > { %v8465_v25 = vpop.f32.mrf.mxu0 }
 0x3da   : > { %v8498_v26 = vpop.f32.mrf.mxu1  ;;  %v3006_v49 = vadd.f32 %v3005_v42, %v2931_v56  ;;  %v4005_v42 = vld [vmem:[#allocation8 + $0x10] sm:$0xff]  ;;  %v4003_v25 = vld [vmem:[#allocation8] sm:$0xff] }
 0x3e1   : > { %v3087_v28 = vpop.f32.mrf.mxu0 }
 0x3e2   : > { %v3335_v31 = vpop.f32.mrf.mxu1  ;;  %v3088_v53 = vadd.f32 %v3087_v28, %v3006_v49  ;;  %v10415_v28 = vsub.f32 %v4006_v37, %v10404_v47 }
 0x3e3   : > { %v8487_v35 = vpop.f32.mrf.mxu0 }
 0x3e4   : > { %v8520_v36 = vpop.f32.mrf.mxu1  ;;  %v3179_v54 = vadd.f32 %v3178_v24, %v3088_v53  ;;  %v10410_v24 = vand.u32 4294901760, %v4005_v42  ;;  %v4991_v53 = vld [vmem:[#allocation8 + $0x40] sm:$0xff] }
 0x3e6   : > { %v10422_v36 = vsub.f32 %v4005_v42, %v10410_v24 }
 0x3eb   : > { %v3258_v40 = vpop.f32.mrf.mxu0 }
 0x3ec   : > { %v3493_v41 = vpop.f32.mrf.mxu1  ;;  %v3259_v61 = vadd.f32 %v3258_v40, %v3179_v54  ;;  %v10424_v40 = vand.u32 4294901760, %v4003_v25 }
 0x3ed   : > { %v8509_v44 = vpop.f32.mrf.mxu0 }
 0x3ee   : > { %v8542_v46 = vpop.f32.mrf.mxu1  ;;  %v3336_v12 = vadd.f32 %v3335_v31, %v3259_v61  ;;  %v10417_v31 = vand.u32 4294901760, %v4004_v22 }
 0x3ef   : > { %v4617_v46 = vand.u32 4294901760, %v10422_v36 }
 0x3f0   : > { %v10430_v44 = vsub.f32 %v4004_v22, %v10417_v31 }
 0x3f5   : > { %v3418_v50 = vpop.f32.mrf.mxu0 }
 0x3f6   : > { %v3672_v51 = vpop.f32.mrf.mxu1  ;;  %v3419_v27 = vadd.f32 %v3418_v50, %v3336_v12  ;;  %v10437_v50 = vsub.f32 %v4003_v25, %v10424_v40 }
 0x3f7   : > { %v8531_v52 = vpop.f32.mrf.mxu0 }
 0x3f8   : > { %v8564_v55 = vpop.f32.mrf.mxu1  ;;  %v3494_v18 = vadd.f32 %v3493_v41, %v3419_v27  ;;  %v4610_v41 = vand.u32 4294901760, %v10415_v28 }
 0x3f9   : > { %v4631_v55 = vand.u32 4294901760, %v10437_v50 }
 0x3ff   : > { %v3581_v57 = vpop.f32.mrf.mxu0 }
 0x400   : > { %v3829_v60 = vpop.f32.mrf.mxu1  ;;  %v3673_v63 = vadd.f32 %v3672_v51, %v3581_v57  ;;  %v4624_v51 = vand.u32 4294901760, %v10430_v44 }
 0x401   : > { %v8553_v45 = vpop.f32.mrf.mxu0 }
 0x402   : > { %v8586_v48 = vpop.f32.mrf.mxu1  ;;  %v4625_v56 = vsub.f32 %v10430_v44, %v4624_v51 }
 0x404   : > { %v4626_v48 = vand.u32 4294901760, %v4625_v56 }
 0x409   : > { %v3752_v58 = vpop.f32.mrf.mxu0 }
 0x40a   : > { %v3987_v59 = vpop.f32.mrf.mxu1  ;;  %v3753_v8 = vadd.f32 %v3752_v58, %v3673_v63  ;;  %v10529_v63 = vand.u32 4294901760, %v4991_v53 }
 0x40b   : > { %v8575_v3 = vpop.f32.mrf.mxu0 }
 0x40c   : > { %v8608_v7 = vpop.f32.mrf.mxu1  ;;  %v3830_v30 = vadd.f32 %v3829_v60, %v3753_v8  ;;  %v10544_v12 = vsub.f32 %v4991_v53, %v10529_v63 }
 0x412   : > { %v3912_v15 = vpop.f32.mrf.mxu0 }
 0x413   : > { %v3913_v16 = vadd.f32 %v3912_v15, %v3830_v30 }
 0x414   : > { %v8597_v17 = vpop.f32.mrf.mxu0 }
 0x415   : > { %v3988_v39 = vadd.f32 %v3987_v59, %v3913_v16  ;;  %v5125_v17 = vand.u32 4294901760, %v10544_v12 }
 0x417   : > { %v3991_v20 = vadd.f32 %v3988_v39, %v3494_v18 }
 0x419   : > { %v3999_v21 = vadd.f32 %v7679_v19, %v3991_v20 }
 0x41b   : > { %v4000_v29 = vmax.f32 %v3999_v21, 0.0  ;;  %v5126_v21 = vsub.f32 %v10544_v12, %v5125_v17 }
 0x41d   : > { %4001 = vst.msk [vmem:[#allocation2 + $0x8] sm:$0xff] %vm1016_vm4, %v4000_v29 }
 0x424   : > { %v4007_v32 = vld [vmem:[#allocation2 + $0x8] sm:$0xff] }
 0x425   : > { %v4014_v33 = vsel %vm1016_vm4, %v4007_v32, 0  ;;  %v4002_v52 = vld [vmem:[#allocation2 + $0x7] sm:$0xff] }
 0x426   : > { %v10400_v38 = vand.u32 4294901760, %v4014_v33  ;;  %v4502_v57 = vsel %vm1016_vm4, %v4002_v52, 0  ;;  %v4989_v15 = vld [vmem:[#allocation2 + $0x9] sm:$0xff] }
 0x427   : > { %v10474_v45 = vand.u32 4294901760, %v4502_v57  ;;  %v4996_v19 = vsel %vm1016_vm4, %v4989_v15, 0 }
 0x428   : > { %v4086_v43 = vsub.f32 %v4014_v33, %v10400_v38  ;;  %8629 = vmatmul.mubr.f32.vlgmr.msra.gmra.mxu1 %v10400_v38  ;;  %v10582_v29 = vand.u32 4294901760, %v4996_v19  ;;  %v5127_v33 = vand.u32 4294901760, %v5126_v21 }
 0x429   : > { %8643 = vmatpush3.msra.mxu1 %v10347_v62  ;;  %8650 = vmatprep.mubr.msk.f32.mxu1 %vm9384_vm0, %v9383_v1 }
 0x42a   : > { %8644 = vmatprep.subr.mxu1 %v9383_v1  ;;  %v4087_v23 = vand.u32 4294901760, %v4086_v43  ;;  %v5068_v37 = vsub.f32 %v4996_v19, %v10582_v29 }
 0x42b   : > { %8645 = vmatpush3.msra.mxu1 %v10352_v2 }
 0x42c   : > { %8646 = vmatprep.subr.mxu1 %v9383_v1  ;;  %v4088_v26 = vsub.f32 %v4086_v43, %v4087_v23 }
 0x42d   : > { %8647 = vmatpush3.msra.mxu1 %v10360_v6 }
 0x42e   : > { %8648 = vmatprep.subr.mxu1 %v9383_v1  ;;  %v4089_v35 = vand.u32 4294901760, %v4088_v26  ;;  %v5502_v26 = vld [vmem:[#allocation10 + $0x28] sm:$0xff] }
 0x42f   : > { %8649 = vmatpush3.msra.mxu1 %v10371_v11 }
 0x430   : > { %8651 = vmatmul.mubr.f32.vlgmr.msra.gmra.mxu1 %v4087_v23  ;;  %8664 = vmatprep.subr.mxu1 %v9383_v1  ;;  %v5503_v23 = vld [vmem:[#allocation10 + $0x30] sm:$0xff] }
 0x431   : > { %8618 = vmatmul.mubr.f32.vlgmr.msra.gmra.mxu0 %v4089_v35  ;;  %8665 = vmatpush3.msra.mxu1 %v10347_v62  ;;  %v4611_v62 = vsub.f32 %v10415_v28, %v4610_v41  ;;  %v10670_v25 = vand.u32 4294901760, %v5503_v23  ;;  %v10678_v35 = vand.u32 4294901760, %v5502_v26 }
 0x432   : > { %8632 = vmatpush3.msra.mxu0 %v10350_v0  ;;  %8666 = vmatprep.subr.mxu1 %v9383_v1  ;;  %v10485_v0 = vsub.f32 %v4502_v57, %v10474_v45 }
 0x433   : > { %8633 = vmatprep.subr.mxu0 %v9383_v1  ;;  %8667 = vmatpush3.msra.mxu1 %v10352_v2  ;;  %v4618_v2 = vsub.f32 %v10422_v36, %v4617_v46 }
 0x434   : > { %8634 = vmatpush3.msra.mxu0 %v10358_v5  ;;  %8668 = vmatprep.subr.mxu1 %v9383_v1  ;;  %v4994_v5 = vld [vmem:[#allocation8 + $0x58] sm:$0xff] }
 0x435   : > { %8635 = vmatprep.subr.mxu0 %v9383_v1  ;;  %8669 = vmatpush3.msra.mxu1 %v10360_v6  ;;  %v4612_v6 = vand.u32 4294901760, %v4611_v62  ;;  %v4619_v60 = vand.u32 4294901760, %v4618_v2 }
 0x436   : > { %8636 = vmatpush3.msra.mxu0 %v10369_v10  ;;  %8670 = vmatprep.subr.mxu1 %v9383_v1  ;;  %v10503_v10 = vand.u32 4294901760, %v4994_v5 }
 0x437   : > { %8637 = vmatprep.subr.mxu0 %v9383_v1  ;;  %8639 = vmatprep.mubr.msk.f32.mxu0 %vm9384_vm0, %v9383_v1 }
 0x438   : > { %8638 = vmatpush3.msra.mxu0 %v10380_v14  ;;  %8671 = vmatpush3.msra.mxu1 %v10371_v11  ;;  %v4632_v11 = vsub.f32 %v10437_v50, %v4631_v55  ;;  %v4992_v14 = vld [vmem:[#allocation8 + $0x48] sm:$0xff]  ;;  %v10517_v54 = vsub.f32 %v4994_v5, %v10503_v10 }
 0x439   : > { %8672 = vmatprep.mubr.msk.f32.mxu1 %vm9384_vm0, %v9383_v1  ;;  %8640 = vmatmul.mubr.f32.vlgmr.msra.gmra.mxu0 %v4086_v43  ;;  %v10519_v58 = vand.u32 4294901760, %v4992_v14 }
 0x43a   : > { %8653 = vmatprep.subr.mxu0 %v9383_v1  ;;  %8673 = vmatmul.mubr.f32.vlgmr.msra.gmra.mxu1 %v10400_v38  ;;  %v4633_v49 = vand.u32 4294901760, %v4632_v11  ;;  %v5104_v3 = vand.u32 4294901760, %v10517_v54 }
 0x43b   : > { %8686 = vmatprep.subr.mxu1 %v9383_v1  ;;  %8654 = vmatpush3.msra.mxu0 %v4122_v4  ;;  %v4575_v4 = vand.u32 4294901760, %v10485_v0  ;;  %v10536_v7 = vsub.f32 %v4992_v14, %v10519_v58 }
 0x43c   : > { %8687 = vmatpush3.msra.mxu1 %v4612_v6  ;;  %8655 = vmatprep.subr.mxu0 %v9383_v1  ;;  %v5105_v27 = vsub.f32 %v10517_v54, %v5104_v3 }
 0x43d   : > { %8688 = vmatprep.subr.mxu1 %v9383_v1  ;;  %8656 = vmatpush3.msra.mxu0 %v4129_v9  ;;  %v4993_v9 = vld [vmem:[#allocation8 + $0x50] sm:$0xff]  ;;  %v5118_v30 = vand.u32 4294901760, %v10536_v7 }
 0x43e   : > { %8689 = vmatpush3.msra.mxu1 %v4619_v60  ;;  %8657 = vmatprep.subr.mxu0 %v9383_v1  ;;  %v5106_v18 = vand.u32 4294901760, %v5105_v27 }
 0x43f   : > { %8690 = vmatprep.subr.mxu1 %v9383_v1  ;;  %8658 = vmatpush3.msra.mxu0 %v4136_v13  ;;  %v4576_v13 = vsub.f32 %v10485_v0, %v4575_v4  ;;  %v5119_v39 = vsub.f32 %v10536_v7, %v5118_v30 }
 0x440   : > { %8691 = vmatpush3.msra.mxu1 %v4626_v48  ;;  %8659 = vmatprep.subr.mxu0 %v9383_v1 }
 0x441   : > { %8692 = vmatprep.subr.mxu1 %v9383_v1  ;;  %8660 = vmatpush3.msra.mxu0 %v4143_v34  ;;  %v10510_v34 = vand.u32 4294901760, %v4993_v9  ;;  %v4577_v59 = vand.u32 4294901760, %v4576_v13  ;;  %v5120_v32 = vand.u32 4294901760, %v5119_v39 }
 0x442   : > { %8661 = vmatprep.mubr.msk.f32.mxu0 %vm9384_vm0, %v9383_v1  ;;  %8693 = vmatpush3.msra.mxu1 %v4633_v49 }
 0x443   : > { %8694 = vmatprep.mubr.msk.f32.mxu1 %vm9384_vm0, %v9383_v1  ;;  %8662 = vmatmul.mubr.f32.vlgmr.msra.gmra.mxu0 %v10400_v38  ;;  %v10527_v61 = vsub.f32 %v4993_v9, %v10510_v34  ;;  %v5069_v38 = vand.u32 4294901760, %v5068_v37 }
 0x444   : > { %8675 = vmatprep.subr.mxu0 %v9383_v1  ;;  %8695 = vmatmul.mubr.f32.vlgmr.msra.gmra.mxu1 %v10474_v45 }
 0x445   : > { %8708 = vmatprep.subr.mxu1 %v9383_v1  ;;  %8676 = vmatpush3.msra.mxu0 %v10404_v47  ;;  %v5111_v8 = vand.u32 4294901760, %v10527_v61  ;;  %v5070_v42 = vsub.f32 %v5068_v37, %v5069_v38 }
 0x446   : > { %8709 = vmatpush3.msra.mxu1 %v10404_v47  ;;  %8677 = vmatprep.subr.mxu0 %v9383_v1 }
 0x447   : > { %8710 = vmatprep.subr.mxu1 %v9383_v1  ;;  %8678 = vmatpush3.msra.mxu0 %v10410_v24  ;;  %v5112_v16 = vsub.f32 %v10527_v61, %v5111_v8  ;;  %v5071_v43 = vand.u32 4294901760, %v5070_v42 }
 0x448   : > { %8711 = vmatpush3.msra.mxu1 %v10410_v24  ;;  %8679 = vmatprep.subr.mxu0 %v9383_v1 }
 0x449   : > { %8712 = vmatprep.subr.mxu1 %v9383_v1  ;;  %8680 = vmatpush3.msra.mxu0 %v10417_v31  ;;  %v5113_v20 = vand.u32 4294901760, %v5112_v16 }
 0x44a   : > { %8713 = vmatpush3.msra.mxu1 %v10417_v31  ;;  %8681 = vmatprep.subr.mxu0 %v9383_v1 }
 0x44b   : > { %8714 = vmatprep.subr.mxu1 %v9383_v1  ;;  %8682 = vmatpush3.msra.mxu0 %v10424_v40 }
 0x44c   : > { %8683 = vmatprep.mubr.msk.f32.mxu0 %vm9384_vm0, %v9383_v1  ;;  %8715 = vmatpush3.msra.mxu1 %v10424_v40 }
 0x44d   : > { %8716 = vmatprep.mubr.msk.f32.mxu1 %vm9384_vm0, %v9383_v1  ;;  %8684 = vmatmul.mubr.f32.vlgmr.msra.gmra.mxu0 %v4577_v59 }
 0x44e   : > { %8697 = vmatprep.subr.mxu0 %v9383_v1  ;;  %8717 = vmatmul.mubr.f32.vlgmr.msra.gmra.mxu1 %v4575_v4 }
 0x44f   : > { %8730 = vmatprep.subr.mxu1 %v9383_v1  ;;  %8698 = vmatpush3.msra.mxu0 %v10415_v28 }
 0x450   : > { %8731 = vmatpush3.msra.mxu1 %v10404_v47  ;;  %8699 = vmatprep.subr.mxu0 %v9383_v1  ;;  %v5504_v47 = vld [vmem:[#allocation10 + $0x38] sm:$0xff] }
 0x451   : > { %8732 = vmatprep.subr.mxu1 %v9383_v1  ;;  %8700 = vmatpush3.msra.mxu0 %v10422_v36  ;;  %v10665_v22 = vand.u32 4294901760, %v5504_v47  ;;  %v5501_v36 = vld [vmem:[#allocation10 + $0x20] sm:$0xff] }
 0x452   : > { %8733 = vmatpush3.msra.mxu1 %v10410_v24  ;;  %8701 = vmatprep.subr.mxu0 %v9383_v1 }
 0x453   : > { %8734 = vmatprep.subr.mxu1 %v9383_v1  ;;  %8702 = vmatpush3.msra.mxu0 %v10430_v44  ;;  %v10668_v24 = vsub.f32 %v5504_v47, %v10665_v22  ;;  %v10687_v44 = vsub.f32 %v5502_v26, %v10678_v35 }
 0x454   : > { %8735 = vmatpush3.msra.mxu1 %v10417_v31  ;;  %8703 = vmatprep.subr.mxu0 %v9383_v1  ;;  %v10676_v31 = vsub.f32 %v5503_v23, %v10670_v25 }
 0x455   : > { %8736 = vmatprep.subr.mxu1 %v9383_v1  ;;  %8704 = vmatpush3.msra.mxu0 %v10437_v50  ;;  %v5614_v28 = vand.u32 4294901760, %v10668_v24 }
 0x456   : > { %8705 = vmatprep.mubr.msk.f32.mxu0 %vm9384_vm0, %v9383_v1  ;;  %8737 = vmatpush3.msra.mxu1 %v10424_v40 }
 0x457   : > { %8738 = vmatprep.mubr.msk.f32.mxu1 %vm9384_vm0, %v9383_v1  ;;  %8706 = vmatmul.mubr.f32.vlgmr.msra.gmra.mxu0 %v10485_v0  ;;  %v5615_v40 = vsub.f32 %v10668_v24, %v5614_v28 }
 0x458   : > { %8719 = vmatprep.subr.mxu0 %v9383_v1  ;;  %8739 = vmatmul.mubr.f32.vlgmr.msra.gmra.mxu1 %v10474_v45 }
 0x459   : > { %8752 = vmatprep.subr.mxu1 %v9383_v1  ;;  %8720 = vmatpush3.msra.mxu0 %v4610_v41  ;;  %v5621_v41 = vand.u32 4294901760, %v10676_v31  ;;  %v5616_v50 = vand.u32 4294901760, %v5615_v40 }
 0x45a   : > { %8753 = vmatpush3.msra.mxu1 %v5106_v18  ;;  %8721 = vmatprep.subr.mxu0 %v9383_v1 }
 0x45b   : > { %8754 = vmatprep.subr.mxu1 %v9383_v1  ;;  %8722 = vmatpush3.msra.mxu0 %v4617_v46  ;;  %v10689_v46 = vand.u32 4294901760, %v5501_v36  ;;  %v5622_v62 = vsub.f32 %v10676_v31, %v5621_v41 }
 0x45c   : > { %8755 = vmatpush3.msra.mxu1 %v5113_v20  ;;  %8723 = vmatprep.subr.mxu0 %v9383_v1 }
 0x45d   : > { %8756 = vmatprep.subr.mxu1 %v9383_v1  ;;  %8724 = vmatpush3.msra.mxu0 %v4624_v51  ;;  %v5628_v51 = vand.u32 4294901760, %v10687_v44  ;;  %v10698_v52 = vsub.f32 %v5501_v36, %v10689_v46  ;;  %v5623_v2 = vand.u32 4294901760, %v5622_v62 }
 0x45e   : > { %8757 = vmatpush3.msra.mxu1 %v5120_v32  ;;  %8725 = vmatprep.subr.mxu0 %v9383_v1 }
 0x45f   : > { %8758 = vmatprep.subr.mxu1 %v9383_v1  ;;  %8726 = vmatpush3.msra.mxu0 %v4631_v55  ;;  %v5629_v55 = vsub.f32 %v10687_v44, %v5628_v51  ;;  %v5635_v6 = vand.u32 4294901760, %v10698_v52 }
 0x460   : > { %8727 = vmatprep.mubr.msk.f32.mxu0 %vm9384_vm0, %v9383_v1  ;;  %8759 = vmatpush3.msra.mxu1 %v5127_v33 }
 0x461   : > { %8760 = vmatprep.mubr.msk.f32.mxu1 %vm9384_vm0, %v9383_v1  ;;  %8728 = vmatmul.mubr.f32.vlgmr.msra.gmra.mxu0 %v10474_v45  ;;  %v5630_v56 = vand.u32 4294901760, %v5629_v55  ;;  %v5636_v57 = vsub.f32 %v10698_v52, %v5635_v6 }
 0x462   : > { %8741 = vmatprep.subr.mxu0 %v9383_v1  ;;  %8761 = vmatmul.mubr.f32.vlgmr.msra.gmra.mxu1 %v10582_v29 }
 0x463   : > { %8774 = vmatprep.subr.mxu1 %v9383_v1  ;;  %8742 = vmatpush3.msra.mxu0 %v10503_v10  ;;  %v5637_v60 = vand.u32 4294901760, %v5636_v57 }
 0x464   : > { %8775 = vmatpush3.msra.mxu1 %v10503_v10  ;;  %8743 = vmatprep.subr.mxu0 %v9383_v1 }
 0x465   : > { %8776 = vmatprep.subr.mxu1 %v9383_v1  ;;  %8744 = vmatpush3.msra.mxu0 %v10510_v34 }
 0x466   : > { %8777 = vmatpush3.msra.mxu1 %v10510_v34  ;;  %8745 = vmatprep.subr.mxu0 %v9383_v1 }
 0x467   : > { %8778 = vmatprep.subr.mxu1 %v9383_v1  ;;  %8746 = vmatpush3.msra.mxu0 %v10519_v58 }
 0x468   : > { %8779 = vmatpush3.msra.mxu1 %v10519_v58  ;;  %8747 = vmatprep.subr.mxu0 %v9383_v1 }
 0x469   : > { %8780 = vmatprep.subr.mxu1 %v9383_v1  ;;  %8748 = vmatpush3.msra.mxu0 %v10529_v63 }
 0x46a   : > { %8749 = vmatprep.mubr.msk.f32.mxu0 %vm9384_vm0, %v9383_v1  ;;  %8781 = vmatpush3.msra.mxu1 %v10529_v63 }
 0x46b   : > { %8782 = vmatprep.mubr.msk.f32.mxu1 %vm9384_vm0, %v9383_v1  ;;  %8750 = vmatmul.mubr.f32.vlgmr.msra.gmra.mxu0 %v5071_v43 }
 0x46c   : > { %8763 = vmatprep.subr.mxu0 %v9383_v1  ;;  %8783 = vmatmul.mubr.f32.vlgmr.msra.gmra.mxu1 %v5069_v38 }
 0x46d   : > { %8796 = vmatprep.subr.mxu1 %v9383_v1  ;;  %8764 = vmatpush3.msra.mxu0 %v10517_v54 }
 0x46e   : > { %8797 = vmatpush3.msra.mxu1 %v10503_v10  ;;  %8765 = vmatprep.subr.mxu0 %v9383_v1 }
 0x46f   : > { %8798 = vmatprep.subr.mxu1 %v9383_v1  ;;  %8766 = vmatpush3.msra.mxu0 %v10527_v61 }
 0x470   : > { %8799 = vmatpush3.msra.mxu1 %v10510_v34  ;;  %8767 = vmatprep.subr.mxu0 %v9383_v1 }
 0x471   : > { %8800 = vmatprep.subr.mxu1 %v9383_v1  ;;  %8768 = vmatpush3.msra.mxu0 %v10536_v7 }
 0x472   : > { %8801 = vmatpush3.msra.mxu1 %v10519_v58  ;;  %8769 = vmatprep.subr.mxu0 %v9383_v1 }
 0x473   : > { %8802 = vmatprep.subr.mxu1 %v9383_v1  ;;  %8770 = vmatpush3.msra.mxu0 %v10544_v12 }
 0x474   : > { %8771 = vmatprep.mubr.msk.f32.mxu0 %vm9384_vm0, %v9383_v1  ;;  %8803 = vmatpush3.msra.mxu1 %v10529_v63 }
 0x475   : > { %8804 = vmatprep.mubr.msk.f32.mxu1 %vm9384_vm0, %v9383_v1  ;;  %8772 = vmatmul.mubr.f32.vlgmr.msra.gmra.mxu0 %v5068_v37 }
 0x476   : > { %8785 = vmatprep.subr.mxu0 %v9383_v1  ;;  %8805 = vmatmul.mubr.f32.vlgmr.msra.gmra.mxu1 %v10582_v29 }
 0x477   : > { %8786 = vmatpush3.msra.mxu0 %v5104_v3  ;;  %8793 = vmatprep.mubr.msk.f32.mxu0 %vm9384_vm0, %v9383_v1 }
 0x478   : > { %8787 = vmatprep.subr.mxu0 %v9383_v1  ;;  %8818 = vmatprep.subr.mxu1 %v9383_v1 }
 0x479   : > { %8788 = vmatpush3.msra.mxu0 %v5111_v8  ;;  %8826 = vmatprep.mubr.msk.f32.mxu1 %vm9384_vm0, %v9383_v1 }
 0x47a   : > { %8789 = vmatprep.subr.mxu0 %v9383_v1  ;;  %8819 = vmatpush3.msra.mxu1 %v5616_v50 }
 0x47b   : > { %8790 = vmatpush3.msra.mxu0 %v5118_v30  ;;  %8820 = vmatprep.subr.mxu1 %v9383_v1 }
 0x47c   : > { %8791 = vmatprep.subr.mxu0 %v9383_v1  ;;  %8821 = vmatpush3.msra.mxu1 %v5623_v2 }
 0x47d   : > { %8792 = vmatpush3.msra.mxu0 %v5125_v17  ;;  %8822 = vmatprep.subr.mxu1 %v9383_v1 }
 0x47e   : > { %8794 = vmatmul.mubr.f32.vlgmr.msra.gmra.mxu0 %v10582_v29  ;;  %8807 = vmatprep.subr.mxu0 %v9383_v1 }
 0x47f   : > { %8815 = vmatprep.mubr.msk.f32.mxu0 %vm9384_vm0, %v9383_v1  ;;  %8808 = vmatpush3.msra.mxu0 %v10665_v22 }
 0x480   : > { %8809 = vmatprep.subr.mxu0 %v9383_v1  ;;  %8823 = vmatpush3.msra.mxu1 %v5630_v56 }
 0x481   : > { %8810 = vmatpush3.msra.mxu0 %v10670_v25  ;;  %8824 = vmatprep.subr.mxu1 %v9383_v1 }
 0x482   : > { %8811 = vmatprep.subr.mxu0 %v9383_v1  ;;  %8825 = vmatpush3.msra.mxu1 %v5637_v60 }
 0x483   : > { %8812 = vmatpush3.msra.mxu0 %v10678_v35  ;;  %8840 = vmatprep.subr.mxu1 %v9383_v1 }
 0x484   : > { %8813 = vmatprep.subr.mxu0 %v9383_v1 }
 0x485   : > { %8814 = vmatpush3.msra.mxu0 %v10689_v46 }
 0x486   : > { %8829 = vmatprep.subr.mxu0 %v9383_v1 }
 0x4e8   : > { %v4182_v11 = vpop.f32.mrf.mxu1 }
 0x4ea   : > { %v8630_v45 = vpop.f32.mrf.mxu1 }
 0x4eb   : > { %v7680_v45 = vld [vmem:[%s11184_s7] ss:$0 sm:$0xff] }
 0x4f0   : > { %v4339_v48 = vpop.f32.mrf.mxu1 }
 0x4f1   : > { %v4091_v49 = vpop.f32.mrf.mxu0 }
 0x4f2   : > { %v8652_v0 = vpop.f32.mrf.mxu1  ;;  %v4183_v5 = vadd.f32 %v4182_v11, %v4091_v49 }
 0x4f3   : > { %v8619_v4 = vpop.f32.mrf.mxu0 }
 0x4f9   : > { %v4262_v9 = vpop.f32.mrf.mxu0 }
 0x4fa   : > { %v4263_v10 = vadd.f32 %v4262_v9, %v4183_v5  ;;  %v4497_v13 = vpop.f32.mrf.mxu1  ;;  %v5498_v9 = vld [vmem:[#allocation10 + $0x18] sm:$0xff] }
 0x4fb   : > { %v8641_v14 = vpop.f32.mrf.mxu0 }
 0x4fc   : > { %v8674_v34 = vpop.f32.mrf.mxu1  ;;  %v4340_v53 = vadd.f32 %v4339_v48, %v4263_v10 }
 0x4fd   : > { %v10722_v34 = vand.u32 4294901760, %v5498_v9 }
 0x503   : > { %v4422_v54 = vpop.f32.mrf.mxu0 }
 0x504   : > { %v4670_v58 = vpop.f32.mrf.mxu1  ;;  %v4423_v19 = vadd.f32 %v4422_v54, %v4340_v53  ;;  %v5496_v53 = vld [vmem:[#allocation10 + $0x8] sm:$0xff] }
 0x505   : > { %v8663_v59 = vpop.f32.mrf.mxu0 }
 0x506   : > { %v8696_v61 = vpop.f32.mrf.mxu1  ;;  %v4498_v33 = vadd.f32 %v4497_v13, %v4423_v19  ;;  %v5497_v13 = vld [vmem:[#allocation10 + $0x10] sm:$0xff]  ;;  %v5495_v59 = vld [vmem:[#allocation10] sm:$0xff] }
 0x50d   : > { %v4579_v63 = vpop.f32.mrf.mxu0 }
 0x50e   : > { %v4827_v3 = vpop.f32.mrf.mxu1  ;;  %v4580_v37 = vadd.f32 %v4579_v63, %v4498_v33  ;;  %v10733_v63 = vsub.f32 %v5498_v9, %v10722_v34 }
 0x50f   : > { %v8685_v7 = vpop.f32.mrf.mxu0 }
 0x510   : > { %v8718_v8 = vpop.f32.mrf.mxu1  ;;  %v4671_v38 = vadd.f32 %v4670_v58, %v4580_v37  ;;  %v10728_v58 = vand.u32 4294901760, %v5497_v13  ;;  %v6483_v37 = vld [vmem:[#allocation10 + $0x40] sm:$0xff] }
 0x512   : > { %v10740_v8 = vsub.f32 %v5497_v13, %v10728_v58 }
 0x517   : > { %v4750_v12 = vpop.f32.mrf.mxu0 }
 0x518   : > { %v4985_v27 = vpop.f32.mrf.mxu1  ;;  %v4751_v47 = vadd.f32 %v4750_v12, %v4671_v38  ;;  %v10742_v12 = vand.u32 4294901760, %v5495_v59 }
 0x519   : > { %v8707_v30 = vpop.f32.mrf.mxu0 }
 0x51a   : > { %v8740_v15 = vpop.f32.mrf.mxu1  ;;  %v4828_v50 = vadd.f32 %v4827_v3, %v4751_v47  ;;  %v10735_v3 = vand.u32 4294901760, %v5496_v53 }
 0x51b   : > { %v6109_v15 = vand.u32 4294901760, %v10740_v8 }
 0x51c   : > { %v10748_v30 = vsub.f32 %v5496_v53, %v10735_v3 }
 0x521   : > { %v4910_v16 = vpop.f32.mrf.mxu0 }
 0x522   : > { %v5164_v17 = vpop.f32.mrf.mxu1  ;;  %v4911_v62 = vadd.f32 %v4910_v16, %v4828_v50  ;;  %v10755_v16 = vsub.f32 %v5495_v59, %v10742_v12 }
 0x523   : > { %v8729_v18 = vpop.f32.mrf.mxu0 }
 0x524   : > { %v8762_v39 = vpop.f32.mrf.mxu1  ;;  %v4986_v60 = vadd.f32 %v4985_v27, %v4911_v62  ;;  %v6102_v27 = vand.u32 4294901760, %v10733_v63 }
 0x525   : > { %v6123_v39 = vand.u32 4294901760, %v10755_v16 }
 0x52b   : > { %v5073_v20 = vpop.f32.mrf.mxu0 }
 0x52c   : > { %v5321_v21 = vpop.f32.mrf.mxu1  ;;  %v5165_v23 = vadd.f32 %v5164_v17, %v5073_v20  ;;  %v6116_v17 = vand.u32 4294901760, %v10748_v30 }
 0x52d   : > { %v8751_v29 = vpop.f32.mrf.mxu0 }
 0x52e   : > { %v8784_v32 = vpop.f32.mrf.mxu1  ;;  %v6117_v19 = vsub.f32 %v10748_v30, %v6116_v17 }
 0x530   : > { %v6118_v32 = vand.u32 4294901760, %v6117_v19 }
 0x535   : > { %v5244_v42 = vpop.f32.mrf.mxu0 }
 0x536   : > { %v5479_v43 = vpop.f32.mrf.mxu1  ;;  %v5245_v40 = vadd.f32 %v5244_v42, %v5165_v23  ;;  %v10847_v23 = vand.u32 4294901760, %v6483_v37 }
 0x537   : > { %v8773_v26 = vpop.f32.mrf.mxu0 }
 0x538   : > { %v8806_v36 = vpop.f32.mrf.mxu1  ;;  %v5322_v2 = vadd.f32 %v5321_v21, %v5245_v40  ;;  %v10862_v50 = vsub.f32 %v6483_v37, %v10847_v23 }
 0x53e   : > { %v5404_v55 = vpop.f32.mrf.mxu0 }
 0x53f   : > { %v5405_v56 = vadd.f32 %v5404_v55, %v5322_v2 }
 0x540   : > { %v8795_v57 = vpop.f32.mrf.mxu0 }
 0x541   : > { %v5480_v11 = vadd.f32 %v5479_v43, %v5405_v56  ;;  %v6617_v57 = vand.u32 4294901760, %v10862_v50 }
 0x543   : > { %v5483_v48 = vadd.f32 %v5480_v11, %v4986_v60 }
 0x545   : > { %v5491_v49 = vadd.f32 %v7680_v45, %v5483_v48 }
 0x547   : > { %v5492_v0 = vmax.f32 %v5491_v49, 0.0  ;;  %v6618_v49 = vsub.f32 %v10862_v50, %v6617_v57 }
 0x549   : > { %5493 = vst.msk [vmem:[#allocation2 + $0x8] sm:$0xff] %vm1016_vm4, %v5492_v0 }
 0x550   : > { %v5499_v4 = vld [vmem:[#allocation2 + $0x8] sm:$0xff] }
 0x551   : > { %v5506_v5 = vsel %vm1016_vm4, %v5499_v4, 0  ;;  %v5494_v18 = vld [vmem:[#allocation2 + $0x7] sm:$0xff] }
 0x552   : > { %v10718_v10 = vand.u32 4294901760, %v5506_v5  ;;  %v5994_v20 = vsel %vm1016_vm4, %v5494_v18, 0  ;;  %v6481_v55 = vld [vmem:[#allocation2 + $0x9] sm:$0xff] }
 0x553   : > { %v10792_v29 = vand.u32 4294901760, %v5994_v20  ;;  %v6488_v45 = vsel %vm1016_vm4, %v6481_v55, 0 }
 0x554   : > { %v5578_v14 = vsub.f32 %v5506_v5, %v10718_v10  ;;  %8827 = vmatmul.mubr.f32.vlgmr.msra.gmra.mxu1 %v10718_v10  ;;  %v10900_v0 = vand.u32 4294901760, %v6488_v45  ;;  %v6619_v5 = vand.u32 4294901760, %v6618_v49 }
 0x555   : > { %8841 = vmatpush3.msra.mxu1 %v10665_v22  ;;  %8848 = vmatprep.mubr.msk.f32.mxu1 %vm9384_vm0, %v9383_v1 }
 0x556   : > { %8842 = vmatprep.subr.mxu1 %v9383_v1  ;;  %v5579_v54 = vand.u32 4294901760, %v5578_v14  ;;  %v6560_v9 = vsub.f32 %v6488_v45, %v10900_v0 }
 0x557   : > { %8843 = vmatpush3.msra.mxu1 %v10670_v25 }
 0x558   : > { %8844 = vmatprep.subr.mxu1 %v9383_v1  ;;  %v5580_v61 = vsub.f32 %v5578_v14, %v5579_v54 }
 0x559   : > { %8845 = vmatpush3.msra.mxu1 %v10678_v35 }
 0x55a   : > { %8846 = vmatprep.subr.mxu1 %v9383_v1  ;;  %v5581_v7 = vand.u32 4294901760, %v5580_v61  ;;  %v6990_v61 = vld [vmem:[#allocation11 + $0x28] sm:$0xff] }
 0x55b   : > { %8847 = vmatpush3.msra.mxu1 %v10689_v46 }
 0x55c   : > { %8849 = vmatmul.mubr.f32.vlgmr.msra.gmra.mxu1 %v5579_v54  ;;  %8862 = vmatprep.subr.mxu1 %v9383_v1  ;;  %v6991_v54 = vld [vmem:[#allocation11 + $0x30] sm:$0xff] }
 0x55d   : > { %8816 = vmatmul.mubr.f32.vlgmr.msra.gmra.mxu0 %v5581_v7  ;;  %8863 = vmatpush3.msra.mxu1 %v10665_v22  ;;  %v6103_v22 = vsub.f32 %v10733_v63, %v6102_v27  ;;  %v10988_v59 = vand.u32 4294901760, %v6991_v54  ;;  %v10996_v7 = vand.u32 4294901760, %v6990_v61 }
 0x55e   : > { %8830 = vmatpush3.msra.mxu0 %v10668_v24  ;;  %8864 = vmatprep.subr.mxu1 %v9383_v1  ;;  %v10803_v24 = vsub.f32 %v5994_v20, %v10792_v29 }
 0x55f   : > { %8831 = vmatprep.subr.mxu0 %v9383_v1  ;;  %8865 = vmatpush3.msra.mxu1 %v10670_v25  ;;  %v6110_v25 = vsub.f32 %v10740_v8, %v6109_v15 }
 0x560   : > { %8832 = vmatpush3.msra.mxu0 %v10676_v31  ;;  %8866 = vmatprep.subr.mxu1 %v9383_v1  ;;  %v6486_v31 = vld [vmem:[#allocation10 + $0x58] sm:$0xff] }
 0x561   : > { %8833 = vmatprep.subr.mxu0 %v9383_v1  ;;  %8867 = vmatpush3.msra.mxu1 %v10678_v35  ;;  %v6104_v35 = vand.u32 4294901760, %v6103_v22  ;;  %v6111_v21 = vand.u32 4294901760, %v6110_v25 }
 0x562   : > { %8834 = vmatpush3.msra.mxu0 %v10687_v44  ;;  %8868 = vmatprep.subr.mxu1 %v9383_v1  ;;  %v10821_v44 = vand.u32 4294901760, %v6486_v31 }
 0x563   : > { %8835 = vmatprep.subr.mxu0 %v9383_v1  ;;  %8837 = vmatprep.mubr.msk.f32.mxu0 %vm9384_vm0, %v9383_v1 }
 0x564   : > { %8836 = vmatpush3.msra.mxu0 %v10698_v52  ;;  %8869 = vmatpush3.msra.mxu1 %v10689_v46  ;;  %v6124_v46 = vsub.f32 %v10755_v16, %v6123_v39  ;;  %v6484_v52 = vld [vmem:[#allocation10 + $0x48] sm:$0xff]  ;;  %v10835_v38 = vsub.f32 %v6486_v31, %v10821_v44 }
 0x565   : > { %8870 = vmatprep.mubr.msk.f32.mxu1 %vm9384_vm0, %v9383_v1  ;;  %8838 = vmatmul.mubr.f32.vlgmr.msra.gmra.mxu0 %v5578_v14  ;;  %v10837_v42 = vand.u32 4294901760, %v6484_v52 }
 0x566   : > { %8851 = vmatprep.subr.mxu0 %v9383_v1  ;;  %8871 = vmatmul.mubr.f32.vlgmr.msra.gmra.mxu1 %v10718_v10  ;;  %v6125_v33 = vand.u32 4294901760, %v6124_v46  ;;  %v6596_v26 = vand.u32 4294901760, %v10835_v38 }
 0x567   : > { %8884 = vmatprep.subr.mxu1 %v9383_v1  ;;  %8852 = vmatpush3.msra.mxu0 %v5614_v28  ;;  %v6067_v28 = vand.u32 4294901760, %v10803_v24  ;;  %v10854_v36 = vsub.f32 %v6484_v52, %v10837_v42 }
 0x568   : > { %8885 = vmatpush3.msra.mxu1 %v6104_v35  ;;  %8853 = vmatprep.subr.mxu0 %v9383_v1  ;;  %v6597_v62 = vsub.f32 %v10835_v38, %v6596_v26  ;;  %v6987_v35 = vld [vmem:[#allocation11 + $0x10] sm:$0xff] }
 0x569   : > { %8886 = vmatprep.subr.mxu1 %v9383_v1  ;;  %8854 = vmatpush3.msra.mxu0 %v5621_v41  ;;  %v6485_v41 = vld [vmem:[#allocation10 + $0x50] sm:$0xff]  ;;  %v6610_v2 = vand.u32 4294901760, %v10854_v36  ;;  %v11026_v46 = vand.u32 4294901760, %v6987_v35 }
 0x56a   : > { %8887 = vmatpush3.msra.mxu1 %v6111_v21  ;;  %8855 = vmatprep.subr.mxu0 %v9383_v1  ;;  %v6598_v60 = vand.u32 4294901760, %v6597_v62 }
 0x56b   : > { %8888 = vmatprep.subr.mxu1 %v9383_v1  ;;  %8856 = vmatpush3.msra.mxu0 %v5628_v51  ;;  %v6068_v51 = vsub.f32 %v10803_v24, %v6067_v28  ;;  %v6611_v11 = vsub.f32 %v10854_v36, %v6610_v2 }
 0x56c   : > { %8889 = vmatpush3.msra.mxu1 %v6118_v32  ;;  %8857 = vmatprep.subr.mxu0 %v9383_v1  ;;  %v6986_v32 = vld [vmem:[#allocation11 + $0x8] sm:$0xff] }
 0x56d   : > { %8890 = vmatprep.subr.mxu1 %v9383_v1  ;;  %8858 = vmatpush3.msra.mxu0 %v5635_v6  ;;  %v10828_v6 = vand.u32 4294901760, %v6485_v41  ;;  %v6069_v43 = vand.u32 4294901760, %v6068_v51  ;;  %v6612_v4 = vand.u32 4294901760, %v6611_v11  ;;  %v11039_v31 = vand.u32 4294901760, %v6986_v32 }
 0x56e   : > { %8859 = vmatprep.mubr.msk.f32.mxu0 %vm9384_vm0, %v9383_v1  ;;  %8891 = vmatpush3.msra.mxu1 %v6125_v33 }
 0x56f   : > { %8892 = vmatprep.mubr.msk.f32.mxu1 %vm9384_vm0, %v9383_v1  ;;  %8860 = vmatmul.mubr.f32.vlgmr.msra.gmra.mxu0 %v10718_v10  ;;  %v10845_v47 = vsub.f32 %v6485_v41, %v10828_v6  ;;  %v6561_v10 = vand.u32 4294901760, %v6560_v9 }
 0x570   : > { %8873 = vmatprep.subr.mxu0 %v9383_v1  ;;  %8893 = vmatmul.mubr.f32.vlgmr.msra.gmra.mxu1 %v10792_v29 }
 0x571   : > { %8906 = vmatprep.subr.mxu1 %v9383_v1  ;;  %8874 = vmatpush3.msra.mxu0 %v10722_v34  ;;  %v6603_v40 = vand.u32 4294901760, %v10845_v47  ;;  %v6562_v13 = vsub.f32 %v6560_v9, %v6561_v10 }
 0x572   : > { %8907 = vmatpush3.msra.mxu1 %v10722_v34  ;;  %8875 = vmatprep.subr.mxu0 %v9383_v1 }
 0x573   : > { %8908 = vmatprep.subr.mxu1 %v9383_v1  ;;  %8876 = vmatpush3.msra.mxu0 %v10728_v58  ;;  %v6604_v56 = vsub.f32 %v10845_v47, %v6603_v40  ;;  %v6563_v14 = vand.u32 4294901760, %v6562_v13 }
 0x574   : > { %8909 = vmatpush3.msra.mxu1 %v10728_v58  ;;  %8877 = vmatprep.subr.mxu0 %v9383_v1 }
 0x575   : > { %8910 = vmatprep.subr.mxu1 %v9383_v1  ;;  %8878 = vmatpush3.msra.mxu0 %v10735_v3  ;;  %v6605_v48 = vand.u32 4294901760, %v6604_v56 }
 0x576   : > { %8911 = vmatpush3.msra.mxu1 %v10735_v3  ;;  %8879 = vmatprep.subr.mxu0 %v9383_v1 }
 0x577   : > { %8912 = vmatprep.subr.mxu1 %v9383_v1  ;;  %8880 = vmatpush3.msra.mxu0 %v10742_v12 }
 0x578   : > { %8881 = vmatprep.mubr.msk.f32.mxu0 %vm9384_vm0, %v9383_v1  ;;  %8913 = vmatpush3.msra.mxu1 %v10742_v12 }
 0x579   : > { %8914 = vmatprep.mubr.msk.f32.mxu1 %vm9384_vm0, %v9383_v1  ;;  %8882 = vmatmul.mubr.f32.vlgmr.msra.gmra.mxu0 %v6069_v43 }
 0x57a   : > { %8895 = vmatprep.subr.mxu0 %v9383_v1  ;;  %8915 = vmatmul.mubr.f32.vlgmr.msra.gmra.mxu1 %v6067_v28  ;;  %v11037_v28 = vsub.f32 %v6987_v35, %v11026_v46 }
 0x57b   : > { %8928 = vmatprep.subr.mxu1 %v9383_v1  ;;  %8896 = vmatpush3.msra.mxu0 %v10733_v63 }
 0x57c   : > { %8929 = vmatpush3.msra.mxu1 %v10722_v34  ;;  %8897 = vmatprep.subr.mxu0 %v9383_v1  ;;  %v6992_v34 = vld [vmem:[#allocation11 + $0x38] sm:$0xff]  ;;  %v7141_v52 = vand.u32 4294901760, %v11037_v28 }
 0x57d   : > { %8930 = vmatprep.subr.mxu1 %v9383_v1  ;;  %8898 = vmatpush3.msra.mxu0 %v10740_v8  ;;  %v10983_v53 = vand.u32 4294901760, %v6992_v34  ;;  %v6989_v8 = vld [vmem:[#allocation11 + $0x20] sm:$0xff] }
 0x57e   : > { %8931 = vmatpush3.msra.mxu1 %v10728_v58  ;;  %8899 = vmatprep.subr.mxu0 %v9383_v1 }
 0x57f   : > { %8932 = vmatprep.subr.mxu1 %v9383_v1  ;;  %8900 = vmatpush3.msra.mxu0 %v10748_v30  ;;  %v10986_v58 = vsub.f32 %v6992_v34, %v10983_v53  ;;  %v11005_v30 = vsub.f32 %v6990_v61, %v10996_v7 }
 0x580   : > { %8933 = vmatpush3.msra.mxu1 %v10735_v3  ;;  %8901 = vmatprep.subr.mxu0 %v9383_v1  ;;  %v10994_v3 = vsub.f32 %v6991_v54, %v10988_v59 }
 0x581   : > { %8934 = vmatprep.subr.mxu1 %v9383_v1  ;;  %8902 = vmatpush3.msra.mxu0 %v10755_v16  ;;  %v7106_v63 = vand.u32 4294901760, %v10986_v58  ;;  %v6988_v16 = vld [vmem:[#allocation11 + $0x18] sm:$0xff]  ;;  %v7120_v18 = vand.u32 4294901760, %v11005_v30 }
 0x582   : > { %8903 = vmatprep.mubr.msk.f32.mxu0 %vm9384_vm0, %v9383_v1  ;;  %8935 = vmatpush3.msra.mxu1 %v10742_v12 }
 0x583   : > { %8936 = vmatprep.mubr.msk.f32.mxu1 %vm9384_vm0, %v9383_v1  ;;  %8904 = vmatmul.mubr.f32.vlgmr.msra.gmra.mxu0 %v10803_v24  ;;  %v7107_v12 = vsub.f32 %v10986_v58, %v7106_v63  ;;  %v7121_v20 = vsub.f32 %v11005_v30, %v7120_v18 }
 0x584   : > { %8917 = vmatprep.subr.mxu0 %v9383_v1  ;;  %8937 = vmatmul.mubr.f32.vlgmr.msra.gmra.mxu1 %v10792_v29 }
 0x585   : > { %8950 = vmatprep.subr.mxu1 %v9383_v1  ;;  %8918 = vmatpush3.msra.mxu0 %v6102_v27  ;;  %v7113_v27 = vand.u32 4294901760, %v10994_v3  ;;  %v7108_v22 = vand.u32 4294901760, %v7107_v12  ;;  %v7122_v33 = vand.u32 4294901760, %v7121_v20 }
 0x586   : > { %8951 = vmatpush3.msra.mxu1 %v6598_v60  ;;  %8919 = vmatprep.subr.mxu0 %v9383_v1 }
 0x587   : > { %8952 = vmatprep.subr.mxu1 %v9383_v1  ;;  %8920 = vmatpush3.msra.mxu0 %v6109_v15  ;;  %v11007_v15 = vand.u32 4294901760, %v6989_v8 }
 0x588   : > { %8953 = vmatpush3.msra.mxu1 %v6605_v48  ;;  %8921 = vmatprep.subr.mxu0 %v9383_v1 }
 0x589   : > { %8954 = vmatprep.subr.mxu1 %v9383_v1  ;;  %8922 = vmatpush3.msra.mxu0 %v6116_v17  ;;  %v7114_v17 = vsub.f32 %v10994_v3, %v7113_v27  ;;  %v11016_v25 = vsub.f32 %v6989_v8, %v11007_v15 }
 0x58a   : > { %8955 = vmatpush3.msra.mxu1 %v6612_v4  ;;  %8923 = vmatprep.subr.mxu0 %v9383_v1 }
 0x58b   : > { %8956 = vmatprep.subr.mxu1 %v9383_v1  ;;  %8924 = vmatpush3.msra.mxu0 %v6123_v39  ;;  %v11019_v39 = vand.u32 4294901760, %v6988_v16  ;;  %v7115_v19 = vand.u32 4294901760, %v7114_v17  ;;  %v7127_v21 = vand.u32 4294901760, %v11016_v25 }
 0x58c   : > { %8925 = vmatprep.mubr.msk.f32.mxu0 %vm9384_vm0, %v9383_v1  ;;  %8957 = vmatpush3.msra.mxu1 %v6619_v5 }
 0x58d   : > { %8958 = vmatprep.mubr.msk.f32.mxu1 %vm9384_vm0, %v9383_v1  ;;  %8926 = vmatmul.mubr.f32.vlgmr.msra.gmra.mxu0 %v10792_v29  ;;  %v11030_v29 = vsub.f32 %v6988_v16, %v11019_v39  ;;  %v7128_v24 = vsub.f32 %v11016_v25, %v7127_v21 }
 0x58e   : > { %8939 = vmatprep.subr.mxu0 %v9383_v1  ;;  %8959 = vmatmul.mubr.f32.vlgmr.msra.gmra.mxu1 %v10900_v0 }
 0x58f   : > { %8972 = vmatprep.subr.mxu1 %v9383_v1  ;;  %8940 = vmatpush3.msra.mxu0 %v10821_v44  ;;  %v7134_v41 = vand.u32 4294901760, %v11030_v29  ;;  %v7129_v51 = vand.u32 4294901760, %v7128_v24 }
 0x590   : > { %8973 = vmatpush3.msra.mxu1 %v10821_v44  ;;  %8941 = vmatprep.subr.mxu0 %v9383_v1 }
 0x591   : > { %8974 = vmatprep.subr.mxu1 %v9383_v1  ;;  %8942 = vmatpush3.msra.mxu0 %v10828_v6 }
 0x592   : > { %8975 = vmatpush3.msra.mxu1 %v10828_v6  ;;  %8943 = vmatprep.subr.mxu0 %v9383_v1 }
 0x593   : > { %8976 = vmatprep.subr.mxu1 %v9383_v1  ;;  %8944 = vmatpush3.msra.mxu0 %v10837_v42 }
 0x594   : > { %8977 = vmatpush3.msra.mxu1 %v10837_v42  ;;  %8945 = vmatprep.subr.mxu0 %v9383_v1 }
 0x595   : > { %8978 = vmatprep.subr.mxu1 %v9383_v1  ;;  %8946 = vmatpush3.msra.mxu0 %v10847_v23 }
 0x596   : > { %8947 = vmatprep.mubr.msk.f32.mxu0 %vm9384_vm0, %v9383_v1  ;;  %8979 = vmatpush3.msra.mxu1 %v10847_v23 }
 0x597   : > { %8980 = vmatprep.mubr.msk.f32.mxu1 %vm9384_vm0, %v9383_v1  ;;  %8948 = vmatmul.mubr.f32.vlgmr.msra.gmra.mxu0 %v6563_v14 }
 0x598   : > { %8961 = vmatprep.subr.mxu0 %v9383_v1  ;;  %8981 = vmatmul.mubr.f32.vlgmr.msra.gmra.mxu1 %v6561_v10 }
 0x599   : > { %8994 = vmatprep.subr.mxu1 %v9383_v1  ;;  %8962 = vmatpush3.msra.mxu0 %v10835_v38  ;;  %v7135_v38 = vsub.f32 %v11030_v29, %v7134_v41 }
 0x59a   : > { %8995 = vmatpush3.msra.mxu1 %v10821_v44  ;;  %8963 = vmatprep.subr.mxu0 %v9383_v1  ;;  %v6985_v44 = vld [vmem:[#allocation11] sm:$0xff] }
 0x59b   : > { %8996 = vmatprep.subr.mxu1 %v9383_v1  ;;  %8964 = vmatpush3.msra.mxu0 %v10845_v47  ;;  %v11049_v37 = vand.u32 4294901760, %v6985_v44 }
 0x59c   : > { %8997 = vmatpush3.msra.mxu1 %v10828_v6  ;;  %8965 = vmatprep.subr.mxu0 %v9383_v1  ;;  %v11047_v6 = vsub.f32 %v6986_v32, %v11039_v31 }
 0x59d   : > { %8998 = vmatprep.subr.mxu1 %v9383_v1  ;;  %8966 = vmatpush3.msra.mxu0 %v10854_v36  ;;  %v11062_v47 = vsub.f32 %v6985_v44, %v11049_v37 }
 0x59e   : > { %8999 = vmatpush3.msra.mxu1 %v10837_v42  ;;  %8967 = vmatprep.subr.mxu0 %v9383_v1  ;;  %v7142_v42 = vsub.f32 %v11037_v28, %v7141_v52  ;;  %v7148_v43 = vand.u32 4294901760, %v11047_v6 }
 0x59f   : > { %9000 = vmatprep.subr.mxu1 %v9383_v1  ;;  %8968 = vmatpush3.msra.mxu0 %v10862_v50 }
 0x5a0   : > { %8969 = vmatprep.mubr.msk.f32.mxu0 %vm9384_vm0, %v9383_v1  ;;  %9001 = vmatpush3.msra.mxu1 %v10847_v23  ;;  %v7136_v23 = vand.u32 4294901760, %v7135_v38  ;;  %v7149_v36 = vsub.f32 %v11047_v6, %v7148_v43 }
 0x5a1   : > { %9002 = vmatprep.mubr.msk.f32.mxu1 %vm9384_vm0, %v9383_v1  ;;  %8970 = vmatmul.mubr.f32.vlgmr.msra.gmra.mxu0 %v6560_v9 }
 0x5a2   : > { %8983 = vmatprep.subr.mxu0 %v9383_v1  ;;  %9003 = vmatmul.mubr.f32.vlgmr.msra.gmra.mxu1 %v10900_v0  ;;  %v7150_v50 = vand.u32 4294901760, %v7149_v36 }
 0x5a3   : > { %8984 = vmatpush3.msra.mxu0 %v6596_v26  ;;  %8991 = vmatprep.mubr.msk.f32.mxu0 %vm9384_vm0, %v9383_v1  ;;  %v7143_v26 = vand.u32 4294901760, %v7142_v42 }
 0x5a4   : > { %8985 = vmatprep.subr.mxu0 %v9383_v1  ;;  %9024 = vmatprep.subr.mxu1 %v9383_v1 }
 0x5a5   : > { %8986 = vmatpush3.msra.mxu0 %v6603_v40  ;;  %9040 = vmatprep.mubr.msk.f32.mxu1 %vm9384_vm0, %v9383_v1  ;;  %v7155_v40 = vand.u32 4294901760, %v11062_v47 }
 0x5a6   : > { %8987 = vmatprep.subr.mxu0 %v9383_v1  ;;  %9025 = vmatpush3.msra.mxu1 %v7108_v22 }
 0x5a7   : > { %8988 = vmatpush3.msra.mxu0 %v6610_v2  ;;  %9026 = vmatprep.subr.mxu1 %v9383_v1  ;;  %v7156_v62 = vsub.f32 %v11062_v47, %v7155_v40 }
 0x5a8   : > { %8989 = vmatprep.subr.mxu0 %v9383_v1  ;;  %9027 = vmatpush3.msra.mxu1 %v7115_v19 }
 0x5a9   : > { %8990 = vmatpush3.msra.mxu0 %v6617_v57  ;;  %9028 = vmatprep.subr.mxu1 %v9383_v1  ;;  %v7157_v2 = vand.u32 4294901760, %v7156_v62 }
 0x5aa   : > { %8992 = vmatmul.mubr.f32.vlgmr.msra.gmra.mxu0 %v10900_v0  ;;  %9005 = vmatprep.subr.mxu0 %v9383_v1 }
 0x5ab   : > { %9021 = vmatprep.mubr.msk.f32.mxu0 %vm9384_vm0, %v9383_v1  ;;  %9006 = vmatpush3.msra.mxu0 %v10983_v53 }
 0x5ac   : > { %9007 = vmatprep.subr.mxu0 %v9383_v1  ;;  %9029 = vmatpush3.msra.mxu1 %v7122_v33 }
 0x5ad   : > { %9008 = vmatpush3.msra.mxu0 %v10988_v59  ;;  %9030 = vmatprep.subr.mxu1 %v9383_v1 }
 0x5ae   : > { %9009 = vmatprep.subr.mxu0 %v9383_v1  ;;  %9031 = vmatpush3.msra.mxu1 %v7129_v51 }
 0x5af   : > { %9010 = vmatpush3.msra.mxu0 %v10996_v7  ;;  %9032 = vmatprep.subr.mxu1 %v9383_v1 }
 0x5b0   : > { %9011 = vmatprep.subr.mxu0 %v9383_v1  ;;  %9033 = vmatpush3.msra.mxu1 %v7136_v23 }
 0x5b1   : > { %9012 = vmatpush3.msra.mxu0 %v11007_v15  ;;  %9034 = vmatprep.subr.mxu1 %v9383_v1 }
 0x5b2   : > { %9013 = vmatprep.subr.mxu0 %v9383_v1  ;;  %9035 = vmatpush3.msra.mxu1 %v7143_v26 }
 0x5b3   : > { %9014 = vmatpush3.msra.mxu0 %v11019_v39  ;;  %9036 = vmatprep.subr.mxu1 %v9383_v1 }
 0x5b4   : > { %9015 = vmatprep.subr.mxu0 %v9383_v1  ;;  %9037 = vmatpush3.msra.mxu1 %v7150_v50 }
 0x5b5   : > { %9016 = vmatpush3.msra.mxu0 %v11026_v46  ;;  %9038 = vmatprep.subr.mxu1 %v9383_v1 }
 0x5b6   : > { %9017 = vmatprep.subr.mxu0 %v9383_v1  ;;  %9039 = vmatpush3.msra.mxu1 %v7157_v2 }
 0x5b7   : > { %9018 = vmatpush3.msra.mxu0 %v11039_v31  ;;  %9062 = vmatprep.subr.mxu1 %v9383_v1 }
 0x5b8   : > { %9019 = vmatprep.subr.mxu0 %v9383_v1 }
 0x5b9   : > { %9020 = vmatpush3.msra.mxu0 %v11049_v37 }
 0x5ba   : > { %9043 = vmatprep.subr.mxu0 %v9383_v1 }
 0x614   : > { %v5674_v55 = vpop.f32.mrf.mxu1 }
 0x616   : > { %v8828_v56 = vpop.f32.mrf.mxu1 }
 0x61c   : > { %v5831_v57 = vpop.f32.mrf.mxu1 }
 0x61d   : > { %v5583_v60 = vpop.f32.mrf.mxu0 }
 0x61e   : > { %v8850_v11 = vpop.f32.mrf.mxu1  ;;  %v5675_v48 = vadd.f32 %v5674_v55, %v5583_v60 }
 0x61f   : > { %v8817_v45 = vpop.f32.mrf.mxu0 }
 0x625   : > { %v5754_v49 = vpop.f32.mrf.mxu0 }
 0x626   : > { %v5755_v0 = vadd.f32 %v5754_v49, %v5675_v48  ;;  %v5989_v4 = vpop.f32.mrf.mxu1 }
 0x627   : > { %v8839_v5 = vpop.f32.mrf.mxu0 }
 0x628   : > { %v8872_v9 = vpop.f32.mrf.mxu1  ;;  %v5832_v10 = vadd.f32 %v5831_v57, %v5755_v0 }
 0x62f   : > { %v5914_v13 = vpop.f32.mrf.mxu0 }
 0x630   : > { %v6162_v14 = vpop.f32.mrf.mxu1  ;;  %v5915_v44 = vadd.f32 %v5914_v13, %v5832_v10 }
 0x631   : > { %v8861_v34 = vpop.f32.mrf.mxu0 }
 0x632   : > { %v8894_v54 = vpop.f32.mrf.mxu1  ;;  %v5990_v26 = vadd.f32 %v5989_v4, %v5915_v44  ;;  %v7681_v4 = vld [vmem:[%s11186_s9] ss:$0 sm:$0xff] }
 0x639   : > { %v6071_v61 = vpop.f32.mrf.mxu0 }
 0x63a   : > { %v6319_v8 = vpop.f32.mrf.mxu1  ;;  %v6072_v36 = vadd.f32 %v6071_v61, %v5990_v26 }
 0x63b   : > { %v8883_v12 = vpop.f32.mrf.mxu0 }
 0x63c   : > { %v8916_v16 = vpop.f32.mrf.mxu1  ;;  %v6163_v50 = vadd.f32 %v6162_v14, %v6072_v36 }
 0x643   : > { %v6242_v22 = vpop.f32.mrf.mxu0 }
 0x644   : > { %v6477_v17 = vpop.f32.mrf.mxu1  ;;  %v6243_v55 = vadd.f32 %v6242_v22, %v6163_v50 }
 0x645   : > { %v8905_v35 = vpop.f32.mrf.mxu0 }
 0x646   : > { %v8938_v19 = vpop.f32.mrf.mxu1  ;;  %v6320_v45 = vadd.f32 %v6319_v8, %v6243_v55 }
 0x64d   : > { %v6402_v20 = vpop.f32.mrf.mxu0 }
 0x64e   : > { %v6656_v32 = vpop.f32.mrf.mxu1  ;;  %v6403_v48 = vadd.f32 %v6402_v20, %v6320_v45 }
 0x64f   : > { %v8927_v33 = vpop.f32.mrf.mxu0 }
 0x650   : > { %v8960_v24 = vpop.f32.mrf.mxu1  ;;  %v6478_v10 = vadd.f32 %v6477_v17, %v6403_v48 }
 0x657   : > { %v6565_v51 = vpop.f32.mrf.mxu0 }
 0x658   : > { %v6813_v38 = vpop.f32.mrf.mxu1  ;;  %v6657_v56 = vadd.f32 %v6656_v32, %v6565_v51 }
 0x659   : > { %v8949_v42 = vpop.f32.mrf.mxu0 }
 0x65a   : > { %v8982_v23 = vpop.f32.mrf.mxu1 }
 0x661   : > { %v6736_v62 = vpop.f32.mrf.mxu0 }
 0x662   : > { %v6971_v2 = vpop.f32.mrf.mxu1  ;;  %v6737_v11 = vadd.f32 %v6736_v62, %v6657_v56 }
 0x663   : > { %v8971_v57 = vpop.f32.mrf.mxu0 }
 0x664   : > { %v9004_v60 = vpop.f32.mrf.mxu1  ;;  %v6814_v49 = vadd.f32 %v6813_v38, %v6737_v11 }
 0x66a   : > { %v6896_v0 = vpop.f32.mrf.mxu0 }
 0x66b   : > { %v6897_v5 = vadd.f32 %v6896_v0, %v6814_v49 }
 0x66c   : > { %v8993_v9 = vpop.f32.mrf.mxu0 }
 0x66d   : > { %v6972_v13 = vadd.f32 %v6971_v2, %v6897_v5 }
 0x66f   : > { %v6975_v14 = vadd.f32 %v6972_v13, %v6478_v10 }
 0x671   : > { %v6983_v34 = vadd.f32 %v7681_v4, %v6975_v14 }
 0x673   : > { %v6984_v54 = vmax.f32 %v6983_v34, 0.0 }
 0x675   : > { %v7002_v61 = vsel %vm7000_vm5, %v6984_v54, 0 }
 0x676   : > { %v11082_v12 = vand.u32 4294901760, %v7002_v61 }
 0x678   : > { %v7078_v8 = vsub.f32 %v7002_v61, %v11082_v12  ;;  %9041 = vmatmul.mubr.f32.vlgmr.msra.gmra.mxu1 %v11082_v12 }
 0x679   : > { %9063 = vmatpush3.msra.mxu1 %v10983_v53  ;;  %9078 = vmatprep.mubr.msk.f32.mxu1 %vm9384_vm0, %v9383_v1 }
 0x67a   : > { %9064 = vmatprep.subr.mxu1 %v9383_v1  ;;  %v7079_v16 = vand.u32 4294901760, %v7078_v8 }
 0x67b   : > { %9065 = vmatpush3.msra.mxu1 %v10988_v59 }
 0x67c   : > { %9066 = vmatprep.subr.mxu1 %v9383_v1  ;;  %v7080_v22 = vsub.f32 %v7078_v8, %v7079_v16 }
 0x67d   : > { %9067 = vmatpush3.msra.mxu1 %v10996_v7 }
 0x67e   : > { %9068 = vmatprep.subr.mxu1 %v9383_v1  ;;  %v7081_v17 = vand.u32 4294901760, %v7080_v22 }
 0x67f   : > { %9069 = vmatpush3.msra.mxu1 %v11007_v15 }
 0x680   : > { %9070 = vmatprep.subr.mxu1 %v9383_v1  ;;  %9022 = vmatmul.mubr.f32.vlgmr.msra.gmra.mxu0 %v7081_v17 }
 0x681   : > { %9044 = vmatpush3.msra.mxu0 %v10986_v58  ;;  %9071 = vmatpush3.msra.mxu1 %v11019_v39 }
 0x682   : > { %9045 = vmatprep.subr.mxu0 %v9383_v1  ;;  %9072 = vmatprep.subr.mxu1 %v9383_v1 }
 0x683   : > { %9046 = vmatpush3.msra.mxu0 %v10994_v3  ;;  %9073 = vmatpush3.msra.mxu1 %v11026_v46 }
 0x684   : > { %9047 = vmatprep.subr.mxu0 %v9383_v1  ;;  %9074 = vmatprep.subr.mxu1 %v9383_v1 }
 0x685   : > { %9048 = vmatpush3.msra.mxu0 %v11005_v30  ;;  %9075 = vmatpush3.msra.mxu1 %v11039_v31 }
 0x686   : > { %9049 = vmatprep.subr.mxu0 %v9383_v1  ;;  %9076 = vmatprep.subr.mxu1 %v9383_v1 }
 0x687   : > { %9050 = vmatpush3.msra.mxu0 %v11016_v25  ;;  %9077 = vmatpush3.msra.mxu1 %v11049_v37 }
 0x688   : > { %9051 = vmatprep.subr.mxu0 %v9383_v1  ;;  %9079 = vmatmul.mubr.f32.vlgmr.msra.gmra.mxu1 %v7079_v16 }
 0x689   : > { %9100 = vmatprep.subr.mxu1 %v9383_v1  ;;  %9052 = vmatpush3.msra.mxu0 %v11030_v29 }
 0x68a   : > { %9101 = vmatpush3.msra.mxu1 %v10983_v53  ;;  %9053 = vmatprep.subr.mxu0 %v9383_v1 }
 0x68b   : > { %9102 = vmatprep.subr.mxu1 %v9383_v1  ;;  %9054 = vmatpush3.msra.mxu0 %v11037_v28 }
 0x68c   : > { %9103 = vmatpush3.msra.mxu1 %v10988_v59  ;;  %9055 = vmatprep.subr.mxu0 %v9383_v1 }
 0x68d   : > { %9104 = vmatprep.subr.mxu1 %v9383_v1  ;;  %9056 = vmatpush3.msra.mxu0 %v11047_v6 }
 0x68e   : > { %9105 = vmatpush3.msra.mxu1 %v10996_v7  ;;  %9057 = vmatprep.subr.mxu0 %v9383_v1 }
 0x68f   : > { %9106 = vmatprep.subr.mxu1 %v9383_v1  ;;  %9058 = vmatpush3.msra.mxu0 %v11062_v47 }
 0x690   : > { %9059 = vmatprep.mubr.msk.f32.mxu0 %vm9384_vm0, %v9383_v1  ;;  %9107 = vmatpush3.msra.mxu1 %v11007_v15  ;;  %v7682_v15 = vld [vmem:[%s11188_s11] ss:$0 sm:$0xff] }
 0x691   : > { %9060 = vmatmul.mubr.f32.vlgmr.msra.gmra.mxu0 %v7078_v8  ;;  %9081 = vmatprep.subr.mxu0 %v9383_v1 }
 0x692   : > { %9108 = vmatprep.subr.mxu1 %v9383_v1  ;;  %9082 = vmatpush3.msra.mxu0 %v7106_v63 }
 0x693   : > { %9109 = vmatpush3.msra.mxu1 %v11019_v39  ;;  %9083 = vmatprep.subr.mxu0 %v9383_v1 }
 0x694   : > { %9110 = vmatprep.subr.mxu1 %v9383_v1  ;;  %9084 = vmatpush3.msra.mxu0 %v7113_v27 }
 0x695   : > { %9111 = vmatpush3.msra.mxu1 %v11026_v46  ;;  %9085 = vmatprep.subr.mxu0 %v9383_v1 }
 0x696   : > { %9112 = vmatprep.subr.mxu1 %v9383_v1  ;;  %9086 = vmatpush3.msra.mxu0 %v7120_v18 }
 0x697   : > { %9113 = vmatpush3.msra.mxu1 %v11039_v31  ;;  %9087 = vmatprep.subr.mxu0 %v9383_v1 }
 0x698   : > { %9114 = vmatprep.subr.mxu1 %v9383_v1  ;;  %9088 = vmatpush3.msra.mxu0 %v7127_v21 }
 0x699   : > { %9115 = vmatpush3.msra.mxu1 %v11049_v37  ;;  %9116 = vmatprep.mubr.msk.f32.mxu1 %vm9384_vm0, %v9383_v1 }
 0x69a   : > { %9089 = vmatprep.subr.mxu0 %v9383_v1  ;;  %9117 = vmatmul.mubr.f32.vlgmr.msra.gmra.mxu1 %v11082_v12 }
 0x69b   : > { %9090 = vmatpush3.msra.mxu0 %v7134_v41  ;;  %9097 = vmatprep.mubr.msk.f32.mxu0 %vm9384_vm0, %v9383_v1 }
 0x69c   : > { %9091 = vmatprep.subr.mxu0 %v9383_v1 }
 0x69d   : > { %9092 = vmatpush3.msra.mxu0 %v7141_v52 }
 0x69e   : > { %9093 = vmatprep.subr.mxu0 %v9383_v1 }
 0x69f   : > { %9094 = vmatpush3.msra.mxu0 %v7148_v43 }
 0x6a0   : > { %9095 = vmatprep.subr.mxu0 %v9383_v1 }
 0x6a1   : > { %9096 = vmatpush3.msra.mxu0 %v7155_v40 }
 0x6a2   : > { %9098 = vmatmul.mubr.f32.vlgmr.msra.gmra.mxu0 %v11082_v12 }
 0x738   : > { %v7194_v53 = vpop.f32.mrf.mxu1 }
 0x73a   : > { %v9042_v58 = vpop.f32.mrf.mxu1 }
 0x740   : > { %v7083_v59 = vpop.f32.mrf.mxu0 }
 0x741   : > { %v7084_v18 = vadd.f32 %v7682_v15, %v7083_v59 }
 0x742   : > { %v9023_v63 = vpop.f32.mrf.mxu0 }
 0x743   : > { %v7195_v25 = vadd.f32 %v7194_v53, %v7084_v18 }
 0x748   : > { %v7363_v3 = vpop.f32.mrf.mxu1 }
 0x74a   : > { %v9080_v7 = vpop.f32.mrf.mxu1 }
 0x751   : > { %v7282_v27 = vpop.f32.mrf.mxu0 }
 0x752   : > { %v7283_v21 = vadd.f32 %v7282_v27, %v7195_v25 }
 0x753   : > { %v9061_v30 = vpop.f32.mrf.mxu0 }
 0x754   : > { %v7364_v46 = vadd.f32 %v7363_v3, %v7283_v21 }
 0x75a   : > { %v7537_v1 = vpop.f32.mrf.mxu1 }
 0x75c   : > { %v9118_v39 = vpop.f32.mrf.mxu1 }
 0x762   : > { %v7458_v29 = vpop.f32.mrf.mxu0 }
 0x763   : > { %v7459_v28 = vadd.f32 %v7458_v29, %v7364_v46 }
 0x764   : > { %v9099_v31 = vpop.f32.mrf.mxu0 }
 0x765   : > { %v7538_v41 = vadd.f32 %v7537_v1, %v7459_v28 }
 0x767   : > { %7541 = vst [vmem:[%s496_s28] sm:$0xff] %v7538_v41 }
 0x768 PF: > { %s26_s21 = sadd.s32 1, %s9372_s21  }
 0x769   : > { %p23_p2 = scmp.ge.s32.totalorder %s26_s21, 4  }
 0x76b   :  { %25 = sbr.rel (!%p23_p2) target bundleno = 4 (0x4), region = 131 }
 0x770   :  { %7561 = vsyncpa [#allocation4], 1 }
 0x771   :  { %7563 = vsyncpa [#allocation4 + $0x1], 1 }
 0x772   :  { %7564 = vsyncpa [#allocation6], 1 }
 0x773   :  { %7565 = vsyncpa [#allocation9], 1 }
 0x774   :  { %7566 = vsyncpa [#allocation12], 1 }

</bundles_post_ra>
